<compile_context>
chip_gen: v7x
topology: tpu7x:2x2x1
jax: 0.10.0
libtpu: 0.0.40
codegen_flags: <defaults>
</compile_context>

<pallas_src>
import jax
import jax.numpy as jnp
from jax.experimental import pallas as pl
from jax.experimental.pallas import tpu as pltpu

# Flat-layout widths (all positions use the "32-wide grid" coordinate p = 32*h + w).
LX = 1280   # padded input width: 1024 valid + margin for shifts (max 4*32+4 = 132)
L1 = 1088   # conv1 output width  (needs >= 1024 + 33 for the pool1 window max)
L1M = 1024  # pool1 window-max width (needs >= 640 + 264 for conv2 patch slices)
L2 = 640    # conv2 output width  (needs >= 544 + 66 for the pool2 window max)
L2M = 544   # pool2 window-max width (valid pooled positions live at 128*ph + 4*pw <= 528)


# ----------------------------- fused kernel -------------------------------- #

def _net_kernel(x_ref, w1_ref, b1_ref, w2_ref, b2_ref, sel_ref, wf1_ref,
                bf1_ref, wf2_ref, bf2_ref, wf3_ref, bf3_ref, out_ref):
    f32, bf16 = jnp.float32, jnp.bfloat16

    x = x_ref[0]                                                   # (8, LX) f32 (ch 3..7 = 0)

    # ---- conv1 + bias + ReLU: im2col built in VMEM, one MXU GEMM, K padded to 256
    slabs = [x[:, 32 * kh + kw: 32 * kh + kw + L1]
             for kh in range(5) for kw in range(5)]                # 25 x (8, L1)
    slabs.append(jnp.zeros((56, L1), f32))
    p1 = jnp.concatenate(slabs, axis=0).astype(bf16)               # (256, L1)
    y1 = jnp.dot(w1_ref[...], p1, preferred_element_type=f32)      # (8, L1) lane-dense
    y1 = jnp.maximum(y1 + b1_ref[...], 0.0)

    # ---- pool1 (2x2, stride 2), fused: 4-way shifted window max; decimation is
    #      deferred (absorbed into conv2's doubled patch strides).
    y1m = jnp.maximum(jnp.maximum(y1[:, 0:L1M], y1[:, 1:L1M + 1]),
                      jnp.maximum(y1[:, 32:L1M + 32], y1[:, 33:L1M + 33]))  # (8, L1M)

    # ---- conv2 + bias + ReLU (patch strides 64 / 2 absorb the pool1 decimation)
    slabs2 = [y1m[:, 64 * kh + 2 * kw: 64 * kh + 2 * kw + L2]
              for kh in range(5) for kw in range(5)]               # 25 x (8, L2)
    slabs2.append(jnp.zeros((56, L2), f32))
    p2 = jnp.concatenate(slabs2, axis=0).astype(bf16)              # (256, L2)
    y2 = jnp.dot(w2_ref[...], p2, preferred_element_type=f32)      # (16, L2)
    y2 = jnp.maximum(y2 + b2_ref[...], 0.0)

    # ---- pool2 (strides doubled once more: +2 lanes / +64 lanes)
    y2m = jnp.maximum(jnp.maximum(y2[:, 0:L2M], y2[:, 2:L2M + 2]),
                      jnp.maximum(y2[:, 64:L2M + 64], y2[:, 66:L2M + 66]))  # (16, L2M)

    # ---- gather the valid 16x5x5 pooled activations with a constant 0/1 selection GEMM
    feat = jnp.dot(y2m, sel_ref[...], preferred_element_type=f32)  # (16, 128); cols>=25 are 0

    # ---- fc1 + ReLU: sum of per-channel (1,128)@(128,120) partials (all in VMEM)
    h = bf1_ref[...]                                               # (1, 120) bias
    for c in range(16):
        h = h + jnp.dot(feat[c:c + 1, :].astype(bf16), wf1_ref[c],
                        preferred_element_type=f32)
    h = jnp.maximum(h, 0.0)                                        # (1, 120)

    # ---- fc2 + ReLU, fc3 (fused; intermediates never leave the kernel)
    h = jnp.maximum(jnp.dot(h.astype(bf16), wf2_ref[...],
                            preferred_element_type=f32) + bf2_ref[...], 0.0)   # (1, 84)
    h = jnp.dot(h.astype(bf16), wf3_ref[...],
                preferred_element_type=f32) + bf3_ref[...]                      # (1, 10)
    out_ref[0] = h.astype(out_ref.dtype)


# --------------------------- host-side plumbing ----------------------------- #

def _const_spec(shape):
    zero = (0,) * len(shape)
    return pl.BlockSpec(shape, lambda i, _z=zero: _z)


def prepare_operands(params):
    """Repack torch-layout params into MXU-friendly, zero-padded operands."""
    f32, bf16 = jnp.float32, jnp.bfloat16

    # conv1: (6,3,5,5) -> (8,256) bf16, column order ((kh*5+kw)*8 + c), zero padded.
    w1 = jnp.transpose(params["conv1_w"], (0, 2, 3, 1))             # (6,5,5,3)
    w1 = jnp.pad(w1, ((0, 2), (0, 0), (0, 0), (0, 5)))              # (8,5,5,8)
    w1 = jnp.pad(w1.reshape(8, 200), ((0, 0), (0, 56))).astype(bf16)
    b1 = jnp.pad(params["conv1_b"], (0, 2)).reshape(8, 1).astype(f32)

    # conv2: (16,6,5,5) -> (16,256) bf16.
    w2 = jnp.transpose(params["conv2_w"], (0, 2, 3, 1))             # (16,5,5,6)
    w2 = jnp.pad(w2, ((0, 0), (0, 0), (0, 0), (0, 2)))              # (16,5,5,8)
    w2 = jnp.pad(w2.reshape(16, 200), ((0, 0), (0, 56))).astype(bf16)
    b2 = params["conv2_b"].reshape(16, 1).astype(f32)

    # 0/1 selection matrix: pooled2[ph,pw] lives at flat position 128*ph + 4*pw.
    s = jnp.arange(25)
    q = 128 * (s // 5) + 4 * (s % 5)
    sel = jnp.zeros((L2M, 128), f32).at[q, s].set(1.0)              # (544, 128)

    # fc1: (120,400) -> (16,128,120); wf1[c, s, j] = W[j, c*25 + s] (s<25), zero padded.
    wf1 = params["fc1_w"].T.reshape(16, 25, 120)
    wf1 = jnp.pad(wf1, ((0, 0), (0, 103), (0, 0))).astype(bf16)
    bf1 = params["fc1_b"].reshape(1, 120).astype(f32)
    wf2 = params["fc2_w"].T.astype(bf16)                            # (120, 84)
    bf2 = params["fc2_b"].reshape(1, 84).astype(f32)
    wf3 = params["fc3_w"].T.astype(bf16)                            # (84, 10)
    bf3 = params["fc3_b"].reshape(1, 10).astype(f32)
    return (w1, b1, w2, b2, sel, wf1, bf1, wf2, bf2, wf3, bf3)


def net_forward(params, x):
    """x: (N, 3, 32, 32) float32 -> (N, 10) float32. Whole net = one pallas_call."""
    n = x.shape[0]
    ops = prepare_operands(params)

    # Flatten spatial (free reshape) and zero-pad channels->8, lanes->LX.
    xp = jnp.pad(x.reshape(n, 3, 1024), ((0, 0), (0, 5), (0, LX - 1024)))   # (n, 8, LX)

    in_specs = [pl.BlockSpec((1, 8, LX), lambda i: (i, 0, 0))]
    in_specs += [_const_spec(o.shape) for o in ops]                 # weights: loaded once

    out = pl.pallas_call(
        _net_kernel,
        out_shape=jax.ShapeDtypeStruct((n, 1, 10), jnp.float32),
        grid=(n,),
        in_specs=in_specs,
        out_specs=pl.BlockSpec((1, 1, 10), lambda i: (i, 0, 0)),
        compiler_params=pltpu.CompilerParams(
            dimension_semantics=("parallel",),
            vmem_limit_bytes=32 * 1024 * 1024),
    )(xp, *ops)
    return out.reshape(n, 10)


# ------------------------------ params ------------------------------------- #

def init_params(key):
    ks = jax.random.split(key, 10)

    def u(k, shape, fan_in):
        bound = 1.0 / float(fan_in) ** 0.5
        return jax.random.uniform(k, shape, jnp.float32, -bound, bound)

    return {
        "conv1_w": u(ks[0], (6, 3, 5, 5), 3 * 25),
        "conv1_b": u(ks[1], (6,), 3 * 25),
        "conv2_w": u(ks[2], (16, 6, 5, 5), 6 * 25),
        "conv2_b": u(ks[3], (16,), 6 * 25),
        "fc1_w":   u(ks[4], (120, 400), 400),
        "fc1_b":   u(ks[5], (120,), 400),
        "fc2_w":   u(ks[6], (84, 120), 120),
        "fc2_b":   u(ks[7], (84,), 120),
        "fc3_w":   u(ks[8], (10, 84), 84),
        "fc3_b":   u(ks[9], (10,), 84),
    }


if __name__ == "__main__":
    key = jax.random.PRNGKey(0)
    pkey, xkey = jax.random.split(key)
    params = init_params(pkey)
    # CIFAR10 input: batch=2, 3 channels, 32x32 (required by the 16*5*5 flatten).
    x = jax.random.normal(xkey, (2, 3, 32, 32), dtype=jnp.float32)

    out = jax.jit(net_forward)(params, x)
    out = jax.block_until_ready(out)
    assert out.shape == (2, 10), out.shape
    assert out.dtype == jnp.float32
    print("KERNEL_OK")
</pallas_src>

<mosaic_0001>
module attributes {stable_mosaic.version = 11 : i64} {
  func.func @_net_kernel(%arg0: i32, %arg1: memref<1x8x1280xf32, #tpu.memory_space<vmem>>, %arg2: memref<8x256xbf16, #tpu.memory_space<vmem>>, %arg3: memref<8x1xf32, #tpu.memory_space<vmem>>, %arg4: memref<16x256xbf16, #tpu.memory_space<vmem>>, %arg5: memref<16x1xf32, #tpu.memory_space<vmem>>, %arg6: memref<544x128xf32, #tpu.memory_space<vmem>>, %arg7: memref<16x128x120xbf16, #tpu.memory_space<vmem>>, %arg8: memref<1x120xf32, #tpu.memory_space<vmem>>, %arg9: memref<120x84xbf16, #tpu.memory_space<vmem>>, %arg10: memref<1x84xf32, #tpu.memory_space<vmem>>, %arg11: memref<84x10xbf16, #tpu.memory_space<vmem>>, %arg12: memref<1x10xf32, #tpu.memory_space<vmem>>, %arg13: memref<1x1x10xf32, #tpu.memory_space<vmem>>) attributes {dimension_semantics = [#tpu.dimension_semantics<parallel>], iteration_bounds = array<i64: 2>, scalar_prefetch = 0 : i64, scratch_operands = 0 : i64, tpu.core_type = #tpu.core_type<tc>, window_params = [{transform_indices = @transform_0, window_bounds = array<i64: 1, 8, 1280>}, {pipeline_mode = #tpu.pipeline_mode<synchronous>, transform_indices = @transform_1, window_bounds = array<i64: 8, 256>}, {pipeline_mode = #tpu.pipeline_mode<synchronous>, transform_indices = @transform_2, window_bounds = array<i64: 8, 1>}, {pipeline_mode = #tpu.pipeline_mode<synchronous>, transform_indices = @transform_3, window_bounds = array<i64: 16, 256>}, {pipeline_mode = #tpu.pipeline_mode<synchronous>, transform_indices = @transform_4, window_bounds = array<i64: 16, 1>}, {pipeline_mode = #tpu.pipeline_mode<synchronous>, transform_indices = @transform_5, window_bounds = array<i64: 544, 128>}, {pipeline_mode = #tpu.pipeline_mode<synchronous>, transform_indices = @transform_6, window_bounds = array<i64: 16, 128, 120>}, {pipeline_mode = #tpu.pipeline_mode<synchronous>, transform_indices = @transform_7, window_bounds = array<i64: 1, 120>}, {pipeline_mode = #tpu.pipeline_mode<synchronous>, transform_indices = @transform_8, window_bounds = array<i64: 120, 84>}, {pipeline_mode = #tpu.pipeline_mode<synchronous>, transform_indices = @transform_9, window_bounds = array<i64: 1, 84>}, {pipeline_mode = #tpu.pipeline_mode<synchronous>, transform_indices = @transform_10, window_bounds = array<i64: 84, 10>}, {pipeline_mode = #tpu.pipeline_mode<synchronous>, transform_indices = @transform_11, window_bounds = array<i64: 1, 10>}, {transform_indices = @transform_12, window_bounds = array<i64: 1, 1, 10>}]} {
    %c0 = arith.constant 0 : index
    %c0_0 = arith.constant 0 : index
    %c0_1 = arith.constant 0 : index
    %0 = vector.load %arg1[%c0, %c0_0, %c0_1] : memref<1x8x1280xf32, #tpu.memory_space<vmem>>, vector<1x8x1280xf32>
    %1 = vector.shape_cast %0 : vector<1x8x1280xf32> to vector<8x1280xf32>
    %2 = vector.extract_strided_slice %1 {offsets = [0, 0], sizes = [8, 1088], strides = [1, 1]} : vector<8x1280xf32> to vector<8x1088xf32>
    %3 = vector.extract_strided_slice %1 {offsets = [0, 1], sizes = [8, 1088], strides = [1, 1]} : vector<8x1280xf32> to vector<8x1088xf32>
    %4 = vector.extract_strided_slice %1 {offsets = [0, 2], sizes = [8, 1088], strides = [1, 1]} : vector<8x1280xf32> to vector<8x1088xf32>
    %5 = vector.extract_strided_slice %1 {offsets = [0, 3], sizes = [8, 1088], strides = [1, 1]} : vector<8x1280xf32> to vector<8x1088xf32>
    %6 = vector.extract_strided_slice %1 {offsets = [0, 4], sizes = [8, 1088], strides = [1, 1]} : vector<8x1280xf32> to vector<8x1088xf32>
    %7 = vector.extract_strided_slice %1 {offsets = [0, 32], sizes = [8, 1088], strides = [1, 1]} : vector<8x1280xf32> to vector<8x1088xf32>
    %8 = vector.extract_strided_slice %1 {offsets = [0, 33], sizes = [8, 1088], strides = [1, 1]} : vector<8x1280xf32> to vector<8x1088xf32>
    %9 = vector.extract_strided_slice %1 {offsets = [0, 34], sizes = [8, 1088], strides = [1, 1]} : vector<8x1280xf32> to vector<8x1088xf32>
    %10 = vector.extract_strided_slice %1 {offsets = [0, 35], sizes = [8, 1088], strides = [1, 1]} : vector<8x1280xf32> to vector<8x1088xf32>
    %11 = vector.extract_strided_slice %1 {offsets = [0, 36], sizes = [8, 1088], strides = [1, 1]} : vector<8x1280xf32> to vector<8x1088xf32>
    %12 = vector.extract_strided_slice %1 {offsets = [0, 64], sizes = [8, 1088], strides = [1, 1]} : vector<8x1280xf32> to vector<8x1088xf32>
    %13 = vector.extract_strided_slice %1 {offsets = [0, 65], sizes = [8, 1088], strides = [1, 1]} : vector<8x1280xf32> to vector<8x1088xf32>
    %14 = vector.extract_strided_slice %1 {offsets = [0, 66], sizes = [8, 1088], strides = [1, 1]} : vector<8x1280xf32> to vector<8x1088xf32>
    %15 = vector.extract_strided_slice %1 {offsets = [0, 67], sizes = [8, 1088], strides = [1, 1]} : vector<8x1280xf32> to vector<8x1088xf32>
    %16 = vector.extract_strided_slice %1 {offsets = [0, 68], sizes = [8, 1088], strides = [1, 1]} : vector<8x1280xf32> to vector<8x1088xf32>
    %17 = vector.extract_strided_slice %1 {offsets = [0, 96], sizes = [8, 1088], strides = [1, 1]} : vector<8x1280xf32> to vector<8x1088xf32>
    %18 = vector.extract_strided_slice %1 {offsets = [0, 97], sizes = [8, 1088], strides = [1, 1]} : vector<8x1280xf32> to vector<8x1088xf32>
    %19 = vector.extract_strided_slice %1 {offsets = [0, 98], sizes = [8, 1088], strides = [1, 1]} : vector<8x1280xf32> to vector<8x1088xf32>
    %20 = vector.extract_strided_slice %1 {offsets = [0, 99], sizes = [8, 1088], strides = [1, 1]} : vector<8x1280xf32> to vector<8x1088xf32>
    %21 = vector.extract_strided_slice %1 {offsets = [0, 100], sizes = [8, 1088], strides = [1, 1]} : vector<8x1280xf32> to vector<8x1088xf32>
    %22 = vector.extract_strided_slice %1 {offsets = [0, 128], sizes = [8, 1088], strides = [1, 1]} : vector<8x1280xf32> to vector<8x1088xf32>
    %23 = vector.extract_strided_slice %1 {offsets = [0, 129], sizes = [8, 1088], strides = [1, 1]} : vector<8x1280xf32> to vector<8x1088xf32>
    %24 = vector.extract_strided_slice %1 {offsets = [0, 130], sizes = [8, 1088], strides = [1, 1]} : vector<8x1280xf32> to vector<8x1088xf32>
    %25 = vector.extract_strided_slice %1 {offsets = [0, 131], sizes = [8, 1088], strides = [1, 1]} : vector<8x1280xf32> to vector<8x1088xf32>
    %26 = vector.extract_strided_slice %1 {offsets = [0, 132], sizes = [8, 1088], strides = [1, 1]} : vector<8x1280xf32> to vector<8x1088xf32>
    %cst = arith.constant 0.000000e+00 : f32
    %27 = vector.broadcast %cst : f32 to vector<56x1088xf32>
    %28 = tpu.concatenate %2, %3, %4, %5, %6, %7, %8, %9, %10, %11, %12, %13, %14, %15, %16, %17 in 0 : vector<8x1088xf32>, vector<8x1088xf32>, vector<8x1088xf32>, vector<8x1088xf32>, vector<8x1088xf32>, vector<8x1088xf32>, vector<8x1088xf32>, vector<8x1088xf32>, vector<8x1088xf32>, vector<8x1088xf32>, vector<8x1088xf32>, vector<8x1088xf32>, vector<8x1088xf32>, vector<8x1088xf32>, vector<8x1088xf32>, vector<8x1088xf32> -> vector<128x1088xf32>
    %29 = tpu.concatenate %18, %19, %20, %21, %22, %23, %24, %25, %26, %27 in 0 : vector<8x1088xf32>, vector<8x1088xf32>, vector<8x1088xf32>, vector<8x1088xf32>, vector<8x1088xf32>, vector<8x1088xf32>, vector<8x1088xf32>, vector<8x1088xf32>, vector<8x1088xf32>, vector<56x1088xf32> -> vector<128x1088xf32>
    %30 = tpu.concatenate %28, %29 in 0 : vector<128x1088xf32>, vector<128x1088xf32> -> vector<256x1088xf32>
    %31 = arith.truncf %30 : vector<256x1088xf32> to vector<256x1088xbf16>
    %c0_2 = arith.constant 0 : index
    %c0_3 = arith.constant 0 : index
    %32 = vector.load %arg2[%c0_2, %c0_3] : memref<8x256xbf16, #tpu.memory_space<vmem>>, vector<8x256xbf16>
    %cst_4 = arith.constant dense<0.000000e+00> : vector<8x1088xf32>
    %33 = tpu.matmul %32, %31, %cst_4 {dimension_numbers = #tpu.dot_dimension_numbers<[1], [0], [0], [1], [0, 0, 1, 1], [], []>} : vector<8x256xbf16>, vector<256x1088xbf16>, vector<8x1088xf32> -> vector<8x1088xf32>
    %c0_5 = arith.constant 0 : index
    %c0_6 = arith.constant 0 : index
    %34 = vector.load %arg3[%c0_5, %c0_6] : memref<8x1xf32, #tpu.memory_space<vmem>>, vector<8x1xf32>
    %35 = vector.broadcast %34 : vector<8x1xf32> to vector<8x1088xf32>
    %36 = arith.addf %33, %35 : vector<8x1088xf32>
    %cst_7 = arith.constant 0.000000e+00 : f32
    %37 = vector.broadcast %cst_7 : f32 to vector<8x1088xf32>
    %38 = arith.maximumf %36, %37 : vector<8x1088xf32>
    %39 = vector.extract_strided_slice %38 {offsets = [0, 0], sizes = [8, 1024], strides = [1, 1]} : vector<8x1088xf32> to vector<8x1024xf32>
    %40 = vector.extract_strided_slice %38 {offsets = [0, 1], sizes = [8, 1024], strides = [1, 1]} : vector<8x1088xf32> to vector<8x1024xf32>
    %41 = arith.maximumf %39, %40 : vector<8x1024xf32>
    %42 = vector.extract_strided_slice %38 {offsets = [0, 32], sizes = [8, 1024], strides = [1, 1]} : vector<8x1088xf32> to vector<8x1024xf32>
    %43 = vector.extract_strided_slice %38 {offsets = [0, 33], sizes = [8, 1024], strides = [1, 1]} : vector<8x1088xf32> to vector<8x1024xf32>
    %44 = arith.maximumf %42, %43 : vector<8x1024xf32>
    %45 = arith.maximumf %41, %44 : vector<8x1024xf32>
    %46 = vector.extract_strided_slice %45 {offsets = [0, 0], sizes = [8, 640], strides = [1, 1]} : vector<8x1024xf32> to vector<8x640xf32>
    %47 = vector.extract_strided_slice %45 {offsets = [0, 2], sizes = [8, 640], strides = [1, 1]} : vector<8x1024xf32> to vector<8x640xf32>
    %48 = vector.extract_strided_slice %45 {offsets = [0, 4], sizes = [8, 640], strides = [1, 1]} : vector<8x1024xf32> to vector<8x640xf32>
    %49 = vector.extract_strided_slice %45 {offsets = [0, 6], sizes = [8, 640], strides = [1, 1]} : vector<8x1024xf32> to vector<8x640xf32>
    %50 = vector.extract_strided_slice %45 {offsets = [0, 8], sizes = [8, 640], strides = [1, 1]} : vector<8x1024xf32> to vector<8x640xf32>
    %51 = vector.extract_strided_slice %45 {offsets = [0, 64], sizes = [8, 640], strides = [1, 1]} : vector<8x1024xf32> to vector<8x640xf32>
    %52 = vector.extract_strided_slice %45 {offsets = [0, 66], sizes = [8, 640], strides = [1, 1]} : vector<8x1024xf32> to vector<8x640xf32>
    %53 = vector.extract_strided_slice %45 {offsets = [0, 68], sizes = [8, 640], strides = [1, 1]} : vector<8x1024xf32> to vector<8x640xf32>
    %54 = vector.extract_strided_slice %45 {offsets = [0, 70], sizes = [8, 640], strides = [1, 1]} : vector<8x1024xf32> to vector<8x640xf32>
    %55 = vector.extract_strided_slice %45 {offsets = [0, 72], sizes = [8, 640], strides = [1, 1]} : vector<8x1024xf32> to vector<8x640xf32>
    %56 = vector.extract_strided_slice %45 {offsets = [0, 128], sizes = [8, 640], strides = [1, 1]} : vector<8x1024xf32> to vector<8x640xf32>
    %57 = vector.extract_strided_slice %45 {offsets = [0, 130], sizes = [8, 640], strides = [1, 1]} : vector<8x1024xf32> to vector<8x640xf32>
    %58 = vector.extract_strided_slice %45 {offsets = [0, 132], sizes = [8, 640], strides = [1, 1]} : vector<8x1024xf32> to vector<8x640xf32>
    %59 = vector.extract_strided_slice %45 {offsets = [0, 134], sizes = [8, 640], strides = [1, 1]} : vector<8x1024xf32> to vector<8x640xf32>
    %60 = vector.extract_strided_slice %45 {offsets = [0, 136], sizes = [8, 640], strides = [1, 1]} : vector<8x1024xf32> to vector<8x640xf32>
    %61 = vector.extract_strided_slice %45 {offsets = [0, 192], sizes = [8, 640], strides = [1, 1]} : vector<8x1024xf32> to vector<8x640xf32>
    %62 = vector.extract_strided_slice %45 {offsets = [0, 194], sizes = [8, 640], strides = [1, 1]} : vector<8x1024xf32> to vector<8x640xf32>
    %63 = vector.extract_strided_slice %45 {offsets = [0, 196], sizes = [8, 640], strides = [1, 1]} : vector<8x1024xf32> to vector<8x640xf32>
    %64 = vector.extract_strided_slice %45 {offsets = [0, 198], sizes = [8, 640], strides = [1, 1]} : vector<8x1024xf32> to vector<8x640xf32>
    %65 = vector.extract_strided_slice %45 {offsets = [0, 200], sizes = [8, 640], strides = [1, 1]} : vector<8x1024xf32> to vector<8x640xf32>
    %66 = vector.extract_strided_slice %45 {offsets = [0, 256], sizes = [8, 640], strides = [1, 1]} : vector<8x1024xf32> to vector<8x640xf32>
    %67 = vector.extract_strided_slice %45 {offsets = [0, 258], sizes = [8, 640], strides = [1, 1]} : vector<8x1024xf32> to vector<8x640xf32>
    %68 = vector.extract_strided_slice %45 {offsets = [0, 260], sizes = [8, 640], strides = [1, 1]} : vector<8x1024xf32> to vector<8x640xf32>
    %69 = vector.extract_strided_slice %45 {offsets = [0, 262], sizes = [8, 640], strides = [1, 1]} : vector<8x1024xf32> to vector<8x640xf32>
    %70 = vector.extract_strided_slice %45 {offsets = [0, 264], sizes = [8, 640], strides = [1, 1]} : vector<8x1024xf32> to vector<8x640xf32>
    %cst_8 = arith.constant 0.000000e+00 : f32
    %71 = vector.broadcast %cst_8 : f32 to vector<56x640xf32>
    %72 = tpu.concatenate %46, %47, %48, %49, %50, %51, %52, %53, %54, %55, %56, %57, %58, %59, %60, %61 in 0 : vector<8x640xf32>, vector<8x640xf32>, vector<8x640xf32>, vector<8x640xf32>, vector<8x640xf32>, vector<8x640xf32>, vector<8x640xf32>, vector<8x640xf32>, vector<8x640xf32>, vector<8x640xf32>, vector<8x640xf32>, vector<8x640xf32>, vector<8x640xf32>, vector<8x640xf32>, vector<8x640xf32>, vector<8x640xf32> -> vector<128x640xf32>
    %73 = tpu.concatenate %62, %63, %64, %65, %66, %67, %68, %69, %70, %71 in 0 : vector<8x640xf32>, vector<8x640xf32>, vector<8x640xf32>, vector<8x640xf32>, vector<8x640xf32>, vector<8x640xf32>, vector<8x640xf32>, vector<8x640xf32>, vector<8x640xf32>, vector<56x640xf32> -> vector<128x640xf32>
    %74 = tpu.concatenate %72, %73 in 0 : vector<128x640xf32>, vector<128x640xf32> -> vector<256x640xf32>
    %75 = arith.truncf %74 : vector<256x640xf32> to vector<256x640xbf16>
    %c0_9 = arith.constant 0 : index
    %c0_10 = arith.constant 0 : index
    %76 = vector.load %arg4[%c0_9, %c0_10] : memref<16x256xbf16, #tpu.memory_space<vmem>>, vector<16x256xbf16>
    %cst_11 = arith.constant dense<0.000000e+00> : vector<16x640xf32>
    %77 = tpu.matmul %76, %75, %cst_11 {dimension_numbers = #tpu.dot_dimension_numbers<[1], [0], [0], [1], [0, 0, 1, 1], [], []>} : vector<16x256xbf16>, vector<256x640xbf16>, vector<16x640xf32> -> vector<16x640xf32>
    %c0_12 = arith.constant 0 : index
    %c0_13 = arith.constant 0 : index
    %78 = vector.load %arg5[%c0_12, %c0_13] : memref<16x1xf32, #tpu.memory_space<vmem>>, vector<16x1xf32>
    %79 = vector.broadcast %78 : vector<16x1xf32> to vector<16x640xf32>
    %80 = arith.addf %77, %79 : vector<16x640xf32>
    %cst_14 = arith.constant 0.000000e+00 : f32
    %81 = vector.broadcast %cst_14 : f32 to vector<16x640xf32>
    %82 = arith.maximumf %80, %81 : vector<16x640xf32>
    %83 = vector.extract_strided_slice %82 {offsets = [0, 0], sizes = [16, 544], strides = [1, 1]} : vector<16x640xf32> to vector<16x544xf32>
    %84 = vector.extract_strided_slice %82 {offsets = [0, 2], sizes = [16, 544], strides = [1, 1]} : vector<16x640xf32> to vector<16x544xf32>
    %85 = arith.maximumf %83, %84 : vector<16x544xf32>
    %86 = vector.extract_strided_slice %82 {offsets = [0, 64], sizes = [16, 544], strides = [1, 1]} : vector<16x640xf32> to vector<16x544xf32>
    %87 = vector.extract_strided_slice %82 {offsets = [0, 66], sizes = [16, 544], strides = [1, 1]} : vector<16x640xf32> to vector<16x544xf32>
    %88 = arith.maximumf %86, %87 : vector<16x544xf32>
    %89 = arith.maximumf %85, %88 : vector<16x544xf32>
    %c0_15 = arith.constant 0 : index
    %c0_16 = arith.constant 0 : index
    %90 = vector.load %arg6[%c0_15, %c0_16] : memref<544x128xf32, #tpu.memory_space<vmem>>, vector<544x128xf32>
    %cst_17 = arith.constant dense<0.000000e+00> : vector<16x128xf32>
    %91 = tpu.matmul %89, %90, %cst_17 {dimension_numbers = #tpu.dot_dimension_numbers<[1], [0], [0], [1], [0, 0, 1, 1], [], []>} : vector<16x544xf32>, vector<544x128xf32>, vector<16x128xf32> -> vector<16x128xf32>
    %c0_18 = arith.constant 0 : index
    %c0_19 = arith.constant 0 : index
    %92 = vector.load %arg8[%c0_18, %c0_19] : memref<1x120xf32, #tpu.memory_space<vmem>>, vector<1x120xf32>
    %93 = vector.extract_strided_slice %91 {offsets = [0, 0], sizes = [1, 128], strides = [1, 1]} : vector<16x128xf32> to vector<1x128xf32>
    %94 = arith.truncf %93 : vector<1x128xf32> to vector<1x128xbf16>
    %c0_20 = arith.constant 0 : index
    %c0_21 = arith.constant 0 : index
    %c0_22 = arith.constant 0 : index
    %95 = vector.load %arg7[%c0_20, %c0_21, %c0_22] : memref<16x128x120xbf16, #tpu.memory_space<vmem>>, vector<1x128x120xbf16>
    %96 = vector.shape_cast %95 : vector<1x128x120xbf16> to vector<128x120xbf16>
    %cst_23 = arith.constant dense<0.000000e+00> : vector<1x120xf32>
    %97 = tpu.matmul %94, %96, %cst_23 {dimension_numbers = #tpu.dot_dimension_numbers<[1], [0], [0], [1], [0, 0, 1, 1], [], []>} : vector<1x128xbf16>, vector<128x120xbf16>, vector<1x120xf32> -> vector<1x120xf32>
    %98 = arith.addf %92, %97 : vector<1x120xf32>
    %99 = vector.extract_strided_slice %91 {offsets = [1, 0], sizes = [1, 128], strides = [1, 1]} : vector<16x128xf32> to vector<1x128xf32>
    %100 = arith.truncf %99 : vector<1x128xf32> to vector<1x128xbf16>
    %c1 = arith.constant 1 : index
    %c0_24 = arith.constant 0 : index
    %c0_25 = arith.constant 0 : index
    %101 = vector.load %arg7[%c1, %c0_24, %c0_25] : memref<16x128x120xbf16, #tpu.memory_space<vmem>>, vector<1x128x120xbf16>
    %102 = vector.shape_cast %101 : vector<1x128x120xbf16> to vector<128x120xbf16>
    %cst_26 = arith.constant dense<0.000000e+00> : vector<1x120xf32>
    %103 = tpu.matmul %100, %102, %cst_26 {dimension_numbers = #tpu.dot_dimension_numbers<[1], [0], [0], [1], [0, 0, 1, 1], [], []>} : vector<1x128xbf16>, vector<128x120xbf16>, vector<1x120xf32> -> vector<1x120xf32>
    %104 = arith.addf %98, %103 : vector<1x120xf32>
    %105 = vector.extract_strided_slice %91 {offsets = [2, 0], sizes = [1, 128], strides = [1, 1]} : vector<16x128xf32> to vector<1x128xf32>
    %106 = arith.truncf %105 : vector<1x128xf32> to vector<1x128xbf16>
    %c2 = arith.constant 2 : index
    %c0_27 = arith.constant 0 : index
    %c0_28 = arith.constant 0 : index
    %107 = vector.load %arg7[%c2, %c0_27, %c0_28] : memref<16x128x120xbf16, #tpu.memory_space<vmem>>, vector<1x128x120xbf16>
    %108 = vector.shape_cast %107 : vector<1x128x120xbf16> to vector<128x120xbf16>
    %cst_29 = arith.constant dense<0.000000e+00> : vector<1x120xf32>
    %109 = tpu.matmul %106, %108, %cst_29 {dimension_numbers = #tpu.dot_dimension_numbers<[1], [0], [0], [1], [0, 0, 1, 1], [], []>} : vector<1x128xbf16>, vector<128x120xbf16>, vector<1x120xf32> -> vector<1x120xf32>
    %110 = arith.addf %104, %109 : vector<1x120xf32>
    %111 = vector.extract_strided_slice %91 {offsets = [3, 0], sizes = [1, 128], strides = [1, 1]} : vector<16x128xf32> to vector<1x128xf32>
    %112 = arith.truncf %111 : vector<1x128xf32> to vector<1x128xbf16>
    %c3 = arith.constant 3 : index
    %c0_30 = arith.constant 0 : index
    %c0_31 = arith.constant 0 : index
    %113 = vector.load %arg7[%c3, %c0_30, %c0_31] : memref<16x128x120xbf16, #tpu.memory_space<vmem>>, vector<1x128x120xbf16>
    %114 = vector.shape_cast %113 : vector<1x128x120xbf16> to vector<128x120xbf16>
    %cst_32 = arith.constant dense<0.000000e+00> : vector<1x120xf32>
    %115 = tpu.matmul %112, %114, %cst_32 {dimension_numbers = #tpu.dot_dimension_numbers<[1], [0], [0], [1], [0, 0, 1, 1], [], []>} : vector<1x128xbf16>, vector<128x120xbf16>, vector<1x120xf32> -> vector<1x120xf32>
    %116 = arith.addf %110, %115 : vector<1x120xf32>
    %117 = vector.extract_strided_slice %91 {offsets = [4, 0], sizes = [1, 128], strides = [1, 1]} : vector<16x128xf32> to vector<1x128xf32>
    %118 = arith.truncf %117 : vector<1x128xf32> to vector<1x128xbf16>
    %c4 = arith.constant 4 : index
    %c0_33 = arith.constant 0 : index
    %c0_34 = arith.constant 0 : index
    %119 = vector.load %arg7[%c4, %c0_33, %c0_34] : memref<16x128x120xbf16, #tpu.memory_space<vmem>>, vector<1x128x120xbf16>
    %120 = vector.shape_cast %119 : vector<1x128x120xbf16> to vector<128x120xbf16>
    %cst_35 = arith.constant dense<0.000000e+00> : vector<1x120xf32>
    %121 = tpu.matmul %118, %120, %cst_35 {dimension_numbers = #tpu.dot_dimension_numbers<[1], [0], [0], [1], [0, 0, 1, 1], [], []>} : vector<1x128xbf16>, vector<128x120xbf16>, vector<1x120xf32> -> vector<1x120xf32>
    %122 = arith.addf %116, %121 : vector<1x120xf32>
    %123 = vector.extract_strided_slice %91 {offsets = [5, 0], sizes = [1, 128], strides = [1, 1]} : vector<16x128xf32> to vector<1x128xf32>
    %124 = arith.truncf %123 : vector<1x128xf32> to vector<1x128xbf16>
    %c5 = arith.constant 5 : index
    %c0_36 = arith.constant 0 : index
    %c0_37 = arith.constant 0 : index
    %125 = vector.load %arg7[%c5, %c0_36, %c0_37] : memref<16x128x120xbf16, #tpu.memory_space<vmem>>, vector<1x128x120xbf16>
    %126 = vector.shape_cast %125 : vector<1x128x120xbf16> to vector<128x120xbf16>
    %cst_38 = arith.constant dense<0.000000e+00> : vector<1x120xf32>
    %127 = tpu.matmul %124, %126, %cst_38 {dimension_numbers = #tpu.dot_dimension_numbers<[1], [0], [0], [1], [0, 0, 1, 1], [], []>} : vector<1x128xbf16>, vector<128x120xbf16>, vector<1x120xf32> -> vector<1x120xf32>
    %128 = arith.addf %122, %127 : vector<1x120xf32>
    %129 = vector.extract_strided_slice %91 {offsets = [6, 0], sizes = [1, 128], strides = [1, 1]} : vector<16x128xf32> to vector<1x128xf32>
    %130 = arith.truncf %129 : vector<1x128xf32> to vector<1x128xbf16>
    %c6 = arith.constant 6 : index
    %c0_39 = arith.constant 0 : index
    %c0_40 = arith.constant 0 : index
    %131 = vector.load %arg7[%c6, %c0_39, %c0_40] : memref<16x128x120xbf16, #tpu.memory_space<vmem>>, vector<1x128x120xbf16>
    %132 = vector.shape_cast %131 : vector<1x128x120xbf16> to vector<128x120xbf16>
    %cst_41 = arith.constant dense<0.000000e+00> : vector<1x120xf32>
    %133 = tpu.matmul %130, %132, %cst_41 {dimension_numbers = #tpu.dot_dimension_numbers<[1], [0], [0], [1], [0, 0, 1, 1], [], []>} : vector<1x128xbf16>, vector<128x120xbf16>, vector<1x120xf32> -> vector<1x120xf32>
    %134 = arith.addf %128, %133 : vector<1x120xf32>
    %135 = vector.extract_strided_slice %91 {offsets = [7, 0], sizes = [1, 128], strides = [1, 1]} : vector<16x128xf32> to vector<1x128xf32>
    %136 = arith.truncf %135 : vector<1x128xf32> to vector<1x128xbf16>
    %c7 = arith.constant 7 : index
    %c0_42 = arith.constant 0 : index
    %c0_43 = arith.constant 0 : index
    %137 = vector.load %arg7[%c7, %c0_42, %c0_43] : memref<16x128x120xbf16, #tpu.memory_space<vmem>>, vector<1x128x120xbf16>
    %138 = vector.shape_cast %137 : vector<1x128x120xbf16> to vector<128x120xbf16>
    %cst_44 = arith.constant dense<0.000000e+00> : vector<1x120xf32>
    %139 = tpu.matmul %136, %138, %cst_44 {dimension_numbers = #tpu.dot_dimension_numbers<[1], [0], [0], [1], [0, 0, 1, 1], [], []>} : vector<1x128xbf16>, vector<128x120xbf16>, vector<1x120xf32> -> vector<1x120xf32>
    %140 = arith.addf %134, %139 : vector<1x120xf32>
    %141 = vector.extract_strided_slice %91 {offsets = [8, 0], sizes = [1, 128], strides = [1, 1]} : vector<16x128xf32> to vector<1x128xf32>
    %142 = arith.truncf %141 : vector<1x128xf32> to vector<1x128xbf16>
    %c8 = arith.constant 8 : index
    %c0_45 = arith.constant 0 : index
    %c0_46 = arith.constant 0 : index
    %143 = vector.load %arg7[%c8, %c0_45, %c0_46] : memref<16x128x120xbf16, #tpu.memory_space<vmem>>, vector<1x128x120xbf16>
    %144 = vector.shape_cast %143 : vector<1x128x120xbf16> to vector<128x120xbf16>
    %cst_47 = arith.constant dense<0.000000e+00> : vector<1x120xf32>
    %145 = tpu.matmul %142, %144, %cst_47 {dimension_numbers = #tpu.dot_dimension_numbers<[1], [0], [0], [1], [0, 0, 1, 1], [], []>} : vector<1x128xbf16>, vector<128x120xbf16>, vector<1x120xf32> -> vector<1x120xf32>
    %146 = arith.addf %140, %145 : vector<1x120xf32>
    %147 = vector.extract_strided_slice %91 {offsets = [9, 0], sizes = [1, 128], strides = [1, 1]} : vector<16x128xf32> to vector<1x128xf32>
    %148 = arith.truncf %147 : vector<1x128xf32> to vector<1x128xbf16>
    %c9 = arith.constant 9 : index
    %c0_48 = arith.constant 0 : index
    %c0_49 = arith.constant 0 : index
    %149 = vector.load %arg7[%c9, %c0_48, %c0_49] : memref<16x128x120xbf16, #tpu.memory_space<vmem>>, vector<1x128x120xbf16>
    %150 = vector.shape_cast %149 : vector<1x128x120xbf16> to vector<128x120xbf16>
    %cst_50 = arith.constant dense<0.000000e+00> : vector<1x120xf32>
    %151 = tpu.matmul %148, %150, %cst_50 {dimension_numbers = #tpu.dot_dimension_numbers<[1], [0], [0], [1], [0, 0, 1, 1], [], []>} : vector<1x128xbf16>, vector<128x120xbf16>, vector<1x120xf32> -> vector<1x120xf32>
    %152 = arith.addf %146, %151 : vector<1x120xf32>
    %153 = vector.extract_strided_slice %91 {offsets = [10, 0], sizes = [1, 128], strides = [1, 1]} : vector<16x128xf32> to vector<1x128xf32>
    %154 = arith.truncf %153 : vector<1x128xf32> to vector<1x128xbf16>
    %c10 = arith.constant 10 : index
    %c0_51 = arith.constant 0 : index
    %c0_52 = arith.constant 0 : index
    %155 = vector.load %arg7[%c10, %c0_51, %c0_52] : memref<16x128x120xbf16, #tpu.memory_space<vmem>>, vector<1x128x120xbf16>
    %156 = vector.shape_cast %155 : vector<1x128x120xbf16> to vector<128x120xbf16>
    %cst_53 = arith.constant dense<0.000000e+00> : vector<1x120xf32>
    %157 = tpu.matmul %154, %156, %cst_53 {dimension_numbers = #tpu.dot_dimension_numbers<[1], [0], [0], [1], [0, 0, 1, 1], [], []>} : vector<1x128xbf16>, vector<128x120xbf16>, vector<1x120xf32> -> vector<1x120xf32>
    %158 = arith.addf %152, %157 : vector<1x120xf32>
    %159 = vector.extract_strided_slice %91 {offsets = [11, 0], sizes = [1, 128], strides = [1, 1]} : vector<16x128xf32> to vector<1x128xf32>
    %160 = arith.truncf %159 : vector<1x128xf32> to vector<1x128xbf16>
    %c11 = arith.constant 11 : index
    %c0_54 = arith.constant 0 : index
    %c0_55 = arith.constant 0 : index
    %161 = vector.load %arg7[%c11, %c0_54, %c0_55] : memref<16x128x120xbf16, #tpu.memory_space<vmem>>, vector<1x128x120xbf16>
    %162 = vector.shape_cast %161 : vector<1x128x120xbf16> to vector<128x120xbf16>
    %cst_56 = arith.constant dense<0.000000e+00> : vector<1x120xf32>
    %163 = tpu.matmul %160, %162, %cst_56 {dimension_numbers = #tpu.dot_dimension_numbers<[1], [0], [0], [1], [0, 0, 1, 1], [], []>} : vector<1x128xbf16>, vector<128x120xbf16>, vector<1x120xf32> -> vector<1x120xf32>
    %164 = arith.addf %158, %163 : vector<1x120xf32>
    %165 = vector.extract_strided_slice %91 {offsets = [12, 0], sizes = [1, 128], strides = [1, 1]} : vector<16x128xf32> to vector<1x128xf32>
    %166 = arith.truncf %165 : vector<1x128xf32> to vector<1x128xbf16>
    %c12 = arith.constant 12 : index
    %c0_57 = arith.constant 0 : index
    %c0_58 = arith.constant 0 : index
    %167 = vector.load %arg7[%c12, %c0_57, %c0_58] : memref<16x128x120xbf16, #tpu.memory_space<vmem>>, vector<1x128x120xbf16>
    %168 = vector.shape_cast %167 : vector<1x128x120xbf16> to vector<128x120xbf16>
    %cst_59 = arith.constant dense<0.000000e+00> : vector<1x120xf32>
    %169 = tpu.matmul %166, %168, %cst_59 {dimension_numbers = #tpu.dot_dimension_numbers<[1], [0], [0], [1], [0, 0, 1, 1], [], []>} : vector<1x128xbf16>, vector<128x120xbf16>, vector<1x120xf32> -> vector<1x120xf32>
    %170 = arith.addf %164, %169 : vector<1x120xf32>
    %171 = vector.extract_strided_slice %91 {offsets = [13, 0], sizes = [1, 128], strides = [1, 1]} : vector<16x128xf32> to vector<1x128xf32>
    %172 = arith.truncf %171 : vector<1x128xf32> to vector<1x128xbf16>
    %c13 = arith.constant 13 : index
    %c0_60 = arith.constant 0 : index
    %c0_61 = arith.constant 0 : index
    %173 = vector.load %arg7[%c13, %c0_60, %c0_61] : memref<16x128x120xbf16, #tpu.memory_space<vmem>>, vector<1x128x120xbf16>
    %174 = vector.shape_cast %173 : vector<1x128x120xbf16> to vector<128x120xbf16>
    %cst_62 = arith.constant dense<0.000000e+00> : vector<1x120xf32>
    %175 = tpu.matmul %172, %174, %cst_62 {dimension_numbers = #tpu.dot_dimension_numbers<[1], [0], [0], [1], [0, 0, 1, 1], [], []>} : vector<1x128xbf16>, vector<128x120xbf16>, vector<1x120xf32> -> vector<1x120xf32>
    %176 = arith.addf %170, %175 : vector<1x120xf32>
    %177 = vector.extract_strided_slice %91 {offsets = [14, 0], sizes = [1, 128], strides = [1, 1]} : vector<16x128xf32> to vector<1x128xf32>
    %178 = arith.truncf %177 : vector<1x128xf32> to vector<1x128xbf16>
    %c14 = arith.constant 14 : index
    %c0_63 = arith.constant 0 : index
    %c0_64 = arith.constant 0 : index
    %179 = vector.load %arg7[%c14, %c0_63, %c0_64] : memref<16x128x120xbf16, #tpu.memory_space<vmem>>, vector<1x128x120xbf16>
    %180 = vector.shape_cast %179 : vector<1x128x120xbf16> to vector<128x120xbf16>
    %cst_65 = arith.constant dense<0.000000e+00> : vector<1x120xf32>
    %181 = tpu.matmul %178, %180, %cst_65 {dimension_numbers = #tpu.dot_dimension_numbers<[1], [0], [0], [1], [0, 0, 1, 1], [], []>} : vector<1x128xbf16>, vector<128x120xbf16>, vector<1x120xf32> -> vector<1x120xf32>
    %182 = arith.addf %176, %181 : vector<1x120xf32>
    %183 = vector.extract_strided_slice %91 {offsets = [15, 0], sizes = [1, 128], strides = [1, 1]} : vector<16x128xf32> to vector<1x128xf32>
    %184 = arith.truncf %183 : vector<1x128xf32> to vector<1x128xbf16>
    %c15 = arith.constant 15 : index
    %c0_66 = arith.constant 0 : index
    %c0_67 = arith.constant 0 : index
    %185 = vector.load %arg7[%c15, %c0_66, %c0_67] : memref<16x128x120xbf16, #tpu.memory_space<vmem>>, vector<1x128x120xbf16>
    %186 = vector.shape_cast %185 : vector<1x128x120xbf16> to vector<128x120xbf16>
    %cst_68 = arith.constant dense<0.000000e+00> : vector<1x120xf32>
    %187 = tpu.matmul %184, %186, %cst_68 {dimension_numbers = #tpu.dot_dimension_numbers<[1], [0], [0], [1], [0, 0, 1, 1], [], []>} : vector<1x128xbf16>, vector<128x120xbf16>, vector<1x120xf32> -> vector<1x120xf32>
    %188 = arith.addf %182, %187 : vector<1x120xf32>
    %cst_69 = arith.constant 0.000000e+00 : f32
    %189 = vector.broadcast %cst_69 : f32 to vector<1x120xf32>
    %190 = arith.maximumf %188, %189 : vector<1x120xf32>
    %191 = arith.truncf %190 : vector<1x120xf32> to vector<1x120xbf16>
    %c0_70 = arith.constant 0 : index
    %c0_71 = arith.constant 0 : index
    %192 = vector.load %arg9[%c0_70, %c0_71] : memref<120x84xbf16, #tpu.memory_space<vmem>>, vector<120x84xbf16>
    %cst_72 = arith.constant dense<0.000000e+00> : vector<1x84xf32>
    %193 = tpu.matmul %191, %192, %cst_72 {dimension_numbers = #tpu.dot_dimension_numbers<[1], [0], [0], [1], [0, 0, 1, 1], [], []>} : vector<1x120xbf16>, vector<120x84xbf16>, vector<1x84xf32> -> vector<1x84xf32>
    %c0_73 = arith.constant 0 : index
    %c0_74 = arith.constant 0 : index
    %194 = vector.load %arg10[%c0_73, %c0_74] : memref<1x84xf32, #tpu.memory_space<vmem>>, vector<1x84xf32>
    %195 = arith.addf %193, %194 : vector<1x84xf32>
    %cst_75 = arith.constant 0.000000e+00 : f32
    %196 = vector.broadcast %cst_75 : f32 to vector<1x84xf32>
    %197 = arith.maximumf %195, %196 : vector<1x84xf32>
    %198 = arith.truncf %197 : vector<1x84xf32> to vector<1x84xbf16>
    %c0_76 = arith.constant 0 : index
    %c0_77 = arith.constant 0 : index
    %199 = vector.load %arg11[%c0_76, %c0_77] : memref<84x10xbf16, #tpu.memory_space<vmem>>, vector<84x10xbf16>
    %cst_78 = arith.constant dense<0.000000e+00> : vector<1x10xf32>
    %200 = tpu.matmul %198, %199, %cst_78 {dimension_numbers = #tpu.dot_dimension_numbers<[1], [0], [0], [1], [0, 0, 1, 1], [], []>} : vector<1x84xbf16>, vector<84x10xbf16>, vector<1x10xf32> -> vector<1x10xf32>
    %c0_79 = arith.constant 0 : index
    %c0_80 = arith.constant 0 : index
    %201 = vector.load %arg12[%c0_79, %c0_80] : memref<1x10xf32, #tpu.memory_space<vmem>>, vector<1x10xf32>
    %202 = arith.addf %200, %201 : vector<1x10xf32>
    %c0_81 = arith.constant 0 : index
    %c0_82 = arith.constant 0 : index
    %c0_83 = arith.constant 0 : index
    %203 = vector.load %arg13[%c0_81, %c0_82, %c0_83] : memref<1x1x10xf32, #tpu.memory_space<vmem>>, vector<1x1x10xf32>
    %204 = vector.shape_cast %203 : vector<1x1x10xf32> to vector<1x10xf32>
    %205 = vector.shape_cast %202 : vector<1x10xf32> to vector<1x1x10xf32>
    tpu.vector_store %arg13[%c0_81, %c0_82, %c0_83], %205 {strides = array<i32>} : memref<1x1x10xf32, #tpu.memory_space<vmem>>, vector<1x1x10xf32>,
    return
  }
  func.func @transform_0(%arg0: i32) -> (i32, i32, i32) {
    %c0_i32 = arith.constant 0 : i32
    %c0_i32_0 = arith.constant 0 : i32
    %c0_i32_1 = arith.constant 0 : i32
    return %arg0, %c0_i32, %c0_i32_0 : i32, i32, i32
  }
  func.func @transform_1(%arg0: i32) -> (i32, i32) {
    %c0_i32 = arith.constant 0 : i32
    %c0_i32_0 = arith.constant 0 : i32
    %c0_i32_1 = arith.constant 0 : i32
    return %c0_i32, %c0_i32_0 : i32, i32
  }
  func.func @transform_2(%arg0: i32) -> (i32, i32) {
    %c0_i32 = arith.constant 0 : i32
    %c0_i32_0 = arith.constant 0 : i32
    %c0_i32_1 = arith.constant 0 : i32
    return %c0_i32, %c0_i32_0 : i32, i32
  }
  func.func @transform_3(%arg0: i32) -> (i32, i32) {
    %c0_i32 = arith.constant 0 : i32
    %c0_i32_0 = arith.constant 0 : i32
    %c0_i32_1 = arith.constant 0 : i32
    return %c0_i32, %c0_i32_0 : i32, i32
  }
  func.func @transform_4(%arg0: i32) -> (i32, i32) {
    %c0_i32 = arith.constant 0 : i32
    %c0_i32_0 = arith.constant 0 : i32
    %c0_i32_1 = arith.constant 0 : i32
    return %c0_i32, %c0_i32_0 : i32, i32
  }
  func.func @transform_5(%arg0: i32) -> (i32, i32) {
    %c0_i32 = arith.constant 0 : i32
    %c0_i32_0 = arith.constant 0 : i32
    %c0_i32_1 = arith.constant 0 : i32
    return %c0_i32, %c0_i32_0 : i32, i32
  }
  func.func @transform_6(%arg0: i32) -> (i32, i32, i32) {
    %c0_i32 = arith.constant 0 : i32
    %c0_i32_0 = arith.constant 0 : i32
    %c0_i32_1 = arith.constant 0 : i32
    %c0_i32_2 = arith.constant 0 : i32
    return %c0_i32, %c0_i32_0, %c0_i32_1 : i32, i32, i32
  }
  func.func @transform_7(%arg0: i32) -> (i32, i32) {
    %c0_i32 = arith.constant 0 : i32
    %c0_i32_0 = arith.constant 0 : i32
    %c0_i32_1 = arith.constant 0 : i32
    return %c0_i32, %c0_i32_0 : i32, i32
  }
  func.func @transform_8(%arg0: i32) -> (i32, i32) {
    %c0_i32 = arith.constant 0 : i32
    %c0_i32_0 = arith.constant 0 : i32
    %c0_i32_1 = arith.constant 0 : i32
    return %c0_i32, %c0_i32_0 : i32, i32
  }
  func.func @transform_9(%arg0: i32) -> (i32, i32) {
    %c0_i32 = arith.constant 0 : i32
    %c0_i32_0 = arith.constant 0 : i32
    %c0_i32_1 = arith.constant 0 : i32
    return %c0_i32, %c0_i32_0 : i32, i32
  }
  func.func @transform_10(%arg0: i32) -> (i32, i32) {
    %c0_i32 = arith.constant 0 : i32
    %c0_i32_0 = arith.constant 0 : i32
    %c0_i32_1 = arith.constant 0 : i32
    return %c0_i32, %c0_i32_0 : i32, i32
  }
  func.func @transform_11(%arg0: i32) -> (i32, i32) {
    %c0_i32 = arith.constant 0 : i32
    %c0_i32_0 = arith.constant 0 : i32
    %c0_i32_1 = arith.constant 0 : i32
    return %c0_i32, %c0_i32_0 : i32, i32
  }
  func.func @transform_12(%arg0: i32) -> (i32, i32, i32) {
    %c0_i32 = arith.constant 0 : i32
    %c0_i32_0 = arith.constant 0 : i32
    %c0_i32_1 = arith.constant 0 : i32
    return %arg0, %c0_i32, %c0_i32_0 : i32, i32, i32
  }
}

</mosaic_0001>

<bundles_post_ra>
// kernel: net_forward.1
= control target key start
LH: loop header
LB: loop body
LE: loop exit
PB: predicated region body
PF: predicated region fallthrough
CT: control target
= control target key end

     0   :  { %s10831_s0 = inlined_call_operand.vmem [shape: f32[2,8,1280], index: 0, kind: input, shape index: {}]   ;;  %s10832_s1 = inlined_call_operand.vmem [shape: bf16[8,256], index: 1, kind: input, shape index: {}]   ;;  %s10833_s2 = inlined_call_operand.vmem [shape: f32[8,1], index: 2, kind: input, shape index: {}]   ;;  %s10834_s3 = inlined_call_operand.vmem [shape: bf16[16,256], index: 3, kind: input, shape index: {}]   ;;  %s10835_s4 = inlined_call_operand.vmem [shape: f32[16,1], index: 4, kind: input, shape index: {}]   ;;  %s10836_s5 = inlined_call_operand.vmem [shape: f32[544,128], index: 5, kind: input, shape index: {}]   ;;  %s10837_s6 = inlined_call_operand.vmem [shape: bf16[16,128,120], index: 6, kind: input, shape index: {}]   ;;  %s10838_s7 = inlined_call_operand.vmem [shape: f32[1,120], index: 7, kind: input, shape index: {}]   ;;  %s10839_s8 = inlined_call_operand.vmem [shape: bf16[120,84], index: 8, kind: input, shape index: {}]   ;;  %s10840_s9 = inlined_call_operand.vmem [shape: f32[1,84], index: 9, kind: input, shape index: {}]   ;;  %s10841_s10 = inlined_call_operand.vmem [shape: bf16[84,10], index: 10, kind: input, shape index: {}]   ;;  %s10842_s11 = inlined_call_operand.vmem [shape: f32[1,10], index: 11, kind: input, shape index: {}]   ;;  %s10843_s12 = inlined_call_operand.hbm [shape: f32[2,1,10], index: 12, kind: output, shape index: {}]  }
   0x1   :  { %10991 = sst [smem:[#allocation29_spill]] %s10831_s0 }
   0x2   :  { %10992 = sst [smem:[#allocation30_spill]] %s10832_s1 }
   0x3   :  { %10993 = sst [smem:[#allocation31_spill]] %s10843_s12 }
   0x4   :  { %17 = vsyncpa [#allocation3], 0 }
   0x5   :  { %19 = vsyncpa [#allocation3 + $0x1], 0  ;;  %s7384_s21 = smov 0   ;;  %s7386_s22 = smov 0  }
   0x6   :  { %s7388_s23 = smov 0   ;;  %s7390_s24 = smov 0  }
   0x7 LB: > { %10994 = sst [smem:[#allocation5_spill]] %s7279_s21  ;;  %s7405_s25 = sadd.s32 4294967295, %s7291_s24   ;;  %s7291_s24 = sphi %s7390_s24, %s11215_s24   ;;  %s7287_s23 = sphi %s7388_s23, %s11217_s23   ;;  %s7283_s22 = sphi %s7386_s22, %s11219_s22   ;;  %s7279_s21 = sphi %s7384_s21, %s11218_s21  }
   0x8   : > { %10995 = sst [smem:[#allocation6_spill]] %s7287_s23  ;;  %s4914_s26 = sadd.s32 4294967294, %s7291_s24  }
   0x9   : > { %10996 = sst [smem:[#allocation7_spill]] %s7291_s24  ;;  %s7409_s27 = sadd.s32 1, %s7291_s24  }
   0xa   : > { %10997 = sst [smem:[#allocation8_spill]] %s7409_s27  ;;  %s289_s28 = sadd.s32 1, %s7287_s23 }
   0xb   : > { %s286_s29 = ssub.s32 %s7291_s24, %s7409_s27  ;;  %p299_p0 = scmp.ne.s32.totalorder %s7287_s23, %s7283_s22 }
   0xc   : > { %p287_p1 = scmp.eq.s32.totalorder %s286_s29, 0  ;;  %p300_p2 = scmp.eq.s32.totalorder %s7405_s25, 1 }
   0xd   : > { %p305_p3 = scmp.ne.s32.totalorder %s7283_s22, %s7279_s21  ;;  %p306_p4 = scmp.eq.s32.totalorder %s4914_s26, 1 }
   0xe   : > { %s7420_s30 = scalar_select %p287_p1, %s7287_s23, %s289_s28  }
   0xf   : > { %p7422_p5 = por %p300_p2, %p299_p0  ;;  %p7426_p6 = por %p306_p4, %p305_p3 }
  0x10   : > { %10998 = sst [smem:[#allocation9_spill]] %s7420_s30  ;;  %p4917_p7 = scmp.ge.s32.totalorder %s7291_s24, 1 }
  0x11   : > { %s11000_s14 = scalar_select %p7426_p6, 1, 0 }
  0x12   : > { %p365_p8 = scmp.lt.s32.totalorder %s7291_s24, 3 }
  0x13   : > { %11001 = sst [smem:[#allocation10_spill]] %s11000_s14 }
  0x14   : > { %p366_p9 = pnand %p4917_p7, %p365_p8 }
  0x16   : > { %369 = sbr.rel (%p366_p9) target bundleno = 3523 (0xdc3), region = 68 }
  0x1d   : > { %p406_p10 = scmp.lt.s32.totalorder %s7405_s25, 1  ;;  %s11002_s0 = sld [smem:[#allocation29_spill]]  ;;  %vm10962_vm0 = vcmask 1039360   ;;  %vm10961_vm1 = vcmask 1031168   ;;  %vm10936_vm2 = vcmask 1022976   ;;  %vm10935_vm3 = vcmask 793600  }
  0x1e   : > { %s10870_s20 = smov 126   ;;  %s10868_s26 = smov 127   ;;  %vm665_vm4 = vcmask 769024   ;;  %vm629_vm5 = vcmask 777216   ;;  %vm10895_vm6 = vcmask 785408   ;;  %vm701_vm7 = vcmask 760832  }
  0x1f   : > { %s407_s15 = scalar_select %p406_p10, %s7405_s25, 1  ;;  %vm557_vm8 = vcmask 1014784   ;;  %vm737_vm9 = vcmask 752640   ;;  %vm812_vm10 = vcmask 515072   ;;  %vm773_vm11 = vcmask 523264  }
  0x20   : > { %s10858_s28 = smov 125   ;;  %s10844_s29 = smov 96   ;;  %vm890_vm12 = vcmask 498688   ;;  %vm851_vm13 = vcmask 506880   ;;  %vm968_vm14 = vcmask 261120   ;;  %vm929_vm15 = vcmask 490496  }
  0x21   : > { %s6098_s16 = smul.u32 80, %s407_s15  ;;  %s10846_s15 = smov 97  }
  0x22   : > { %s10850_s17 = smov 94   ;;  %s10852_s18 = smov 93  }
  0x23   : > { %s7437_s19 = scalar_lea.vmem %s11002_s0, %s6098_s16  ;;  %s10848_s16 = smov 95  }
  0x24   : > { %v7440_v0 = vld [vmem:[%s7437_s19 + $0x8] sm:$0xff]  ;;  %v414_v1 = vld [vmem:[%s7437_s19 + $0x10] sm:$0xff]  ;;  %v7444_v2 = vld [vmem:[%s7437_s19] sm:$0xff]  ;;  %s11011_s0 = smov 63   ;;  %s11013_s30 = smov 61  }
  0x25   : > { %v6173_v3 = vpack.i.bf16 %v414_v1, %v7440_v0  ;;  %v415_v4 = vld [vmem:[%s7437_s19 + $0x18] sm:$0xff]  ;;  %v416_v6 = vld [vmem:[%s7437_s19 + $0x20] sm:$0xff]  ;;  %v7480_v9 = vld [vmem:[%s7437_s19 + $0x28] sm:$0xff]  ;;  %s11015_s1 = sld [smem:[#allocation30_spill]]  ;;  %s11016_s14 = smov 64  }
  0x26   : > { %v6178_v5 = vpack.i.bf16 %v7444_v2, %v415_v4  ;;  %v6208_v7 = vpack.i.bf16 %v416_v6, %v415_v4  ;;  %v6248_v8 = vpack.i.bf16 %v415_v4, %v7444_v2  ;;  %v7487_v10 = vpack.i.bf16 %v7480_v9, %v416_v6  ;;  %s11017_s23 = smov 32   ;;  %s11019_s27 = smov 62  }
  0x27   : > { %6174 = vrot.lane.b32.xlu1 %v6173_v3, %s10870_s20  ;;  %6164 = vrot.lane.b32.xlu0 %v6173_v3, %s10868_s26  ;;  %s11024_s21 = smov 60   ;;  %s11027_s24 = smov 126  }
  0x28   : > { %s11029_s12 = smov 127  }
  0x2b   : > { %6179 = vrot.lane.b32.xlu1 %v6178_v5, %s10870_s20  ;;  %6169 = vrot.lane.b32.xlu0 %v6178_v5, %s10868_s26 }
  0x2f   : > { %6189 = vrot.lane.b32.xlu1 %v6178_v5, %s10858_s28  ;;  %6184 = vrot.lane.b32.xlu0 %v6173_v3, %s10858_s28  ;;  %s10872_s28 = smov 60  }
  0x33   : > { %6199 = vrot.lane.b32.xlu1 %v6178_v5, %s10844_s29  ;;  %6194 = vrot.lane.b32.xlu0 %v6173_v3, %s10844_s29  ;;  %s10854_s29 = smov 124  }
  0x37   : > { %6209 = vrot.lane.b32.xlu1 %v6208_v7, %s10846_s15  ;;  %6204 = vrot.lane.b32.xlu0 %v6173_v3, %s10846_s15  ;;  %s10856_s15 = smov 92  }
  0x3b   : > { %6219 = vrot.lane.b32.xlu1 %v6178_v5, %s10848_s16  ;;  %6214 = vrot.lane.b32.xlu0 %v6173_v3, %s10848_s16  ;;  %s10874_s16 = smov 63  }
  0x3f   : > { %6229 = vrot.lane.b32.xlu1 %v6178_v5, %s10850_s17  ;;  %6224 = vrot.lane.b32.xlu0 %v6173_v3, %s10850_s17  ;;  %s10860_s17 = smov 64  }
  0x43   : > { %6239 = vrot.lane.b32.xlu1 %v6178_v5, %s10852_s18  ;;  %6234 = vrot.lane.b32.xlu0 %v6173_v3, %s10852_s18  ;;  %s10864_s18 = smov 61  }
  0x47   : > { %6249 = vrot.lane.b32.xlu1 %v6248_v8, %s10854_s29  ;;  %6244 = vrot.lane.b32.xlu0 %v6173_v3, %s10854_s29  ;;  %s10862_s29 = smov 62  }
  0x4b   : > { %6259 = vrot.lane.b32.xlu1 %v6248_v8, %s10856_s15  ;;  %6254 = vrot.lane.b32.xlu0 %v6173_v3, %s10856_s15  ;;  %s10866_s15 = smov 32  }
  0x4f   : > { %6269 = vrot.lane.b32.xlu1 %v6173_v3, %s10874_s16  ;;  %6264 = vrot.lane.b32.xlu0 %v6173_v3, %s10860_s17 }
  0x53   : > { %6279 = vrot.lane.b32.xlu1 %v6248_v8, %s10874_s16  ;;  %6274 = vrot.lane.b32.xlu0 %v6248_v8, %s10860_s17  ;;  %s10876_s17 = smov 31   ;;  %s11009_s16 = smov 92  }
  0x57   : > { %6289 = vrot.lane.b32.xlu1 %v6173_v3, %s10864_s18  ;;  %6284 = vrot.lane.b32.xlu0 %v6173_v3, %s10862_s29 }
  0x5b   : > { %6299 = vrot.lane.b32.xlu1 %v6248_v8, %s10864_s18  ;;  %6294 = vrot.lane.b32.xlu0 %v6248_v8, %s10862_s29  ;;  %s11003_s29 = smov 125   ;;  %s11004_s18 = smov 97  }
  0x5f   : > { %6309 = vrot.lane.b32.xlu1 %v6173_v3, %s10866_s15  ;;  %6304 = vrot.lane.b32.xlu0 %v6173_v3, %s10872_s28 }
  0x63   : > { %6319 = vrot.lane.b32.xlu1 %v6248_v8, %s10866_s15  ;;  %6314 = vrot.lane.b32.xlu0 %v6248_v8, %s10872_s28  ;;  %s11005_s15 = smov 96   ;;  %s11008_s28 = smov 95  }
  0x67   : > { %6329 = vrot.lane.b32.xlu1 %v7487_v10, %s10868_s26  ;;  %6324 = vrot.lane.b32.xlu0 %v6173_v3, %s10876_s17  ;;  %s11006_s26 = smov 94  }
  0x6b   : > { %6334 = vrot.lane.b32.xlu1 %v7487_v10, %s10870_s20  ;;  %6339 = vrot.lane.b32.xlu0 %v7487_v10, %s11003_s29  ;;  %s11007_s20 = smov 93  }
  0x6f   : > { %1004 = vrot.lane.b32.xlu1 %v7480_v9, %s11004_s18  ;;  %6344 = vrot.lane.b32.xlu0 %v7487_v10, %s11005_s15 }
  0x99   : > { %v6175_v11 = vpop.permute.xlu1 %6174  ;;  %v6165_v12 = vpop.permute.xlu0 %6164 }
  0x9a   : > { %v6167_v13 = vunpack.i.h.bf16 %v6165_v12  ;;  %v6166_v14 = vunpack.i.l.bf16 %v6165_v12  ;;  %v6177_v16 = vunpack.i.h.bf16 %v6175_v11  ;;  %v6176_v17 = vunpack.i.l.bf16 %v6175_v11 }
  0x9c   : > { %v451_v15 = vsel %vm10962_vm0, %v6166_v14, %v6167_v13  ;;  %v487_v28 = vsel %vm10961_vm1, %v6176_v17, %v6177_v16 }
  0x9d   : > { %v7501_v18 = vpop.permute.xlu1 %6179  ;;  %v7503_v19 = vpop.permute.xlu0 %6169  ;;  %v1383_v20 = vpack.c.bf16 %v451_v15, %v7440_v0 }
  0x9e   : > { %v6182_v21 = vunpack.i.h.bf16 %v7501_v18  ;;  %v6181_v22 = vunpack.i.l.bf16 %v7501_v18  ;;  %v6172_v23 = vunpack.i.h.bf16 %v7503_v19  ;;  %v6171_v43 = vunpack.i.l.bf16 %v7503_v19 }
  0x9f   : > { %1514 = vmatprep.subr.bf16.mxu0 %v1383_v20 }
  0xa0   : > { %v7510_v24 = vsel %vm10962_vm0, %v6172_v23, %v6166_v14  ;;  %v7518_v29 = vsel %vm10961_vm1, %v6182_v21, %v6176_v17  ;;  %v7523_v30 = vsel %vm10961_vm1, %v6177_v16, %v6181_v22  ;;  %v7554_v49 = vsel %vm10962_vm0, %v6167_v13, %v6171_v43 }
  0xa1   : > { %v7512_v25 = vpop.permute.xlu1 %6189  ;;  %v6185_v26 = vpop.permute.xlu0 %6184  ;;  %v1382_v27 = vpack.c.bf16 %v7510_v24, %v7444_v2  ;;  %v6358_v52 = vpack.i.bf16 %v7554_v49, %v451_v15  ;;  %v6368_v0 = vpack.i.bf16 %v7523_v30, %v487_v28  ;;  %v6363_v17 = vpack.i.bf16 %v7510_v24, %v7444_v2 }
  0xa2   : > { %v6192_v31 = vunpack.i.h.bf16 %v7512_v25  ;;  %v6191_v32 = vunpack.i.l.bf16 %v7512_v25  ;;  %v6187_v33 = vunpack.i.h.bf16 %v6185_v26  ;;  %v6186_v34 = vunpack.i.l.bf16 %v6185_v26 }
  0xa3   : > { %1515 = vmatpush1.bf16.msra.mxu0 %v1382_v27 }
  0xa4   : > { %v7528_v35 = vsel %vm10936_vm2, %v6186_v34, %v6187_v33  ;;  %v7531_v36 = vsel %vm10936_vm2, %v6192_v31, %v6186_v34  ;;  %v7536_v37 = vsel %vm10936_vm2, %v6187_v33, %v6191_v32 }
  0xa5   : > { %v7538_v38 = vpop.permute.xlu1 %6199  ;;  %v7540_v39 = vpop.permute.xlu0 %6194  ;;  %v1392_v40 = vpack.c.bf16 %v7528_v35, %v487_v28  ;;  %v1391_v41 = vpack.c.bf16 %v7531_v36, %v7518_v29  ;;  %v6373_v23 = vpack.i.bf16 %v7536_v37, %v7528_v35 }
  0xa6   : > { %v6196_v46 = vunpack.i.l.bf16 %v7540_v39  ;;  %v6202_v63 = vunpack.i.h.bf16 %v7538_v38  ;;  %v6197_v1 = vunpack.i.h.bf16 %v7540_v39  ;;  %v6201_v6 = vunpack.i.l.bf16 %v7538_v38 }
  0xa7   : > { %1516 = vmatprep.subr.bf16.mxu0 %v1392_v40 }
  0xa8   : > { %1517 = vmatpush1.bf16.msra.mxu0 %v1391_v41  ;;  %v7603_v27 = vsel %vm10895_vm6, %v6196_v46, %v6197_v1  ;;  %v594_v33 = vsel %vm10895_vm6, %v6202_v63, %v6196_v46  ;;  %v7618_v34 = vsel %vm10895_vm6, %v6197_v1, %v6201_v6 }
  0xa9   : > { %v7548_v44 = vpop.permute.xlu1 %6209  ;;  %v6205_v45 = vpop.permute.xlu0 %6204 }
  0xaa   : > { %v6206_v47 = vunpack.i.l.bf16 %v6205_v45  ;;  %v6211_v55 = vunpack.i.l.bf16 %v7548_v44  ;;  %v6207_v56 = vunpack.i.h.bf16 %v6205_v45 }
  0xac   : > { %v6348_v48 = vpack.i.bf16 %v6196_v46, %v6206_v47  ;;  %v1015_v11 = vsel %vm10935_vm3, %v6206_v47, %v6207_v56  ;;  %v1016_v12 = vsel %vm10935_vm3, %v6207_v56, %v6211_v55 }
  0xad   : > { %v7556_v50 = vpop.permute.xlu1 %6219  ;;  %v6215_v51 = vpop.permute.xlu0 %6214  ;;  %v6383_v21 = vpack.i.bf16 %v1016_v12, %v1015_v11 }
  0xae   : > { %6349 = vrot.lane.b32.xlu1 %v6348_v48, %s10876_s17  ;;  %v10901_v53 = vunpack.i.l.bf16 %v7556_v50  ;;  %v6217_v54 = vunpack.i.h.bf16 %v6215_v51  ;;  %v7564_v59 = vunpack.i.l.bf16 %v6215_v51  ;;  %v6222_v45 = vunpack.i.h.bf16 %v7556_v50 }
  0xb0   : > { %v7580_v5 = vsel %vm629_vm5, %v6217_v54, %v10901_v53  ;;  %v7628_v47 = vsel %vm629_vm5, %v7564_v59, %v6217_v54 }
  0xb1   : > { %v7562_v57 = vpop.permute.xlu1 %6229  ;;  %v6225_v58 = vpop.permute.xlu0 %6224 }
  0xb2   : > { %v10902_v60 = vunpack.i.l.bf16 %v7562_v57  ;;  %v6227_v61 = vunpack.i.h.bf16 %v6225_v58  ;;  %v6226_v62 = vunpack.i.l.bf16 %v6225_v58  ;;  %6359 = vrot.lane.b32.xlu1 %v6358_v52, %s10876_s17  ;;  %v6232_v20 = vunpack.i.h.bf16 %v7562_v57 }
  0xb4   : > { %v6353_v3 = vpack.i.bf16 %v6226_v62, %v7564_v59  ;;  %v7575_v4 = vsel %vm665_vm4, %v6227_v61, %v10902_v60  ;;  %v667_v26 = vsel %vm665_vm4, %v6226_v62, %v6227_v61  ;;  %v666_v48 = vsel %vm665_vm4, %v6232_v20, %v6226_v62 }
  0xb5   : > { %v7583_v7 = vpop.permute.xlu1 %6239  ;;  %v6235_v8 = vpop.permute.xlu0 %6234  ;;  %v6403_v46 = vpack.i.bf16 %v7575_v4, %v667_v26  ;;  %v6378_v20 = vpack.i.bf16 %v7531_v36, %v7518_v29 }
  0xb6   : > { %v10900_v14 = vunpack.i.l.bf16 %v7583_v7  ;;  %v6237_v15 = vunpack.i.h.bf16 %v6235_v8  ;;  %v7592_v16 = vunpack.i.l.bf16 %v6235_v8  ;;  %6354 = vrot.lane.b32.xlu0 %v6353_v3, %s10876_s17  ;;  %6369 = vrot.lane.b32.xlu1 %v6368_v0, %s10876_s17  ;;  %v6242_v51 = vunpack.i.h.bf16 %v7583_v7 }
  0xb8   : > { %v703_v2 = vsel %vm701_vm7, %v7592_v16, %v6237_v15  ;;  %v7613_v24 = vsel %vm701_vm7, %v6237_v15, %v10900_v14  ;;  %v1410_v15 = vpack.c.bf16 %v667_v26, %v7628_v47 }
  0xb9   : > { %v7605_v28 = vpop.permute.xlu1 %6249  ;;  %v6245_v31 = vpop.permute.xlu0 %6244  ;;  %v6408_v1 = vpack.i.bf16 %v7613_v24, %v703_v2 }
  0xba   : > { %v10899_v35 = vunpack.i.h.bf16 %v7605_v28  ;;  %v6251_v39 = vunpack.i.l.bf16 %v7605_v28  ;;  %v6247_v40 = vunpack.i.h.bf16 %v6245_v31  ;;  %v6246_v41 = vunpack.i.l.bf16 %v6245_v31  ;;  %6364 = vrot.lane.b32.xlu0 %v6363_v17, %s10876_s17  ;;  %6384 = vrot.lane.b32.xlu1 %v6383_v21, %s10876_s17 }
  0xbb   : > { %v630_v17 = vsel %vm629_vm5, %v6222_v45, %v7564_v59 }
  0xbc   : > { %v559_v52 = vsel %vm557_vm8, %v6246_v41, %v6247_v40  ;;  %v558_v56 = vsel %vm557_vm8, %v6251_v39, %v6246_v41  ;;  %v7637_v58 = vsel %vm557_vm8, %v6247_v40, %v10899_v35  ;;  %v1409_v31 = vpack.c.bf16 %v666_v48, %v630_v17 }
  0xbd   : > { %v7639_v61 = vpop.permute.xlu1 %6259  ;;  %v6255_v63 = vpop.permute.xlu0 %6254  ;;  %v1401_v0 = vpack.c.bf16 %v7603_v27, %v559_v52  ;;  %v1400_v54 = vpack.c.bf16 %v594_v33, %v558_v56  ;;  %v702_v40 = vsel %vm701_vm7, %v6242_v51, %v7592_v16  ;;  %v6388_v48 = vpack.i.bf16 %v7618_v34, %v7603_v27 }
  0xbe   : > { %v10897_v3 = vunpack.i.h.bf16 %v7639_v61  ;;  %v6261_v8 = vunpack.i.l.bf16 %v7639_v61  ;;  %v6257_v11 = vunpack.i.h.bf16 %v6255_v63  ;;  %v6256_v12 = vunpack.i.l.bf16 %v6255_v63  ;;  %6374 = vrot.lane.b32.xlu0 %v6373_v23, %s10876_s17  ;;  %6404 = vrot.lane.b32.xlu1 %v6403_v46, %s10876_s17 }
  0xbf   : > { %1518 = vmatprep.subr.bf16.mxu0 %v1401_v0  ;;  %v6393_v27 = vpack.i.bf16 %v7580_v5, %v7628_v47 }
  0xc0   : > { %1519 = vmatpush1.bf16.msra.mxu0 %v1400_v54  ;;  %v7657_v21 = vsel %vm737_vm9, %v6257_v11, %v10897_v3  ;;  %v739_v23 = vsel %vm737_vm9, %v6256_v12, %v6257_v11  ;;  %v738_v29 = vsel %vm737_vm9, %v6261_v8, %v6256_v12 }
  0xc1   : > { %v6270_v33 = vpop.permute.xlu1 %6269  ;;  %v6265_v39 = vpop.permute.xlu0 %6264  ;;  %1520 = vmatprep.subr.bf16.mxu0 %v1410_v15  ;;  %v1419_v59 = vpack.c.bf16 %v739_v23, %v703_v2  ;;  %v1418_v63 = vpack.c.bf16 %v738_v29, %v702_v40 }
  0xc2   : > { %v6272_v36 = vunpack.i.h.bf16 %v6270_v33  ;;  %v6271_v41 = vunpack.i.l.bf16 %v6270_v33  ;;  %v6267_v45 = vunpack.i.h.bf16 %v6265_v39  ;;  %v6266_v46 = vunpack.i.l.bf16 %v6265_v39  ;;  %6379 = vrot.lane.b32.xlu0 %v6378_v20, %s10876_s17  ;;  %6409 = vrot.lane.b32.xlu1 %v6408_v1, %s10876_s17 }
  0xc4   : > { %1521 = vmatpush1.bf16.msra.mxu0 %v1409_v31  ;;  %v775_v52 = vsel %vm773_vm11, %v6266_v46, %v6267_v45  ;;  %v814_v2 = vsel %vm812_vm10, %v6271_v41, %v6272_v36 }
  0xc5   : > { %v7671_v56 = vpop.permute.xlu1 %6279  ;;  %v7673_v51 = vpop.permute.xlu0 %6274  ;;  %1522 = vmatprep.subr.bf16.mxu0 %v1419_v59  ;;  %v1428_v0 = vpack.c.bf16 %v814_v2, %v775_v52 }
  0xc6   : > { %v10890_v54 = vunpack.i.h.bf16 %v7671_v56  ;;  %v6281_v8 = vunpack.i.l.bf16 %v7671_v56  ;;  %v10891_v1 = vunpack.i.h.bf16 %v7673_v51  ;;  %v6276_v11 = vunpack.i.l.bf16 %v7673_v51  ;;  %6389 = vrot.lane.b32.xlu0 %v6388_v48, %s10876_s17  ;;  %6414 = vrot.lane.b32.xlu1 %v7487_v10, %s11006_s26 }
  0xc8   : > { %v7687_v12 = vsel %vm812_vm10, %v6272_v36, %v10890_v54  ;;  %v7692_v15 = vsel %vm773_vm11, %v6267_v45, %v10891_v1  ;;  %1523 = vmatpush1.bf16.msra.mxu0 %v1418_v63  ;;  %v774_v17 = vsel %vm773_vm11, %v6276_v11, %v6266_v46  ;;  %v813_v20 = vsel %vm812_vm10, %v6281_v8, %v6271_v41  ;;  %v7855_v54 = vld [vmem:[%s7437_s19 + $0x38] sm:$0xff] }
  0xc9   : > { %v6290_v31 = vpop.permute.xlu1 %6289  ;;  %v6285_v23 = vpop.permute.xlu0 %6284  ;;  %1524 = vmatprep.subr.bf16.mxu0 %v1428_v0  ;;  %v1427_v47 = vpack.c.bf16 %v813_v20, %v774_v17  ;;  %v10878_v8 = vmov 0.0   ;;  %11025 = vst [vmem:[#allocation17_spill] sm:$0xff] %v7855_v54 }
  0xca   : > { %v6292_v39 = vunpack.i.h.bf16 %v6290_v31  ;;  %v6291_v59 = vunpack.i.l.bf16 %v6290_v31  ;;  %v6287_v40 = vunpack.i.h.bf16 %v6285_v23  ;;  %v6286_v29 = vunpack.i.l.bf16 %v6285_v23  ;;  %6394 = vrot.lane.b32.xlu0 %v6393_v27, %s10876_s17  ;;  %6424 = vrot.lane.b32.xlu1 %v7487_v10, %s11007_s20 }
  0xcb   : > { %v6418_v11 = vpack.i.bf16 %v10878_v8, %v7592_v16 }
  0xcc   : > { %1525 = vmatpush1.bf16.msra.mxu0 %v1427_v47  ;;  %v853_v36 = vsel %vm851_vm13, %v6286_v29, %v6287_v40  ;;  %v892_v41 = vsel %vm890_vm12, %v6291_v59, %v6292_v39  ;;  %v7768_v47 = vld [vmem:[%s11015_s1] sm:$0xff]  ;;  %s11020_s1 = smov 31  }
  0xcd   : > { %v7703_v45 = vpop.permute.xlu1 %6299  ;;  %v7705_v46 = vpop.permute.xlu0 %6294  ;;  %v1437_v48 = vpack.c.bf16 %v892_v41, %v853_v36 }
  0xce   : > { %v10886_v52 = vunpack.i.h.bf16 %v7703_v45  ;;  %v6301_v2 = vunpack.i.l.bf16 %v7703_v45  ;;  %v10887_v63 = vunpack.i.h.bf16 %v7705_v46  ;;  %v6296_v0 = vunpack.i.l.bf16 %v7705_v46  ;;  %6399 = vrot.lane.b32.xlu0 %v7487_v10, %s11008_s28  ;;  %6429 = vrot.lane.b32.xlu1 %v7487_v10, %s11009_s16 }
  0xcf   : > { %1526 = vmatprep.subr.bf16.mxu0 %v1437_v48 }
  0xd0   : > { %v7720_v27 = vsel %vm890_vm12, %v6292_v39, %v10886_v52  ;;  %v7725_v17 = vsel %vm851_vm13, %v6287_v40, %v10887_v63  ;;  %v852_v20 = vsel %vm851_vm13, %v6296_v0, %v6286_v29  ;;  %v891_v10 = vsel %vm890_vm12, %v6301_v2, %v6291_v59  ;;  %v7733_v40 = vld [vmem:[%s7437_s19 + $0x20] sm:$0xff] }
  0xd1   : > { %v6310_v31 = vpop.permute.xlu1 %6309  ;;  %v6305_v23 = vpop.permute.xlu0 %6304  ;;  %v1436_v16 = vpack.c.bf16 %v891_v10, %v852_v20  ;;  %11010 = vst [vmem:[#allocation11_spill] sm:$0xff] %v7733_v40  ;;  %v6433_v20 = vpack.i.bf16 %v7480_v9, %v7733_v40 }
  0xd2   : > { %v6312_v36 = vunpack.i.h.bf16 %v6310_v31  ;;  %v6311_v39 = vunpack.i.l.bf16 %v6310_v31  ;;  %v6307_v41 = vunpack.i.h.bf16 %v6305_v23  ;;  %v6306_v48 = vunpack.i.l.bf16 %v6305_v23  ;;  %6419 = vrot.lane.b32.xlu0 %v6418_v11, %s10876_s17  ;;  %800 = vrot.lane.b32.xlu1 %v7733_v40, %s11011_s0  ;;  %s11012_s17 = smov 124  }
  0xd3   : > { %1527 = vmatpush1.bf16.msra.mxu0 %v1436_v16 }
  0xd4   : > { %v931_v59 = vsel %vm929_vm15, %v6306_v48, %v6307_v41  ;;  %v970_v29 = vsel %vm968_vm14, %v6311_v39, %v6312_v36 }
  0xd5   : > { %v7739_v2 = vpop.permute.xlu1 %6319  ;;  %v7741_v0 = vpop.permute.xlu0 %6314  ;;  %v1446_v10 = vpack.c.bf16 %v970_v29, %v931_v59 }
  0xd6   : > { %v10883_v11 = vunpack.i.h.bf16 %v7739_v2  ;;  %v6321_v31 = vunpack.i.l.bf16 %v7739_v2  ;;  %v10885_v23 = vunpack.i.h.bf16 %v7741_v0  ;;  %v6316_v16 = vunpack.i.l.bf16 %v7741_v0  ;;  %547 = vrot.lane.b32.xlu0 %v7733_v40, %s11012_s17  ;;  %878 = vrot.lane.b32.xlu1 %v7733_v40, %s11013_s30 }
  0xd7   : > { %1528 = vmatprep.subr.bf16.mxu0 %v1446_v10 }
  0xd8   : > { %v7756_v9 = vsel %vm968_vm14, %v6312_v36, %v10883_v11  ;;  %v7761_v59 = vsel %vm929_vm15, %v6307_v41, %v10885_v23  ;;  %v930_v29 = vsel %vm929_vm15, %v6316_v16, %v6306_v48  ;;  %v969_v8 = vsel %vm968_vm14, %v6321_v31, %v6311_v39 }
  0xd9   : > { %11014 = vst [vmem:[#allocation12_spill] sm:$0xff] %v7761_v59  ;;  %v7770_v10 = vpop.permute.xlu1 %6329  ;;  %v7772_v33 = vpop.permute.xlu0 %6324  ;;  %v1445_v36 = vpack.c.bf16 %v969_v8, %v930_v29  ;;  %v7776_v11 = vcombine.high %v7768_v47, %v7768_v47 }
  0xda   : > { %v10898_v48 = vunpack.i.h.bf16 %v7770_v10  ;;  %v6331_v39 = vunpack.i.l.bf16 %v7770_v10  ;;  %6434 = vrot.lane.b32.xlu0 %v6433_v20, %s11016_s14  ;;  %956 = vrot.lane.b32.xlu1 %v7733_v40, %s11017_s23 }
  0xdb   : > { %1529 = vmatpush1.bf16.msra.mxu0 %v1445_v36  ;;  %1546 = vmatprep.mubr.bf16.mxu0 %v7776_v11 }
  0xdc   : > { %v7789_v8 = vsel %vm10962_vm0, %v6171_v43, %v6331_v39  ;;  %v7794_v31 = vsel %vm10962_vm0, %v6331_v39, %v10898_v48  ;;  %v6212_v39 = vunpack.i.h.bf16 %v7548_v44 }
  0xdd   : > { %11018 = vst [vmem:[#allocation13_spill] sm:$0xff] %v7794_v31  ;;  %v7796_v16 = vpop.permute.xlu1 %6334  ;;  %v7798_v29 = vpop.permute.xlu0 %6339  ;;  %v6443_v20 = vpack.i.bf16 %v7794_v31, %v7789_v8 }
  0xde   : > { %v10892_v36 = vunpack.i.h.bf16 %v7796_v16  ;;  %v6336_v41 = vunpack.i.l.bf16 %v7796_v16  ;;  %v10889_v19 = vunpack.i.h.bf16 %v7798_v29  ;;  %v6341_v43 = vunpack.i.l.bf16 %v7798_v29  ;;  %839 = vrot.lane.b32.xlu0 %v7733_v40, %s11019_s27 }
  0xdf   : > { %6444 = vrot.lane.b32.xlu1 %v6443_v20, %s11020_s1  ;;  %v1017_v63 = vsel %vm10935_vm3, %v6211_v55, %v6212_v39 }
  0xe0   : > { %v7813_v23 = vsel %vm10936_vm2, %v6191_v32, %v6341_v43  ;;  %v7818_v52 = vsel %vm10936_vm2, %v6341_v43, %v10889_v19  ;;  %v7823_v26 = vsel %vm10961_vm1, %v6181_v22, %v6336_v41  ;;  %v7828_v20 = vsel %vm10961_vm1, %v6336_v41, %v10892_v36  ;;  %v7843_v22 = vld [vmem:[%s7437_s19 + $0x18] sm:$0xff]  ;;  %v7852_v19 = vld [vmem:[%s7437_s19 + $0x30] sm:$0xff] }
  0xe1   : > { %11021 = vst [vmem:[#allocation14_spill] sm:$0xff] %v7818_v52  ;;  %11022 = vst [vmem:[#allocation15_spill] sm:$0xff] %v7828_v20  ;;  %v7830_v25 = vpop.permute.xlu1 %1004  ;;  %v6453_v32 = vpack.i.bf16 %v7818_v52, %v7813_v23  ;;  %v6438_v41 = vpack.i.bf16 %v7733_v40, %v7843_v22  ;;  %v7857_v13 = vpop.permute.xlu0 %6344  ;;  %v7863_v36 = vpack.i.bf16 %v7855_v54, %v7852_v19 }
  0xe2   : > { %11023 = vst [vmem:[#allocation16_spill] sm:$0xff] %v7830_v25  ;;  %v1018_v18 = vsel %vm10935_vm3, %v6212_v39, %v7830_v25  ;;  %917 = vrot.lane.b32.xlu0 %v7733_v40, %s11024_s21  ;;  %11026 = vst [vmem:[#allocation18_spill] sm:$0xff] %v7857_v13  ;;  %v6448_v44 = vpack.i.bf16 %v7828_v20, %v7823_v26  ;;  %v10896_v55 = vunpack.i.h.bf16 %v7857_v13  ;;  %v6346_v39 = vunpack.i.l.bf16 %v7857_v13 }
  0xe3   : > { %6454 = vrot.lane.b32.xlu1 %v6453_v32, %s11020_s1  ;;  %v6463_v1 = vpack.i.bf16 %v1018_v18, %v1017_v63  ;;  %v6326_v18 = vunpack.i.l.bf16 %v7772_v33 }
  0xe4   : > { %v7880_v63 = vsel %vm10895_vm6, %v6346_v39, %v10896_v55 }
  0xe5   : > { %11028 = vst [vmem:[#allocation19_spill] sm:$0xff] %v7880_v63 }
  0xe6   : > { %6439 = vrot.lane.b32.xlu0 %v6438_v41, %s11020_s1 }
  0xe7   : > { %6464 = vrot.lane.b32.xlu1 %v6463_v1, %s11020_s1  ;;  %v7875_v1 = vsel %vm10895_vm6, %v6201_v6, %v6346_v39  ;;  %v10903_v6 = vunpack.i.h.bf16 %v7772_v33  ;;  %vm1218_vm6 = vcmask 252928  }
  0xe8   : > { %v6468_v32 = vpack.i.bf16 %v7880_v63, %v7875_v1 }
  0xe9   : > { %v1220_v55 = vsel %vm1218_vm6, %v6326_v18, %v10903_v6 }
  0xea   : > { %6449 = vrot.lane.b32.xlu0 %v6448_v44, %s11020_s1 }
  0xeb   : > { %6474 = vrot.lane.b32.xlu1 %v7863_v36, %s11027_s24 }
  0xee   : > { %6459 = vrot.lane.b32.xlu0 %v7863_v36, %s11029_s12 }
  0xf2   : > { %6469 = vrot.lane.b32.xlu0 %v6468_v32, %s11020_s1 }
  0xf6   : > { %6479 = vrot.lane.b32.xlu0 %v7863_v36, %s11003_s29 }
 0x120   : > { %v6350_v38 = vpop.permute.xlu1 %6349 }
 0x121   : > { %v6351_v54 = vunpack.i.l.bf16 %v6350_v38 }
 0x124   : > { %v7891_v41 = vpop.permute.xlu1 %6359 }
 0x125   : > { %11030 = vst [vmem:[#allocation20_spill] sm:$0xff] %v7891_v41  ;;  %v10905_v44 = vunpack.i.h.bf16 %v7891_v41  ;;  %v6361_v39 = vunpack.i.l.bf16 %v7891_v41 }
 0x127   : > { %v1229_v32 = vsel %vm1218_vm6, %v6361_v39, %v10905_v44 }
 0x128   : > { %v7901_v3 = vpop.permute.xlu0 %6354  ;;  %v7903_v62 = vpop.permute.xlu1 %6369  ;;  %v1455_v48 = vpack.c.bf16 %v1229_v32, %v1220_v55 }
 0x129   : > { %v10910_v53 = vunpack.i.h.bf16 %v7903_v62  ;;  %v6371_v60 = vunpack.i.l.bf16 %v7903_v62 }
 0x12a   : > { %1530 = vmatprep.subr.bf16.mxu0 %v1455_v48 }
 0x12c   : > { %v6365_v42 = vpop.permute.xlu0 %6364  ;;  %v7905_v43 = vpop.permute.xlu1 %6384 }
 0x12d   : > { %v6367_v35 = vunpack.i.h.bf16 %v6365_v42  ;;  %v6366_v14 = vunpack.i.l.bf16 %v6365_v42  ;;  %v1238_v42 = vsel %vm1218_vm6, %v6371_v60, %v10910_v53  ;;  %v6352_v53 = vunpack.i.h.bf16 %v6350_v38 }
 0x12f   : > { %v1219_v6 = vsel %vm1218_vm6, %v6366_v14, %v6326_v18  ;;  %v1228_v63 = vsel %vm1218_vm6, %v6367_v35, %v6361_v39 }
 0x130   : > { %v7911_v44 = vpop.permute.xlu0 %6374  ;;  %v7913_v20 = vpop.permute.xlu1 %6404  ;;  %v1454_v52 = vpack.c.bf16 %v1228_v63, %v1219_v6  ;;  %v6386_v6 = vunpack.i.l.bf16 %v7905_v43 }
 0x131   : > { %v10913_v48 = vunpack.i.h.bf16 %v7911_v44  ;;  %v6376_v55 = vunpack.i.l.bf16 %v7911_v44 }
 0x132   : > { %1531 = vmatpush1.bf16.msra.mxu0 %v1454_v52 }
 0x133   : > { %v1247_v14 = vsel %vm1218_vm6, %v6376_v55, %v10913_v48 }
 0x134   : > { %v6380_v18 = vpop.permute.xlu0 %6379  ;;  %v7923_v35 = vpop.permute.xlu1 %6409  ;;  %v1464_v39 = vpack.c.bf16 %v1247_v14, %v1238_v42 }
 0x135   : > { %v6382_v32 = vunpack.i.h.bf16 %v6380_v18  ;;  %v6381_v31 = vunpack.i.l.bf16 %v6380_v18  ;;  %v10926_v59 = vunpack.i.h.bf16 %v7923_v35 }
 0x136   : > { %1532 = vmatprep.subr.bf16.mxu0 %v1464_v39 }
 0x137   : > { %v1237_v52 = vsel %vm1218_vm6, %v6381_v31, %v6371_v60  ;;  %v1246_v40 = vsel %vm1218_vm6, %v6382_v32, %v6376_v55  ;;  %v6406_v60 = vunpack.i.l.bf16 %v7913_v20  ;;  %v11032_v31 = vunpack.i.h.bf16 %v7905_v43 }
 0x138   : > { %v7929_v13 = vpop.permute.xlu0 %6389  ;;  %v7931_v48 = vpop.permute.xlu1 %6414  ;;  %v1463_v25 = vpack.c.bf16 %v1246_v40, %v1237_v52  ;;  %v1255_v55 = vsel %vm1218_vm6, %v6351_v54, %v6386_v6  ;;  %v11033_v40 = vunpack.i.l.bf16 %v7562_v57 }
 0x139   : > { %11031 = vst [vmem:[#allocation21_spill] sm:$0xff] %v7931_v48  ;;  %v10918_v42 = vunpack.i.h.bf16 %v7929_v13  ;;  %v6391_v14 = vunpack.i.l.bf16 %v7929_v13  ;;  %v10916_v18 = vunpack.i.h.bf16 %v7931_v48  ;;  %v6416_v63 = vunpack.i.l.bf16 %v7931_v48 }
 0x13a   : > { %1533 = vmatpush1.bf16.msra.mxu0 %v1463_v25  ;;  %v1256_v38 = vsel %vm1218_vm6, %v6386_v6, %v11032_v31  ;;  %v6357_v31 = vunpack.i.h.bf16 %v7901_v3 }
 0x13b   : > { %v7946_v32 = vsel %vm665_vm4, %v11033_v40, %v6416_v63  ;;  %v7951_v52 = vsel %vm665_vm4, %v6416_v63, %v10916_v18  ;;  %v1265_v25 = vsel %vm1218_vm6, %v6391_v14, %v10918_v42  ;;  %v1264_v39 = vsel %vm1218_vm6, %v6352_v53, %v6391_v14 }
 0x13c   : > { %11034 = vst [vmem:[#allocation22_spill] sm:$0xff] %v7951_v52  ;;  %v7958_v41 = vpop.permute.xlu0 %6394  ;;  %v7960_v54 = vpop.permute.xlu1 %6424  ;;  %v6488_v57 = vpack.i.bf16 %v7951_v52, %v7946_v32  ;;  %v1473_v6 = vpack.c.bf16 %v1265_v25, %v1256_v38  ;;  %v1472_v40 = vpack.c.bf16 %v1264_v39, %v1255_v55  ;;  %v6356_v63 = vunpack.i.l.bf16 %v7901_v3  ;;  %v7225_v52 = vld [vmem:[%s7437_s19 + $0x10] sm:$0xff] }
 0x13d   : > { %11035 = vst [vmem:[#allocation23_spill] sm:$0xff] %v7960_v54  ;;  %v10920_v18 = vunpack.i.h.bf16 %v7958_v41  ;;  %v6396_v48 = vunpack.i.l.bf16 %v7958_v41  ;;  %v11036_v53 = vunpack.i.h.bf16 %v7913_v20  ;;  %v1282_v42 = vsel %vm1218_vm6, %v6357_v31, %v6406_v60 }
 0x13e   : > { %6489 = vrot.lane.b32.xlu0 %v6488_v57, %s11020_s1  ;;  %1534 = vmatprep.subr.bf16.mxu0 %v1473_v6  ;;  %v6426_v38 = vunpack.i.l.bf16 %v7960_v54 }
 0x13f   : > { %v1283_v14 = vsel %vm1218_vm6, %v6406_v60, %v11036_v53  ;;  %1535 = vmatpush1.bf16.msra.mxu0 %v1472_v40  ;;  %v1274_v3 = vsel %vm1218_vm6, %v6396_v48, %v10920_v18  ;;  %v1273_v39 = vsel %vm1218_vm6, %v6356_v63, %v6396_v48  ;;  %v6411_v18 = vunpack.i.l.bf16 %v7923_v35 }
 0x140   : > { %v7978_v55 = vpop.permute.xlu0 %6399  ;;  %v7980_v25 = vpop.permute.xlu1 %6429  ;;  %v1482_v57 = vpack.c.bf16 %v1283_v14, %v1274_v3  ;;  %v1481_v6 = vpack.c.bf16 %v1282_v42, %v1273_v39  ;;  %v11037_v48 = vunpack.i.l.bf16 %v7556_v50  ;;  %v11039_v14 = vunpack.i.h.bf16 %v7960_v54 }
 0x141   : > { %v10921_v53 = vunpack.i.h.bf16 %v7978_v55  ;;  %v6401_v60 = vunpack.i.l.bf16 %v7978_v55  ;;  %v10922_v31 = vunpack.i.h.bf16 %v7980_v25  ;;  %v10923_v40 = vunpack.i.l.bf16 %v7980_v25 }
 0x142   : > { %6499 = vrot.lane.b32.xlu0 %v7863_v36, %s11004_s18  ;;  %1536 = vmatprep.subr.bf16.mxu0 %v1482_v57  ;;  %v8003_v3 = vsel %vm701_vm7, %v6426_v38, %v11039_v14 }
 0x143   : > { %1537 = vmatpush1.bf16.msra.mxu0 %v1481_v6  ;;  %v7993_v42 = vsel %vm629_vm5, %v11037_v48, %v6401_v60  ;;  %v7998_v63 = vsel %vm629_vm5, %v6401_v60, %v10921_v53  ;;  %11040 = vst [vmem:[#allocation25_spill] sm:$0xff] %v8003_v3  ;;  %v8010_v39 = vsel %vm737_vm9, %v10923_v40, %v10922_v31 }
 0x144   : > { %11038 = vst [vmem:[#allocation24_spill] sm:$0xff] %v7998_v63  ;;  %11041 = vst [vmem:[#allocation26_spill] sm:$0xff] %v8010_v39  ;;  %v6420_v50 = vpop.permute.xlu0 %6419  ;;  %v8012_v57 = vpop.permute.xlu1 %800  ;;  %v6483_v6 = vpack.i.bf16 %v7998_v63, %v7993_v42  ;;  %v1292_v31 = vsel %vm1218_vm6, %v6411_v18, %v10926_v59 }
 0x145   : > { %v8020_v14 = vunpack.i.h.bf16 %v6420_v50  ;;  %v6421_v53 = vunpack.i.l.bf16 %v6420_v50 }
 0x146   : > { %6484 = vrot.lane.b32.xlu1 %v6483_v6, %s11020_s1  ;;  %6509 = vrot.lane.b32.xlu0 %v7863_v36, %s11008_s28  ;;  %v11043_v6 = vunpack.i.l.bf16 %v7583_v7 }
 0x147   : > { %v1491_v40 = vpack.c.bf16 %v8020_v14, %v1292_v31  ;;  %v1291_v54 = vsel %vm1218_vm6, %v6421_v53, %v6411_v18  ;;  %v8042_v59 = vpack.c.bf16 %v8020_v14, %v8020_v14 }
 0x148   : > { %v8030_v60 = vpop.permute.xlu0 %547  ;;  %v8032_v48 = vpop.permute.xlu1 %878  ;;  %v1490_v50 = vpack.c.bf16 %v8020_v14, %v1291_v54  ;;  %v8038_v39 = vsel %vm701_vm7, %v11043_v6, %v6426_v38  ;;  %v8059_v38 = vld [vmem:[%s7437_s19 + $0x28] sm:$0xff] }
 0x149   : > { %11042 = vst [vmem:[#allocation27_spill] sm:$0xff] %v8030_v60  ;;  %1538 = vmatprep.subr.bf16.mxu0 %v1491_v40  ;;  %v6503_v7 = vpack.i.bf16 %v8003_v3, %v8038_v39  ;;  %11044 = vst [vmem:[#allocation28_spill] sm:$0xff] %v8059_v38  ;;  %v6528_v53 = vpack.i.bf16 %v7852_v19, %v8059_v38  ;;  %v1384_v38 = vpack.c.bf16 %v7554_v49, %v7225_v52 }
 0x14a   : > { %6494 = vrot.lane.b32.xlu1 %v7863_v36, %s11005_s15  ;;  %6519 = vrot.lane.b32.xlu0 %v7863_v36, %s11007_s20  ;;  %v11046_v49 = vpack.c.bf16 %v7813_v23, %v7823_v26  ;;  %v11048_v26 = vunpack.i.h.bf16 %v7903_v62 }
 0x14b   : > { %1539 = vmatpush1.bf16.msra.mxu0 %v1490_v50 }
 0x14c   : > { %1540 = vmatprep.subr.bf16.mxu0 %v8042_v59  ;;  %v8049_v18 = vpop.permute.xlu0 %6434  ;;  %v8051_v54 = vpop.permute.xlu1 %956 }
 0x14e   : > { %6504 = vrot.lane.b32.xlu1 %v6503_v7, %s11020_s1  ;;  %731 = vrot.lane.b32.xlu0 %v7852_v19, %s11009_s16  ;;  %v1385_v7 = vpack.c.bf16 %v7789_v8, %v7843_v22 }
 0x14f   : > { %1541 = vmatpush1.bf16.msra.mxu0 %v8042_v59 }
 0x150   : > { %1542 = vmatprep.subr.bf16.mxu0 %v8042_v59  ;;  %v8065_v31 = vpop.permute.xlu0 %839 }
 0x151   : > { %v8067_v40 = vpop.permute.xlu1 %6444 }
 0x152   : > { %6514 = vrot.lane.b32.xlu1 %v7863_v36, %s11006_s26  ;;  %6529 = vrot.lane.b32.xlu0 %v6528_v53, %s11011_s0  ;;  %v8085_v36 = vcombine.low %v7768_v47, %v7768_v47  ;;  %v11045_v47 = vunpack.i.h.bf16 %v7605_v28  ;;  %v11047_v28 = vunpack.i.h.bf16 %v7911_v44  ;;  %v11051_v44 = vpack.c.bf16 %v7618_v34, %v7637_v58 }
 0x153   : > { %1543 = vmatpush1.bf16.msra.mxu0 %v8042_v59  ;;  %v11055_v58 = vunpack.i.h.bf16 %v7905_v43 }
 0x154   : > { %1544 = vmatprep.subr.bf16.mxu0 %v8042_v59  ;;  %v8074_v50 = vpop.permute.xlu0 %917  ;;  %v561_v22 = vsel %vm557_vm8, %v11045_v47, %v8030_v60 }
 0x155   : > { %v8076_v6 = vpop.permute.xlu1 %6454  ;;  %v1403_v47 = vpack.c.bf16 %v7875_v1, %v561_v22 }
 0x156   : > { %6524 = vrot.lane.b32.xlu1 %v6528_v53, %s11012_s17  ;;  %6539 = vrot.lane.b32.xlu0 %v6528_v53, %s11013_s30  ;;  %v10932_v8 = vunpack.i.l.bf16 %v8076_v6 }
 0x157   : > { %1545 = vmatpush1.bf16.msra.mxu0 %v8042_v59 }
 0x158   : > { %1555 = vmatprep.subr.bf16.mxu0 %v1385_v7  ;;  %v8087_v3 = vpop.permute.xlu0 %6439 }
 0x159   : > { %v8089_v63 = vpop.permute.xlu1 %6464 }
 0x15a   : > { %767 = vrot.lane.b32.xlu1 %v7852_v19, %s11016_s14  ;;  %6549 = vrot.lane.b32.xlu0 %v6528_v53, %s11017_s23  ;;  %v6466_v1 = vunpack.i.l.bf16 %v8089_v63 }
 0x15b   : > { %1547 = vmatmul.mubr.bf16.vlgmr.msra.gmra.mrb[0].mxu0 %v8085_v36 }
 0x15c   : > { %1556 = vmatpush1.bf16.msra.mxu0 %v1384_v38  ;;  %v8102_v7 = vpop.permute.xlu0 %6449  ;;  %1587 = vmatprep.mubr.bf16.mxu0 %v7776_v11  ;;  %v8117_v38 = vsel %vm1218_vm6, %v11047_v28, %v10932_v8 }
 0x15d   : > { %1557 = vmatprep.subr.bf16.mxu0 %v11046_v49  ;;  %v10933_v19 = vunpack.i.l.bf16 %v8102_v7  ;;  %v8109_v52 = vpop.permute.xlu1 %6474  ;;  %v11049_v49 = vpack.c.bf16 %v7536_v37, %v7523_v30  ;;  %v1412_v30 = vpack.c.bf16 %v7946_v32, %v7993_v42  ;;  %v11050_v37 = vunpack.i.h.bf16 %v7770_v10 }
 0x15e   : > { %6534 = vrot.lane.b32.xlu1 %v6528_v53, %s11019_s27  ;;  %v10949_v28 = vunpack.i.h.bf16 %v8109_v52  ;;  %v6476_v8 = vunpack.i.l.bf16 %v8109_v52  ;;  %v11052_v32 = vunpack.i.l.bf16 %v7980_v25  ;;  %v11053_v42 = vunpack.i.h.bf16 %v7639_v61 }
 0x15f   : > { %v8124_v23 = vsel %vm1218_vm6, %v11048_v26, %v10933_v19  ;;  %v1257_v61 = vsel %vm1218_vm6, %v11055_v58, %v6466_v1 }
 0x160   : > { %1558 = vmatpush1.bf16.msra.mxu0 %v11049_v49  ;;  %v8130_v60 = vpop.permute.xlu0 %6459  ;;  %v8174_v34 = vsel %vm10961_vm1, %v6476_v8, %v10949_v28 }
 0x161   : > { %1559 = vmatprep.subr.bf16.mxu0 %v1403_v47  ;;  %v10934_v62 = vunpack.i.h.bf16 %v8130_v60  ;;  %v6461_v26 = vunpack.i.l.bf16 %v8130_v60 }
 0x162   : > { %6544 = vrot.lane.b32.xlu1 %v6528_v53, %s11024_s21 }
 0x163   : > { %v8145_v22 = vsel %vm10962_vm0, %v11050_v37, %v6461_v26  ;;  %v8150_v47 = vsel %vm10962_vm0, %v6461_v26, %v10934_v62  ;;  %v741_v37 = vsel %vm737_vm9, %v11053_v42, %v11052_v32  ;;  %v11054_v62 = vunpack.i.h.bf16 %v7796_v16 }
 0x164   : > { %1560 = vmatpush1.bf16.msra.mxu0 %v11051_v44  ;;  %v8156_v19 = vpop.permute.xlu0 %6469  ;;  %v6558_v10 = vpack.i.bf16 %v8150_v47, %v8145_v22  ;;  %v11056_v16 = vunpack.i.h.bf16 %v7929_v13  ;;  %v11058_v32 = vunpack.i.l.bf16 %v8049_v18  ;;  %v11059_v13 = vunpack.i.h.bf16 %v7673_v51 }
 0x165   : > { %1561 = vmatprep.subr.bf16.mxu0 %v1412_v30  ;;  %v6471_v26 = vunpack.i.l.bf16 %v8156_v19  ;;  %v8169_v49 = vsel %vm10961_vm1, %v11054_v62, %v6476_v8  ;;  %v1421_v62 = vpack.c.bf16 %v741_v37, %v8038_v39  ;;  %v8188_v30 = vld [vmem:[%s7437_s19 + $0x40] sm:$0xff]  ;;  %v8191_v8 = vld [vmem:[%s7437_s19 + $0x48] sm:$0xff] }
 0x166   : > { %6554 = vrot.lane.b32.xlu1 %v6528_v53, %s11020_s1  ;;  %6559 = vrot.lane.b32.xlu0 %v6558_v10, %s11020_s1  ;;  %v11057_v53 = vpack.c.bf16 %v7575_v4, %v7580_v5  ;;  %v6563_v43 = vpack.i.bf16 %v8174_v34, %v8169_v49  ;;  %v777_v42 = vsel %vm773_vm11, %v11059_v13, %v11058_v32  ;;  %v11060_v4 = vunpack.i.h.bf16 %v7671_v56 }
 0x167   : > { %v1266_v44 = vsel %vm1218_vm6, %v11056_v16, %v6471_v26  ;;  %v8214_v16 = vpack.i.bf16 %v8191_v8, %v8188_v30  ;;  %v11062_v56 = vunpack.i.h.bf16 %v7705_v46 }
 0x168   : > { %1562 = vmatpush1.bf16.msra.mxu0 %v11057_v53  ;;  %v8196_v10 = vpop.permute.xlu0 %6479  ;;  %v1474_v39 = vpack.c.bf16 %v1266_v44, %v1257_v61  ;;  %v816_v5 = vsel %vm812_vm10, %v11060_v4, %v8012_v57  ;;  %v11061_v53 = vunpack.i.h.bf16 %v7798_v29  ;;  %v10953_v4 = vunpack.i.h.bf16 %v8087_v3 }
 0x169   : > { %1563 = vmatprep.subr.bf16.mxu0 %v1421_v62  ;;  %v10945_v37 = vunpack.i.h.bf16 %v8196_v10  ;;  %v6481_v58 = vunpack.i.l.bf16 %v8196_v10  ;;  %v1430_v51 = vpack.c.bf16 %v816_v5, %v777_v42  ;;  %v855_v62 = vsel %vm851_vm13, %v11062_v56, %v8065_v31 }
 0x16a   : > { %6564 = vrot.lane.b32.xlu1 %v6563_v43, %s11020_s1  ;;  %v11063_v43 = vpack.c.bf16 %v7657_v21, %v7613_v24  ;;  %v11064_v42 = vunpack.i.h.bf16 %v7703_v45  ;;  %v11065_v21 = vunpack.i.h.bf16 %v7741_v0  ;;  %v6441_v5 = vunpack.i.l.bf16 %v8087_v3 }
 0x16b   : > { %v8219_v61 = vsel %vm10936_vm2, %v11061_v53, %v6481_v58  ;;  %v8224_v44 = vsel %vm10936_vm2, %v6481_v58, %v10945_v37  ;;  %v11066_v45 = vpack.c.bf16 %v7687_v12, %v7692_v15  ;;  %v10952_v56 = vunpack.i.h.bf16 %v8067_v40  ;;  %v11095_v37 = vld [vmem:[#allocation13_spill] sm:$0xff] }
 0x16c   : > { %1564 = vmatpush1.bf16.msra.mxu0 %v11063_v43  ;;  %v6568_v29 = vpack.i.bf16 %v8224_v44, %v8219_v61  ;;  %v1396_v13 = vpack.c.bf16 %v8219_v61, %v8169_v49  ;;  %v894_v46 = vsel %vm890_vm12, %v11064_v42, %v8032_v48  ;;  %v933_v58 = vsel %vm929_vm15, %v11065_v21, %v8074_v50  ;;  %v11100_v49 = vld [vmem:[#allocation19_spill] sm:$0xff] }
 0x16d   : > { %1565 = vmatprep.subr.bf16.mxu0 %v1430_v51  ;;  %v1439_v24 = vpack.c.bf16 %v894_v46, %v855_v62  ;;  %v11067_v51 = vunpack.i.h.bf16 %v7739_v2  ;;  %v6446_v0 = vunpack.i.l.bf16 %v8067_v40  ;;  %v10950_v43 = vunpack.i.h.bf16 %v8102_v7 }
 0x16e   : > { %6574 = vrot.lane.b32.xlu1 %v8214_v16, %s11029_s12  ;;  %6569 = vrot.lane.b32.xlu0 %v6568_v29, %s11020_s1  ;;  %v11068_v29 = vpack.c.bf16 %v7720_v27, %v7725_v17  ;;  %v1222_v12 = vsel %vm1218_vm6, %v6441_v5, %v10953_v4  ;;  %v10951_v15 = vunpack.i.h.bf16 %v8076_v6  ;;  %v11069_v42 = vunpack.i.h.bf16 %v7772_v33  ;;  %v11070_v27 = vld [vmem:[#allocation12_spill] sm:$0xff] }
 0x16f   : > { %v972_v53 = vsel %vm968_vm14, %v11067_v51, %v8051_v54  ;;  %v1231_v2 = vsel %vm1218_vm6, %v6446_v0, %v10952_v56  ;;  %v10946_v21 = vunpack.i.h.bf16 %v8156_v19  ;;  %v11071_v17 = vpack.c.bf16 %v7756_v9, %v11070_v27  ;;  %v11073_v51 = vld [vmem:[#allocation20_spill] sm:$0xff] }
 0x170   : > { %1566 = vmatpush1.bf16.msra.mxu0 %v11066_v45  ;;  %v1448_v62 = vpack.c.bf16 %v972_v53, %v933_v58  ;;  %v1221_v46 = vsel %vm1218_vm6, %v11069_v42, %v6441_v5  ;;  %v11072_v58 = vunpack.i.l.bf16 %v8102_v7  ;;  %v11074_v53 = vunpack.i.h.bf16 %v11073_v51 }
 0x171   : > { %1567 = vmatprep.subr.bf16.mxu0 %v1439_v24  ;;  %v1457_v24 = vpack.c.bf16 %v1231_v2, %v1222_v12  ;;  %v10947_v33 = vunpack.i.h.bf16 %v8089_v63  ;;  %v1267_v2 = vsel %vm1218_vm6, %v6471_v26, %v10946_v21 }
 0x172   : > { %v1240_v45 = vsel %vm1218_vm6, %v11072_v58, %v10950_v43 }
 0x174   : > { %1568 = vmatpush1.bf16.msra.mxu0 %v11068_v29  ;;  %v11075_v29 = vunpack.i.l.bf16 %v8076_v6 }
 0x175   : > { %1569 = vmatprep.subr.bf16.mxu0 %v1448_v62  ;;  %v1230_v62 = vsel %vm1218_vm6, %v11074_v53, %v6446_v0  ;;  %v1258_v0 = vsel %vm1218_vm6, %v6466_v1, %v10947_v33  ;;  %v11077_v1 = vld [vmem:[#allocation16_spill] sm:$0xff]  ;;  %v11098_v33 = vld [vmem:[#allocation15_spill] sm:$0xff] }
 0x176   : > { %v1456_v5 = vpack.c.bf16 %v1230_v62, %v1221_v46  ;;  %v1249_v9 = vsel %vm1218_vm6, %v11075_v29, %v10951_v15  ;;  %v1475_v42 = vpack.c.bf16 %v1267_v2, %v1258_v0  ;;  %v11076_v46 = vpack.c.bf16 %v8117_v38, %v8124_v23 }
 0x177   : > { %v1466_v12 = vpack.c.bf16 %v1249_v9, %v1240_v45  ;;  %v11079_v0 = vunpack.i.h.bf16 %v7958_v41  ;;  %v11080_v41 = vunpack.i.h.bf16 %v7978_v55 }
 0x178   : > { %1570 = vmatpush1.bf16.msra.mxu0 %v11071_v17 }
 0x179   : > { %1571 = vmatprep.subr.bf16.mxu0 %v1457_v24 }
 0x17c   : > { %1572 = vmatpush1.bf16.msra.mxu0 %v1456_v5 }
 0x17d   : > { %1573 = vmatprep.subr.bf16.mxu0 %v1466_v12  ;;  %v11078_v12 = vunpack.i.h.bf16 %v7913_v20 }
 0x180   : > { %1574 = vmatpush1.bf16.msra.mxu0 %v11076_v46 }
 0x181   : > { %1575 = vmatprep.subr.bf16.mxu0 %v1475_v42 }
 0x184   : > { %1576 = vmatpush1.bf16.msra.mxu0 %v1474_v39 }
 0x1b0   : > { %v8304_v24 = vpop.permute.xlu0 %6489 }
 0x1b1   : > { %v10939_v58 = vunpack.i.h.bf16 %v8304_v24  ;;  %v6491_v45 = vunpack.i.l.bf16 %v8304_v24 }
 0x1b3   : > { %v1284_v2 = vsel %vm1218_vm6, %v11078_v12, %v6491_v45 }
 0x1b4   : > { %v8306_v27 = vpop.permute.xlu0 %6499 }
 0x1b5   : > { %v10938_v26 = vunpack.i.h.bf16 %v8306_v27  ;;  %v6501_v17 = vunpack.i.l.bf16 %v8306_v27 }
 0x1b7   : > { %v1019_v51 = vsel %vm10935_vm3, %v11077_v1, %v6501_v17  ;;  %v1020_v38 = vsel %vm10935_vm3, %v6501_v17, %v10938_v26  ;;  %v1285_v17 = vsel %vm1218_vm6, %v6491_v45, %v10939_v58  ;;  %v11081_v45 = vld [vmem:[#allocation18_spill] sm:$0xff]  ;;  %vm11083_vm3 = vcmask 785408  }
 0x1b8   : > { %v8317_v23 = vpop.permute.xlu1 %6484  ;;  %v8319_v39 = vpop.permute.xlu0 %6509  ;;  %v6578_v53 = vpack.i.bf16 %v1020_v38, %v1019_v51  ;;  %vm11084_vm2 = vmmov %vm11083_vm3 }
 0x1b9   : > { %v10940_v62 = vunpack.i.h.bf16 %v8317_v23  ;;  %v6486_v5 = vunpack.i.l.bf16 %v8317_v23  ;;  %v10937_v29 = vunpack.i.h.bf16 %v8319_v39  ;;  %v6511_v9 = vunpack.i.l.bf16 %v8319_v39 }
 0x1ba   : > { %6579 = vrot.lane.b32.xlu0 %v6578_v53, %s11020_s1 }
 0x1bb   : > { %v1275_v42 = vsel %vm1218_vm6, %v11079_v0, %v6486_v5  ;;  %v1276_v46 = vsel %vm1218_vm6, %v6486_v5, %v10940_v62  ;;  %v8345_v12 = vsel %vm629_vm5, %v11080_v41, %v6511_v9  ;;  %v8350_v5 = vsel %vm629_vm5, %v6511_v9, %v10937_v29  ;;  %v11086_v62 = vld [vmem:[#allocation23_spill] sm:$0xff] }
 0x1bc   : > { %v8338_v1 = vpop.permute.xlu1 %6494  ;;  %v1484_v51 = vpack.c.bf16 %v1285_v17, %v1276_v46  ;;  %v1483_v38 = vpack.c.bf16 %v1284_v2, %v1275_v42  ;;  %v8352_v0 = vpop.permute.xlu0 %6519  ;;  %v11082_v2 = vunpack.i.h.bf16 %v11081_v45  ;;  %v6598_v17 = vpack.i.bf16 %v8350_v5, %v8345_v12 }
 0x1bd   : > { %v10941_v20 = vunpack.i.h.bf16 %v8338_v1  ;;  %v6496_v53 = vunpack.i.l.bf16 %v8338_v1 }
 0x1be   : > { %6589 = vrot.lane.b32.xlu0 %v8214_v16, %s11027_s24  ;;  %1577 = vmatprep.subr.bf16.mxu0 %v1484_v51  ;;  %v10942_v51 = vunpack.i.h.bf16 %v8352_v0 }
 0x1bf   : > { %1578 = vmatpush1.bf16.msra.mxu0 %v1483_v38  ;;  %v8359_v42 = vsel %vm11083_vm3, %v11082_v2, %v6496_v53  ;;  %v8364_v55 = vsel %vm11084_vm2, %v6496_v53, %v10941_v20  ;;  %v6521_v38 = vunpack.i.l.bf16 %v8352_v0  ;;  %v11085_v53 = vunpack.i.h.bf16 %v7923_v35 }
 0x1c0   : > { %v8366_v46 = vpop.permute.xlu1 %6504  ;;  %v6583_v9 = vpack.i.bf16 %v8364_v55, %v8359_v42  ;;  %v11087_v20 = vunpack.i.h.bf16 %v11086_v62  ;;  %vm11123_vm2 = vcmask 1022976  }
 0x1c1   : > { %v10944_v41 = vunpack.i.h.bf16 %v8366_v46  ;;  %v6506_v45 = vunpack.i.l.bf16 %v8366_v46  ;;  %v8396_v35 = vsel %vm701_vm7, %v6521_v38, %v10942_v51  ;;  %vm11124_vm3 = vmmov %vm11123_vm2 }
 0x1c2   : > { %6584 = vrot.lane.b32.xlu1 %v6583_v9, %s11020_s1  ;;  %6599 = vrot.lane.b32.xlu0 %v6598_v17, %s11020_s1  ;;  %v8391_v9 = vsel %vm701_vm7, %v11087_v20, %v6521_v38 }
 0x1c3   : > { %v1293_v2 = vsel %vm1218_vm6, %v11085_v53, %v6506_v45  ;;  %v1294_v32 = vsel %vm1218_vm6, %v6506_v45, %v10944_v41  ;;  %v11094_v41 = vld [vmem:[#allocation11_spill] sm:$0xff] }
 0x1c4   : > { %v8384_v29 = vpop.permute.xlu1 %6514  ;;  %v1493_v26 = vpack.c.bf16 %v8020_v14, %v1294_v32  ;;  %v1492_v58 = vpack.c.bf16 %v8020_v14, %v1293_v2  ;;  %v11088_v32 = vld [vmem:[#allocation21_spill] sm:$0xff]  ;;  %v1386_v21 = vpack.c.bf16 %v11095_v37, %v11094_v41  ;;  %v11096_v37 = vld [vmem:[#allocation27_spill] sm:$0xff]  ;;  %v11097_v41 = vld [vmem:[#allocation14_spill] sm:$0xff] }
 0x1c5   : > { %v10943_v17 = vunpack.i.h.bf16 %v8384_v29  ;;  %v6516_v45 = vunpack.i.l.bf16 %v8384_v29  ;;  %v11089_v62 = vunpack.i.h.bf16 %v11088_v32 }
 0x1c6   : > { %6594 = vrot.lane.b32.xlu1 %v8214_v16, %s11003_s29  ;;  %6609 = vrot.lane.b32.xlu0 %v8214_v16, %s11005_s15  ;;  %s7318_s29 = smov [#allocation2]  }
 0x1c7   : > { %1579 = vmatprep.subr.bf16.mxu0 %v1493_v26  ;;  %v671_v20 = vsel %vm665_vm4, %v11089_v62, %v6516_v45  ;;  %v8410_v38 = vsel %vm665_vm4, %v6516_v45, %v10943_v17  ;;  %v6618_v26 = vpack.i.bf16 %v8396_v35, %v8391_v9 }
 0x1c8   : > { %1580 = vmatpush1.bf16.msra.mxu0 %v1492_v58  ;;  %v8412_v53 = vpop.permute.xlu1 %6524  ;;  %v6603_v2 = vpack.i.bf16 %v8410_v38, %v671_v20  ;;  %v11091_v58 = vld [vmem:[#allocation17_spill] sm:$0xff]  ;;  %v1414_v43 = vpack.c.bf16 %v671_v20, %v8345_v12 }
 0x1c9   : > { %1581 = vmatprep.subr.bf16.mxu0 %v8042_v59  ;;  %v6638_v32 = vpack.i.bf16 %v8188_v30, %v11091_v58  ;;  %v10948_v17 = vunpack.i.h.bf16 %v8412_v53  ;;  %v6526_v30 = vunpack.i.l.bf16 %v8412_v53 }
 0x1ca   : > { %6604 = vrot.lane.b32.xlu1 %v6603_v2, %s11020_s1  ;;  %6619 = vrot.lane.b32.xlu0 %v6618_v26, %s11020_s1  ;;  %v8439_v2 = vpop.permute.xlu0 %731  ;;  %v11093_v26 = vld [vmem:[#allocation28_spill] sm:$0xff] }
 0x1cb   : > { %v1387_v51 = vpack.c.bf16 %v8145_v22, %v11093_v26  ;;  %v563_v26 = vsel %vm557_vm8, %v6526_v30, %v10948_v17  ;;  %v11099_v17 = vpack.c.bf16 %v11097_v41, %v11098_v33  ;;  %v11102_v33 = vunpack.i.h.bf16 %v7980_v25 }
 0x1cc   : > { %1582 = vmatpush1.bf16.msra.mxu0 %v8042_v59  ;;  %v8423_v45 = vpop.permute.xlu1 %767 }
 0x1cd   : > { %11090 = vst [vmem:[#allocation12_spill] sm:$0xff] %v8423_v45  ;;  %1583 = vmatprep.subr.bf16.mxu0 %v8042_v59 }
 0x1ce   : > { %6614 = vrot.lane.b32.xlu1 %v8214_v16, %s11004_s18  ;;  %6629 = vrot.lane.b32.xlu0 %v8214_v16, %s11006_s26  ;;  %s7316_s26 = smov 56  }
 0x1d0   : > { %1584 = vmatpush1.bf16.msra.mxu0 %v8042_v59  ;;  %v8433_v62 = vpop.permute.xlu1 %6534 }
 0x1d1   : > { %11092 = vst [vmem:[#allocation20_spill] sm:$0xff] %v8433_v62  ;;  %1585 = vmatprep.subr.bf16.mxu0 %v8042_v59  ;;  %v10958_v25 = vunpack.i.h.bf16 %v8433_v62 }
 0x1d2   : > { %6624 = vrot.lane.b32.xlu1 %v8214_v16, %s11008_s28  ;;  %6639 = vrot.lane.b32.xlu0 %v6638_v32, %s11012_s17 }
 0x1d4   : > { %1586 = vmatpush1.bf16.msra.mxu0 %v8042_v59  ;;  %v8446_v58 = vpop.permute.xlu1 %6544 }
 0x1d5   : > { %1596 = vmatprep.subr.bf16.mxu0 %v1387_v51  ;;  %v8460_v51 = vpop.permute.xlu0 %6529 }
 0x1d6   : > { %6634 = vrot.lane.b32.xlu1 %v8214_v16, %s11007_s20  ;;  %6649 = vrot.lane.b32.xlu0 %v6638_v32, %s11016_s14  ;;  %v562_v16 = vsel %vm557_vm8, %v11096_v37, %v6526_v30  ;;  %v7311_v30 = vmov 0   ;;  %v6437_v37 = vunpack.i.h.bf16 %v8049_v18  ;;  %v6531_v12 = vunpack.i.l.bf16 %v8460_v51  ;;  %s7315_s20 = smov 120  }
 0x1d7   : > { %1588 = vmatmul.mubr.bf16.vlgmr.msra.gmra.mrb[4].mxu0 %v8085_v36  ;;  %v1404_v61 = vpack.c.bf16 %v11100_v49, %v562_v16  ;;  %6743 = vset.pattern.permute.xlu1 %v7311_v30 }
 0x1d8   : > { %1597 = vmatpush1.bf16.msra.mxu0 %v1386_v21  ;;  %v8454_v22 = vpop.permute.xlu1 %6554  ;;  %1628 = vmatprep.mubr.bf16.mxu0 %v7776_v11  ;;  %v1405_v21 = vpack.c.bf16 %v8359_v42, %v563_v26  ;;  %v743_v42 = vsel %vm737_vm9, %v11102_v33, %v8439_v2  ;;  %v11105_v33 = vld [vmem:[#allocation24_spill] sm:$0xff] }
 0x1d9   : > { %1598 = vmatprep.subr.bf16.mxu0 %v1396_v13  ;;  %v8478_v13 = vpop.permute.xlu0 %6539  ;;  %7039 = vset.pattern.permute.xlu0 %v7311_v30  ;;  %v1423_v41 = vpack.c.bf16 %v743_v42, %v8391_v9  ;;  %v6536_v30 = vunpack.i.l.bf16 %v8433_v62  ;;  %v11107_v9 = vunpack.i.h.bf16 %v8130_v60 }
 0x1da   : > { %6644 = vrot.lane.b32.xlu1 %v6638_v32, %s11009_s16  ;;  %6659 = vrot.lane.b32.xlu0 %v6638_v32, %s11019_s27  ;;  %11101 = vst [vmem:[#allocation16_spill] sm:$0xff] %v8478_v13  ;;  %v6541_v49 = vunpack.i.l.bf16 %v8478_v13  ;;  %v11108_v60 = vunpack.i.h.bf16 %v8478_v13 }
 0x1dc   : > { %1599 = vmatpush1.bf16.msra.mxu0 %v11099_v17  ;;  %v8473_v28 = vpop.permute.xlu1 %6564  ;;  %v10954_v17 = vunpack.i.h.bf16 %v8460_v51 }
 0x1dd   : > { %1600 = vmatprep.subr.bf16.mxu0 %v1405_v21  ;;  %v8509_v4 = vpop.permute.xlu0 %6549 }
 0x1de   : > { %6654 = vrot.lane.b32.xlu1 %v6638_v32, %s11011_s0  ;;  %6669 = vrot.lane.b32.xlu0 %v6638_v32, %s11024_s21  ;;  %v818_v56 = vsel %vm812_vm10, %v6531_v12, %v10954_v17  ;;  %v817_v17 = vsel %vm812_vm10, %v8012_v57, %v6531_v12 }
 0x1e0   : > { %1601 = vmatpush1.bf16.msra.mxu0 %v1404_v61  ;;  %v8486_v26 = vpop.permute.xlu1 %6574  ;;  %v779_v61 = vsel %vm773_vm11, %v6437_v37, %v8423_v45 }
 0x1e1   : > { %v10956_v16 = vunpack.i.h.bf16 %v8486_v26  ;;  %v8491_v21 = vunpack.i.l.bf16 %v8486_v26  ;;  %1602 = vmatprep.subr.bf16.mxu0 %v1414_v43  ;;  %v11104_v43 = vld [vmem:[#allocation22_spill] sm:$0xff]  ;;  %v1432_v45 = vpack.c.bf16 %v818_v56, %v779_v61  ;;  %v8541_v13 = vpop.permute.xlu0 %6559  ;;  %v11113_v56 = vunpack.i.h.bf16 %v8446_v58 }
 0x1e2   : > { %6664 = vrot.lane.b32.xlu1 %v6638_v32, %s11013_s30  ;;  %6679 = vrot.lane.b32.xlu0 %v6638_v32, %s11020_s1  ;;  %v11106_v15 = vpack.c.bf16 %v11104_v43, %v11105_v33  ;;  %v857_v33 = vsel %vm851_vm13, %v6536_v30, %v10958_v25  ;;  %v11110_v43 = vld [vmem:[#allocation25_spill] sm:$0xff]  ;;  %v11112_v25 = vunpack.i.l.bf16 %v8049_v18  ;;  %v11114_v61 = vunpack.i.h.bf16 %v8509_v4 }
 0x1e3   : > { %11103 = vst [vmem:[#allocation18_spill] sm:$0xff] %v8491_v21  ;;  %v8515_v42 = vsel %vm10962_vm0, %v11107_v9, %v8491_v21  ;;  %v989_v20 = vsel %vm10962_vm0, %v8491_v21, %v10956_v16  ;;  %v896_v9 = vsel %vm890_vm12, %v6541_v49, %v11108_v60  ;;  %v6546_v16 = vunpack.i.l.bf16 %v8446_v58 }
 0x1e4   : > { %1603 = vmatpush1.bf16.msra.mxu0 %v11106_v15  ;;  %v11109_v15 = vld [vmem:[#allocation26_spill] sm:$0xff]  ;;  %v778_v62 = vsel %vm773_vm11, %v11112_v25, %v6437_v37  ;;  %v1441_v60 = vpack.c.bf16 %v896_v9, %v857_v33  ;;  %v856_v18 = vsel %vm851_vm13, %v8065_v31, %v6536_v30  ;;  %v10967_v37 = vunpack.i.h.bf16 %v8454_v22 }
 0x1e5   : > { %1604 = vmatprep.subr.bf16.mxu0 %v1423_v41  ;;  %v6551_v41 = vunpack.i.l.bf16 %v8509_v4  ;;  %v11111_v21 = vpack.c.bf16 %v11109_v15, %v11110_v43  ;;  %v1431_v57 = vpack.c.bf16 %v817_v17, %v778_v62  ;;  %v935_v12 = vsel %vm929_vm15, %v6546_v16, %v11113_v56  ;;  %v8558_v17 = vpop.permute.xlu0 %6569 }
 0x1e6   : > { %6674 = vrot.lane.b32.xlu1 %v6638_v32, %s11017_s23  ;;  %v6683_v32 = vpack.i.bf16 %v989_v20, %v8515_v42  ;;  %v6556_v20 = vunpack.i.l.bf16 %v8454_v22  ;;  %v6561_v25 = vunpack.i.l.bf16 %v8541_v13  ;;  %v895_v62 = vsel %vm890_vm12, %v8032_v48, %v6541_v49 }
 0x1e7   : > { %v1440_v43 = vpack.c.bf16 %v895_v62, %v856_v18  ;;  %v934_v31 = vsel %vm929_vm15, %v8074_v50, %v6546_v16  ;;  %v10965_v30 = vunpack.i.h.bf16 %v8558_v17  ;;  %v6571_v33 = vunpack.i.l.bf16 %v8558_v17 }
 0x1e8   : > { %1605 = vmatpush1.bf16.msra.mxu0 %v11111_v21  ;;  %v974_v21 = vsel %vm968_vm14, %v6551_v41, %v11114_v61  ;;  %v1224_v9 = vsel %vm1218_vm6, %v6556_v20, %v10967_v37  ;;  %v973_v49 = vsel %vm968_vm14, %v8051_v54, %v6551_v41  ;;  %v6566_v50 = vunpack.i.l.bf16 %v8473_v28 }
 0x1e9   : > { %1606 = vmatprep.subr.bf16.mxu0 %v1432_v45  ;;  %v10968_v45 = vunpack.i.h.bf16 %v8541_v13  ;;  %v1450_v15 = vpack.c.bf16 %v974_v21, %v935_v12  ;;  %v1449_v16 = vpack.c.bf16 %v973_v49, %v934_v31  ;;  %v11116_v56 = vunpack.i.h.bf16 %v8067_v40 }
 0x1ea   : > { %6684 = vrot.lane.b32.xlu1 %v6683_v32, %s11020_s1  ;;  %v10966_v32 = vunpack.i.h.bf16 %v8473_v28  ;;  %v1251_v54 = vsel %vm1218_vm6, %v6571_v33, %v10965_v30  ;;  %v11118_v40 = vunpack.i.h.bf16 %v8102_v7  ;;  %v11119_v7 = vunpack.i.h.bf16 %v8109_v52 }
 0x1eb   : > { %v1233_v48 = vsel %vm1218_vm6, %v6561_v25, %v10968_v45  ;;  %v1232_v12 = vsel %vm1218_vm6, %v11116_v56, %v6561_v25  ;;  %v11120_v52 = vunpack.i.h.bf16 %v8089_v63 }
 0x1ec   : > { %1607 = vmatpush1.bf16.msra.mxu0 %v1431_v57  ;;  %v1459_v61 = vpack.c.bf16 %v1233_v48, %v1224_v9  ;;  %v1242_v21 = vsel %vm1218_vm6, %v6566_v50, %v10966_v32  ;;  %v1241_v25 = vsel %vm1218_vm6, %v11118_v40, %v6566_v50 }
 0x1ed   : > { %1608 = vmatprep.subr.bf16.mxu0 %v1441_v60  ;;  %v11115_v60 = vunpack.i.h.bf16 %v8087_v3  ;;  %v11117_v3 = vunpack.i.h.bf16 %v8076_v6 }
 0x1ef   : > { %v1223_v57 = vsel %vm1218_vm6, %v11115_v60, %v6556_v20  ;;  %v1250_v18 = vsel %vm1218_vm6, %v11117_v3, %v6571_v33  ;;  %v1468_v20 = vpack.c.bf16 %v1251_v54, %v1242_v21 }
 0x1f0   : > { %1609 = vmatpush1.bf16.msra.mxu0 %v1440_v43  ;;  %v1458_v41 = vpack.c.bf16 %v1232_v12, %v1223_v57  ;;  %v1467_v62 = vpack.c.bf16 %v1250_v18, %v1241_v25 }
 0x1f1   : > { %1610 = vmatprep.subr.bf16.mxu0 %v1450_v15 }
 0x1f4   : > { %1611 = vmatpush1.bf16.msra.mxu0 %v1449_v16 }
 0x1f5   : > { %1612 = vmatprep.subr.bf16.mxu0 %v1459_v61  ;;  %v11121_v61 = vunpack.i.h.bf16 %v8156_v19 }
 0x1f8   : > { %1613 = vmatpush1.bf16.msra.mxu0 %v1458_v41 }
 0x1f9   : > { %1614 = vmatprep.subr.bf16.mxu0 %v1468_v20 }
 0x1fc   : > { %1615 = vmatpush1.bf16.msra.mxu0 %v1467_v62 }
 0x22c   : > { %v8592_v15 = vpop.permute.xlu0 %6579 }
 0x22d   : > { %v10963_v6 = vunpack.i.h.bf16 %v8592_v15  ;;  %v6581_v33 = vunpack.i.l.bf16 %v8592_v15 }
 0x22f   : > { %v1259_v12 = vsel %vm1218_vm6, %v11120_v52, %v6581_v33  ;;  %v1260_v41 = vsel %vm1218_vm6, %v6581_v33, %v10963_v6  ;;  %v11125_v52 = vunpack.i.h.bf16 %v8338_v1 }
 0x230   : > { %v8594_v43 = vpop.permute.xlu0 %6589 }
 0x231   : > { %v10970_v31 = vunpack.i.h.bf16 %v8594_v43  ;;  %v8598_v9 = vunpack.i.l.bf16 %v8594_v43 }
 0x233   : > { %v8606_v48 = vsel %vm10961_vm1, %v11119_v7, %v8598_v9  ;;  %v992_v49 = vsel %vm10961_vm1, %v8598_v9, %v10970_v31  ;;  %vm11126_vm1 = vcmask 785408  }
 0x234   : > { %v8612_v50 = vpop.permute.xlu1 %6584  ;;  %v8614_v16 = vpop.permute.xlu0 %6599  ;;  %v6688_v60 = vpack.i.bf16 %v992_v49, %v8606_v48  ;;  %v11122_v49 = vunpack.i.h.bf16 %v8196_v10  ;;  %vm11127_vm0 = vmmov %vm11126_vm1 }
 0x235   : > { %v10964_v57 = vunpack.i.h.bf16 %v8612_v50  ;;  %v6586_v56 = vunpack.i.l.bf16 %v8612_v50  ;;  %v6601_v33 = vunpack.i.l.bf16 %v8614_v16  ;;  %v10971_v7 = vunpack.i.h.bf16 %v8614_v16 }
 0x236   : > { %6689 = vrot.lane.b32.xlu0 %v6688_v60, %s11020_s1 }
 0x237   : > { %v1268_v54 = vsel %vm1218_vm6, %v11121_v61, %v6586_v56  ;;  %v1269_v21 = vsel %vm1218_vm6, %v6586_v56, %v10964_v57  ;;  %v11129_v57 = vunpack.i.h.bf16 %v8304_v24 }
 0x238   : > { %v8632_v3 = vpop.permute.xlu1 %6594  ;;  %v8634_v18 = vpop.permute.xlu0 %6609  ;;  %v1477_v20 = vpack.c.bf16 %v1269_v21, %v1260_v41  ;;  %v1476_v63 = vpack.c.bf16 %v1268_v54, %v1259_v12  ;;  %v1278_v21 = vsel %vm1218_vm6, %v6601_v33, %v10971_v7 }
 0x239   : > { %v10969_v40 = vunpack.i.h.bf16 %v8632_v3  ;;  %v8638_v19 = vunpack.i.l.bf16 %v8632_v3  ;;  %v6612_v25 = vunpack.i.h.bf16 %v8634_v18  ;;  %v6611_v62 = vunpack.i.l.bf16 %v8634_v18  ;;  %v7226_v18 = vld [vmem:[%s7437_s19 + $0x38] sm:$0xff] }
 0x23a   : > { %1616 = vmatprep.subr.bf16.mxu0 %v1477_v20 }
 0x23b   : > { %v8648_v60 = vsel %vm11123_vm2, %v11122_v49, %v8638_v19  ;;  %v995_v56 = vsel %vm11124_vm3, %v8638_v19, %v10969_v40  ;;  %1617 = vmatpush1.bf16.msra.mxu0 %v1476_v63  ;;  %v8657_v12 = vsel %vm11126_vm1, %v11125_v52, %v6611_v62  ;;  %v1025_v61 = vsel %vm11127_vm0, %v6611_v62, %v6612_v25 }
 0x23c   : > { %v8662_v54 = vpop.permute.xlu1 %6604  ;;  %v8664_v10 = vpop.permute.xlu0 %6619  ;;  %v6693_v41 = vpack.i.bf16 %v995_v56, %v8648_v60  ;;  %v11128_v52 = vunpack.i.h.bf16 %v8317_v23  ;;  %vm11132_vm0 = vcmask 793600  }
 0x23d   : > { %v6607_v20 = vunpack.i.h.bf16 %v8662_v54  ;;  %v6606_v1 = vunpack.i.l.bf16 %v8662_v54  ;;  %v10972_v63 = vunpack.i.h.bf16 %v8664_v10  ;;  %v6621_v49 = vunpack.i.l.bf16 %v8664_v10  ;;  %vm11133_vm1 = vmmov %vm11132_vm0 }
 0x23e   : > { %v1277_v6 = vsel %vm1218_vm6, %v11128_v52, %v6601_v33  ;;  %6694 = vrot.lane.b32.xlu1 %v6693_v41, %s11020_s1  ;;  %v6703_v41 = vpack.i.bf16 %v1025_v61, %v8657_v12  ;;  %v11130_v33 = vunpack.i.h.bf16 %v8366_v46 }
 0x23f   : > { %v1286_v56 = vsel %vm1218_vm6, %v11129_v57, %v6606_v1  ;;  %v1287_v30 = vsel %vm1218_vm6, %v6606_v1, %v6607_v20  ;;  %v1296_v23 = vsel %vm1218_vm6, %v6621_v49, %v10972_v63  ;;  %v11131_v63 = vunpack.i.h.bf16 %v8306_v27 }
 0x240   : > { %v6615_v32 = vpop.permute.xlu1 %6614  ;;  %v6630_v52 = vpop.permute.xlu0 %6629  ;;  %v1486_v37 = vpack.c.bf16 %v1287_v30, %v1278_v21  ;;  %v1485_v24 = vpack.c.bf16 %v1286_v56, %v1277_v6  ;;  %v1295_v7 = vsel %vm1218_vm6, %v11130_v33, %v6621_v49  ;;  %v1495_v1 = vpack.c.bf16 %v8020_v14, %v1296_v23 }
 0x241   : > { %v6617_v45 = vunpack.i.h.bf16 %v6615_v32  ;;  %v6616_v57 = vunpack.i.l.bf16 %v6615_v32  ;;  %v6632_v40 = vunpack.i.h.bf16 %v6630_v52  ;;  %v8690_v31 = vunpack.i.l.bf16 %v6630_v52 }
 0x242   : > { %6704 = vrot.lane.b32.xlu1 %v6703_v41, %s11020_s1  ;;  %1618 = vmatprep.subr.bf16.mxu0 %v1486_v37  ;;  %v11134_v32 = vunpack.i.h.bf16 %v8384_v29  ;;  %v1494_v23 = vpack.c.bf16 %v8020_v14, %v1295_v7  ;;  %v11135_v29 = vunpack.i.h.bf16 %v8319_v39  ;;  %v11136_v39 = vunpack.i.h.bf16 %v8486_v26 }
 0x243   : > { %v1021_v61 = vsel %vm11132_vm0, %v11131_v63, %v6616_v57  ;;  %v1022_v30 = vsel %vm11133_vm1, %v6616_v57, %v6617_v45  ;;  %1619 = vmatpush1.bf16.msra.mxu0 %v1485_v24  ;;  %v1031_v46 = vsel %vm665_vm4, %v8690_v31, %v6632_v40 }
 0x244   : > { %v8705_v6 = vsel %vm665_vm4, %v11134_v32, %v8690_v31  ;;  %v6625_v21 = vpop.permute.xlu1 %6624  ;;  %v6640_v37 = vpop.permute.xlu0 %6639  ;;  %1620 = vmatprep.subr.bf16.mxu0 %v1495_v1  ;;  %v6698_v49 = vpack.i.bf16 %v1022_v30, %v1021_v61  ;;  %v6723_v30 = vpack.i.bf16 %v11136_v39, %v8191_v8  ;;  %v1398_v39 = vpack.c.bf16 %v8648_v60, %v8606_v48 }
 0x245   : > { %v6627_v56 = vunpack.i.h.bf16 %v6625_v21  ;;  %v8709_v27 = vunpack.i.l.bf16 %v6625_v21  ;;  %v6642_v63 = vunpack.i.h.bf16 %v6640_v37  ;;  %v6713_v52 = vpack.i.bf16 %v1031_v46, %v8705_v6 }
 0x246   : > { %6699 = vrot.lane.b32.xlu0 %v6698_v49, %s11020_s1  ;;  %vm11161_vm4 = vcmask 1039360  }
 0x247   : > { %v8718_v41 = vsel %vm629_vm5, %v11135_v29, %v8709_v27  ;;  %v1028_v24 = vsel %vm629_vm5, %v8709_v27, %v6627_v56  ;;  %1621 = vmatpush1.bf16.msra.mxu0 %v1494_v23  ;;  %v8722_v57 = vpack.c.bf16 %v6611_v62, %v6642_v63  ;;  %6714 = vrot.lane.b32.xlu1 %v6713_v52, %s11020_s1  ;;  %v11137_v62 = vunpack.i.h.bf16 %v8352_v0  ;;  %vm11162_vm5 = vmmov %vm11161_vm4 }
 0x248   : > { %v6635_v33 = vpop.permute.xlu1 %6634  ;;  %1622 = vmatprep.subr.bf16.mxu0 %v8042_v59  ;;  %v6708_v7 = vpack.i.bf16 %v1028_v24, %v8718_v41  ;;  %v1417_v32 = vpack.c.bf16 %v8690_v31, %v8709_v27  ;;  %v6733_v0 = vpack.i.bf16 %v6612_v25, %v6617_v45  ;;  %v11138_v29 = vunpack.i.h.bf16 %v8594_v43  ;;  %v7227_v43 = vld [vmem:[%s7437_s19 + $0x30] sm:$0xff]  ;;  %vm11168_vm2 = vmmov %vm11161_vm4 }
 0x249   : > { %v6637_v1 = vunpack.i.h.bf16 %v6635_v33  ;;  %v6636_v61 = vunpack.i.l.bf16 %v6635_v33  ;;  %v11139_v24 = vunpack.i.h.bf16 %v8632_v3  ;;  %v1389_v45 = vpack.c.bf16 %v8515_v42, %v7226_v18  ;;  %vm11170_vm0 = vmmov %vm11168_vm2 }
 0x24a   : > { %6709 = vrot.lane.b32.xlu0 %v6708_v7, %s11020_s1  ;;  %v6641_v25 = vunpack.i.l.bf16 %v6640_v37  ;;  %v6738_v7 = vpack.i.bf16 %v6632_v40, %v6627_v56  ;;  %v1388_v3 = vpack.c.bf16 %v8150_v47, %v7227_v43  ;;  %v8769_v37 = vpop.f32.mrb[0].mxu0  ;;  %v8771_v40 = vpop.permute.xlu0 %6649 }
 0x24b   : > { %v8736_v46 = vsel %vm701_vm7, %v11137_v62, %v6636_v61  ;;  %v1034_v21 = vsel %vm701_vm7, %v6636_v61, %v6637_v1  ;;  %1623 = vmatpush1.bf16.msra.mxu0 %v8042_v59  ;;  %6724 = vrot.lane.b32.xlu1 %v6723_v30, %s11020_s1  ;;  %v6728_v33 = vpack.i.bf16 %v11139_v24, %v11138_v29  ;;  %v8775_v47 = vpop.f32.mrb[1].mxu0  ;;  %vm11164_vm7 = vmmov %vm11161_vm4 }
 0x24c   : > { %v6645_v49 = vpop.permute.xlu1 %6644  ;;  %1624 = vmatprep.subr.bf16.mxu0 %v8042_v59  ;;  %v6718_v26 = vpack.i.bf16 %v1034_v21, %v8736_v46  ;;  %v565_v42 = vsel %vm557_vm8, %v6641_v25, %v6642_v63  ;;  %v1552_v56 = vpop.f32.mrb[2].mxu0  ;;  %v11141_v62 = vpack.c.bf16 %v8224_v44, %v8174_v34  ;;  %v6652_v21 = vunpack.i.h.bf16 %v8771_v40 }
 0x24d   : > { %v6647_v23 = vunpack.i.h.bf16 %v6645_v49  ;;  %v1407_v60 = vpack.c.bf16 %v8657_v12, %v565_v42  ;;  %v1553_v63 = vpop.f32.mrb[3].mxu0  ;;  %v6646_v30 = vunpack.i.l.bf16 %v6645_v49  ;;  %v1501_v12 = vld [vmem:[%s10833_s2] sm:$0xff]  ;;  %v1416_v44 = vpack.c.bf16 %v8705_v6, %v8718_v41 }
 0x24e   : > { %6719 = vrot.lane.b32.xlu0 %v6718_v26, %s11020_s1  ;;  %v8798_v34 = vpop.permute.xlu0 %6659 }
 0x24f   : > { %v8746_v52 = vpack.c.bf16 %v6647_v23, %v6636_v61  ;;  %1625 = vmatpush1.bf16.msra.mxu0 %v8042_v59  ;;  %6734 = vrot.lane.b32.xlu1 %v6733_v0, %s11020_s1  ;;  %v6651_v0 = vunpack.i.l.bf16 %v8771_v40  ;;  %v745_v24 = vsel %vm737_vm9, %v6646_v30, %v6647_v23  ;;  %v6662_v18 = vunpack.i.h.bf16 %v8798_v34 }
 0x250   : > { %1626 = vmatprep.subr.bf16.mxu0 %v8042_v59  ;;  %v8762_v61 = vpop.permute.xlu1 %6654  ;;  %v1425_v23 = vpack.c.bf16 %v745_v24, %v8736_v46 }
 0x251   : > { %v6656_v29 = vunpack.i.l.bf16 %v8762_v61 }
 0x252   : > { %6729 = vrot.lane.b32.xlu0 %v6728_v33, %s11020_s1  ;;  %v744_v33 = vsel %vm737_vm9, %v8439_v2, %v6646_v30  ;;  %v11142_v2 = vpack.c.bf16 %v8410_v38, %v8350_v5  ;;  %v8826_v43 = vpop.permute.xlu0 %6669  ;;  %v11143_v5 = vunpack.i.h.bf16 %v8460_v51  ;;  %vm11165_vm9 = vmmov %vm11161_vm4 }
 0x253   : > { %1627 = vmatpush1.bf16.msra.mxu0 %v8042_v59  ;;  %1214 = vrot.lane.b32.xlu1 %v6637_v1, %s11020_s1  ;;  %v11140_v1 = vunpack.i.h.bf16 %v8412_v53  ;;  %v6657_v53 = vunpack.i.h.bf16 %v8762_v61  ;;  %v6672_v42 = vunpack.i.h.bf16 %v8826_v43 }
 0x254   : > { %1637 = vmatprep.subr.bf16.mxu0 %v1389_v45  ;;  %v8788_v26 = vpop.permute.xlu1 %6664  ;;  %v819_v38 = vsel %vm812_vm10, %v11143_v5, %v6656_v29 }
 0x255   : > { %v564_v48 = vsel %vm557_vm8, %v11140_v1, %v6641_v25  ;;  %v6667_v45 = vunpack.i.h.bf16 %v8788_v26  ;;  %v820_v6 = vsel %vm812_vm10, %v6656_v29, %v6657_v53  ;;  %v6661_v25 = vunpack.i.l.bf16 %v8798_v34 }
 0x256   : > { %6739 = vrot.lane.b32.xlu0 %v6738_v7, %s11020_s1  ;;  %1629 = vmatmul.mubr.bf16.vlgmr.msra.gmra.mrb[8].mxu0 %v8085_v36  ;;  %v1406_v49 = vpack.c.bf16 %v8364_v55, %v564_v48  ;;  %v781_v55 = vsel %vm773_vm11, %v6651_v0, %v6652_v21  ;;  %v6666_v7 = vunpack.i.l.bf16 %v8788_v26  ;;  %v6671_v1 = vunpack.i.l.bf16 %v8826_v43  ;;  %v11144_v48 = vld [vmem:[#allocation12_spill] sm:$0xff]  ;;  %v8855_v24 = vpop.permute.xlu0 %6679 }
 0x257   : > { %1638 = vmatpush1.bf16.msra.mxu0 %v1388_v3  ;;  %849 = vrot.lane.b32.xlu1 %v8191_v8, %s11019_s27  ;;  %v1424_v3 = vpack.c.bf16 %v744_v33, %v8396_v35  ;;  %v859_v46 = vsel %vm851_vm13, %v6661_v25, %v6662_v18 }
 0x258   : > { %1639 = vmatprep.subr.bf16.mxu0 %v1398_v39  ;;  %1669 = vmatprep.mubr.bf16.mxu0 %v7776_v11  ;;  %v8816_v41 = vpop.permute.xlu1 %6674  ;;  %v1434_v39 = vpack.c.bf16 %v820_v6, %v781_v55  ;;  %v898_v56 = vsel %vm890_vm12, %v6666_v7, %v6667_v45  ;;  %v11147_v6 = vld [vmem:[#allocation20_spill] sm:$0xff] }
 0x259   : > { %v6676_v35 = vunpack.i.l.bf16 %v8816_v41  ;;  %v1443_v30 = vpack.c.bf16 %v898_v56, %v859_v46 }
 0x25a   : > { %810 = vrot.lane.b32.xlu0 %v8191_v8, %s11011_s0  ;;  %s5309_s0 = sshll.u32 %s7405_s25, 4 }
 0x25b   : > { %1640 = vmatpush1.bf16.msra.mxu0 %v11141_v62  ;;  %927 = vrot.lane.b32.xlu1 %v8191_v8, %s11024_s21 }
 0x25c   : > { %1641 = vmatprep.subr.bf16.mxu0 %v1407_v60  ;;  %v780_v60 = vsel %vm773_vm11, %v11144_v48, %v6651_v0  ;;  %v8844_v63 = vpop.permute.xlu1 %6684  ;;  %v6682_v0 = vunpack.i.h.bf16 %v8855_v24 }
 0x25d   : > { %v1433_v62 = vpack.c.bf16 %v819_v38, %v780_v60  ;;  %v6687_v55 = vunpack.i.h.bf16 %v8844_v63  ;;  %v6686_v33 = vunpack.i.l.bf16 %v8844_v63 }
 0x25e   : > { %888 = vrot.lane.b32.xlu0 %v8191_v8, %s11013_s30  ;;  %s7313_s30 = smov 66  }
 0x25f   : > { %1642 = vmatpush1.bf16.msra.mxu0 %v1406_v49  ;;  %1504 = vperm.xlu1 %6743, %v1501_v12   ;;  %v937_v12 = vsel %vm929_vm15, %v6671_v1, %v6672_v42  ;;  %v11145_v49 = vld [vmem:[#allocation16_spill] sm:$0xff]  ;;  %v1235_v38 = vsel %vm1218_vm6, %v6686_v33, %v6687_v55 }
 0x260   : > { %1643 = vmatprep.subr.bf16.mxu0 %v1416_v44  ;;  %v11146_v44 = vunpack.i.h.bf16 %v11145_v49 }
 0x262   : > { %966 = vrot.lane.b32.xlu0 %v8191_v8, %s11017_s23  ;;  %v6677_v8 = vunpack.i.h.bf16 %v8816_v41  ;;  %v897_v29 = vsel %vm890_vm12, %v11146_v44, %v6666_v7  ;;  %v11149_v7 = vunpack.i.h.bf16 %v8509_v4 }
 0x263   : > { %1644 = vmatpush1.bf16.msra.mxu0 %v11142_v2 }
 0x264   : > { %1645 = vmatprep.subr.bf16.mxu0 %v1425_v23  ;;  %v976_v51 = vsel %vm968_vm14, %v6676_v35, %v6677_v8  ;;  %v11148_v23 = vunpack.i.h.bf16 %v11147_v6  ;;  %v975_v56 = vsel %vm968_vm14, %v11149_v7, %v6676_v35 }
 0x266   : > { %v858_v2 = vsel %vm851_vm13, %v11148_v23, %v6661_v25  ;;  %v11150_v25 = vunpack.i.h.bf16 %v8446_v58 }
 0x267   : > { %1646 = vmatpush1.bf16.msra.mxu0 %v1424_v3  ;;  %v1452_v3 = vpack.c.bf16 %v976_v51, %v937_v12  ;;  %v1442_v46 = vpack.c.bf16 %v897_v29, %v858_v2  ;;  %v11153_v2 = vunpack.i.h.bf16 %v8473_v28 }
 0x268   : > { %1647 = vmatprep.subr.bf16.mxu0 %v1434_v39  ;;  %v6681_v39 = vunpack.i.l.bf16 %v8855_v24  ;;  %v936_v48 = vsel %vm929_vm15, %v11150_v25, %v6671_v1 }
 0x269   : > { %v1451_v60 = vpack.c.bf16 %v975_v56, %v936_v48 }
 0x26a   : > { %v1226_v5 = vsel %vm1218_vm6, %v6681_v39, %v6682_v0 }
 0x26b   : > { %1648 = vmatpush1.bf16.msra.mxu0 %v1433_v62  ;;  %v1461_v35 = vpack.c.bf16 %v1235_v38, %v1226_v5  ;;  %v11152_v62 = vunpack.i.h.bf16 %v8454_v22 }
 0x26c   : > { %1649 = vmatprep.subr.bf16.mxu0 %v1443_v30  ;;  %v11151_v30 = vunpack.i.h.bf16 %v8541_v13 }
 0x26d   : > { %v1225_v12 = vsel %vm1218_vm6, %v11152_v62, %v6681_v39  ;;  %v11154_v39 = vunpack.i.h.bf16 %v8558_v17 }
 0x26e   : > { %v1234_v4 = vsel %vm1218_vm6, %v11151_v30, %v6686_v33 }
 0x26f   : > { %1650 = vmatpush1.bf16.msra.mxu0 %v1442_v46  ;;  %v1460_v51 = vpack.c.bf16 %v1234_v4, %v1225_v12  ;;  %v11155_v4 = vunpack.i.h.bf16 %v8612_v50 }
 0x270   : > { %1651 = vmatprep.subr.bf16.mxu0 %v1452_v3 }
 0x273   : > { %1652 = vmatpush1.bf16.msra.mxu0 %v1451_v60 }
 0x274   : > { %1653 = vmatprep.subr.bf16.mxu0 %v1461_v35 }
 0x277   : > { %1654 = vmatpush1.bf16.msra.mxu0 %v1460_v51 }
 0x2a8   : > { %v8886_v1 = vpop.permute.xlu0 %6689 }
 0x2a9   : > { %v6692_v13 = vunpack.i.h.bf16 %v8886_v1  ;;  %v6691_v33 = vunpack.i.l.bf16 %v8886_v1 }
 0x2aa   : > { %v8882_v49 = vpop.f32.mrb[4].mxu0 }
 0x2ab   : > { %v8884_v58 = vpop.f32.mrb[5].mxu0  ;;  %v1243_v3 = vsel %vm1218_vm6, %v11153_v2, %v6691_v33  ;;  %v1244_v7 = vsel %vm1218_vm6, %v6691_v33, %v6692_v13 }
 0x2ac   : > { %v1593_v44 = vpop.f32.mrb[6].mxu0 }
 0x2ad   : > { %v1594_v29 = vpop.f32.mrb[7].mxu0 }
 0x2ae   : > { %v11156_v29 = vunpack.i.h.bf16 %v8592_v15  ;;  %v11157_v15 = vunpack.i.h.bf16 %v8614_v16 }
 0x2b0   : > { %v8890_v6 = vpop.permute.xlu1 %6694 }
 0x2b1   : > { %v6697_v22 = vunpack.i.h.bf16 %v8890_v6  ;;  %v6696_v23 = vunpack.i.l.bf16 %v8890_v6 }
 0x2b3   : > { %v1252_v46 = vsel %vm1218_vm6, %v11154_v39, %v6696_v23  ;;  %v1253_v56 = vsel %vm1218_vm6, %v6696_v23, %v6697_v22 }
 0x2b4   : > { %v8906_v5 = vpop.permute.xlu1 %6704  ;;  %v1470_v38 = vpack.c.bf16 %v1253_v56, %v1244_v7  ;;  %v1469_v25 = vpack.c.bf16 %v1252_v46, %v1243_v3 }
 0x2b5   : > { %v6707_v28 = vunpack.i.h.bf16 %v8906_v5  ;;  %v6706_v48 = vunpack.i.l.bf16 %v8906_v5 }
 0x2b6   : > { %1655 = vmatprep.subr.bf16.mxu0 %v1470_v38 }
 0x2b7   : > { %1656 = vmatpush1.bf16.msra.mxu0 %v1469_v25  ;;  %v1270_v35 = vsel %vm1218_vm6, %v11155_v4, %v6706_v48  ;;  %v1271_v12 = vsel %vm1218_vm6, %v6706_v48, %v6707_v28 }
 0x2b8   : > { %v8910_v17 = vpop.permute.xlu0 %6699 }
 0x2b9   : > { %v6702_v60 = vunpack.i.h.bf16 %v8910_v17  ;;  %v6701_v30 = vunpack.i.l.bf16 %v8910_v17  ;;  %v8917_v62 = vpop.permute.xlu1 %6714 }
 0x2ba   : > { %v6717_v51 = vunpack.i.h.bf16 %v8917_v62  ;;  %v6716_v44 = vunpack.i.l.bf16 %v8917_v62 }
 0x2bb   : > { %v1261_v33 = vsel %vm1218_vm6, %v11156_v29, %v6701_v30  ;;  %v1262_v50 = vsel %vm1218_vm6, %v6701_v30, %v6702_v60 }
 0x2bc   : > { %v8930_v23 = vpop.permute.xlu0 %6709  ;;  %v1479_v2 = vpack.c.bf16 %v1271_v12, %v1262_v50  ;;  %v1478_v3 = vpack.c.bf16 %v1270_v35, %v1261_v33  ;;  %v1288_v7 = vsel %vm1218_vm6, %v6607_v20, %v6716_v44  ;;  %v1289_v25 = vsel %vm1218_vm6, %v6716_v44, %v6717_v51 }
 0x2bd   : > { %v6712_v39 = vunpack.i.h.bf16 %v8930_v23  ;;  %v6711_v46 = vunpack.i.l.bf16 %v8930_v23  ;;  %v6725_v54 = vpop.permute.xlu1 %6724  ;;  %v11158_v20 = vunpack.i.h.bf16 %v8664_v10 }
 0x2be   : > { %1657 = vmatprep.subr.bf16.mxu0 %v1479_v2  ;;  %v6727_v23 = vunpack.i.h.bf16 %v6725_v54  ;;  %v6726_v2 = vunpack.i.l.bf16 %v6725_v54 }
 0x2bf   : > { %v1279_v56 = vsel %vm1218_vm6, %v11157_v15, %v6711_v46  ;;  %1658 = vmatpush1.bf16.msra.mxu0 %v1478_v3  ;;  %v1280_v38 = vsel %vm1218_vm6, %v6711_v46, %v6712_v39 }
 0x2c0   : > { %v6720_v48 = vpop.permute.xlu0 %6719  ;;  %v1488_v30 = vpack.c.bf16 %v1289_v25, %v1280_v38  ;;  %v1487_v4 = vpack.c.bf16 %v1288_v7, %v1279_v56  ;;  %v1227_v15 = vsel %vm1218_vm6, %v6682_v0, %v6726_v2  ;;  %v1236_v56 = vsel %vm1218_vm6, %v6687_v55, %v6727_v23  ;;  %v11159_v55 = vld [vmem:[#allocation18_spill] sm:$0xff] }
 0x2c1   : > { %v6722_v35 = vunpack.i.h.bf16 %v6720_v48  ;;  %v6721_v12 = vunpack.i.l.bf16 %v6720_v48  ;;  %v6735_v44 = vpop.permute.xlu1 %6734  ;;  %v1462_v38 = vpack.c.bf16 %v1236_v56, %v1227_v15 }
 0x2c2   : > { %1659 = vmatprep.subr.bf16.mxu0 %v1488_v30  ;;  %v6737_v25 = vunpack.i.h.bf16 %v6735_v44  ;;  %v6736_v48 = vunpack.i.l.bf16 %v6735_v44 }
 0x2c3   : > { %v1297_v16 = vsel %vm1218_vm6, %v11158_v20, %v6721_v12  ;;  %1660 = vmatpush1.bf16.msra.mxu0 %v1487_v4  ;;  %v1298_v29 = vsel %vm1218_vm6, %v6721_v12, %v6722_v35  ;;  %v7228_v4 = vld [vmem:[%s7437_s19 + $0x40] sm:$0xff]  ;;  %s7314_s19 = smov 58  }
 0x2c4   : > { %v1497_v33 = vpack.c.bf16 %v8020_v14, %v1298_v29  ;;  %v1496_v50 = vpack.c.bf16 %v8020_v14, %v1297_v16  ;;  %v6730_v3 = vpop.permute.xlu0 %6729  ;;  %v1390_v12 = vpack.c.bf16 %v11159_v55, %v7228_v4  ;;  %v1263_v1 = vsel %vm1218_vm6, %v6702_v60, %v6736_v48 }
 0x2c5   : > { %v1215_v10 = vpop.permute.xlu1 %1214  ;;  %v6732_v46 = vunpack.i.h.bf16 %v6730_v3  ;;  %v6731_v7 = vunpack.i.l.bf16 %v6730_v3  ;;  %v11160_v29 = vpack.c.bf16 %v8638_v19, %v8598_v9 }
 0x2c6   : > { %1661 = vmatprep.subr.bf16.mxu0 %v1497_v33  ;;  %v1299_v5 = vsel %vm1218_vm6, %v6722_v35, %v1215_v10 }
 0x2c7   : > { %1662 = vmatpush1.bf16.msra.mxu0 %v1496_v50  ;;  %v1245_v30 = vsel %vm1218_vm6, %v6692_v13, %v6731_v7  ;;  %v1254_v24 = vsel %vm1218_vm6, %v6697_v22, %v6732_v46  ;;  %v1272_v13 = vsel %vm1218_vm6, %v6707_v28, %v6737_v25  ;;  %v1498_v19 = vpack.c.bf16 %v8020_v14, %v1299_v5 }
 0x2c8   : > { %1663 = vmatprep.subr.bf16.mxu0 %v8042_v59  ;;  %v6740_v0 = vpop.permute.xlu0 %6739  ;;  %v1471_v54 = vpack.c.bf16 %v1254_v24, %v1245_v30  ;;  %v1480_v6 = vpack.c.bf16 %v1272_v13, %v1263_v1 }
 0x2c9   : > { %v850_v63 = vpop.permute.xlu1 %849  ;;  %v6742_v20 = vunpack.i.h.bf16 %v6740_v0  ;;  %v6741_v16 = vunpack.i.l.bf16 %v6740_v0 }
 0x2cb   : > { %1664 = vmatpush1.bf16.msra.mxu0 %v8042_v59  ;;  %v1281_v33 = vsel %vm1218_vm6, %v6712_v39, %v6741_v16  ;;  %v1290_v17 = vsel %vm1218_vm6, %v6717_v51, %v6742_v20  ;;  %vm11163_vm6 = vmmov %vm11161_vm4 }
 0x2cc   : > { %1665 = vmatprep.subr.bf16.mxu0 %v8042_v59  ;;  %v1489_v60 = vpack.c.bf16 %v1290_v17, %v1281_v33  ;;  %v811_v28 = vpop.permute.xlu0 %810 }
 0x2cd   : > { %v928_v22 = vpop.permute.xlu1 %927 }
 0x2ce   : > { %v938_v40 = vsel %vm929_vm15, %v6672_v42, %v928_v22 }
 0x2cf   : > { %1666 = vmatpush1.bf16.msra.mxu0 %v8042_v59 }
 0x2d0   : > { %1667 = vmatprep.subr.bf16.mxu0 %v8042_v59  ;;  %v889_v35 = vpop.permute.xlu0 %888 }
 0x2d1   : > { %v899_v31 = vsel %vm890_vm12, %v6667_v45, %v889_v35  ;;  %vm11167_vm12 = vcmask 785408  }
 0x2d2   : > { %vm11169_vm3 = vmmov %vm11167_vm12 }
 0x2d3   : > { %1668 = vmatpush1.bf16.msra.mxu0 %v8042_v59  ;;  %vm11171_vm1 = vmmov %vm11169_vm3 }
 0x2d4   : > { %5312 = vmatprep.subr.bf16.mxu0 %v1462_v38  ;;  %v967_v27 = vpop.permute.xlu0 %966 }
 0x2d6   : > { %1670 = vmatmul.mubr.bf16.vlgmr.msra.gmra.mrb[12].mxu0 %v8085_v36 }
 0x2d7   : > { %5313 = vmatpush3.bf16.msra.mxu0 %v1390_v12  ;;  %1710 = vmatprep.mubr.bf16.mxu0 %v7776_v11 }
 0x2d8   : > { %5314 = vmatprep.subr.bf16.mxu0 %v1471_v54 }
 0x2db   : > { %5315 = vmatpush3.bf16.msra.mxu0 %v11160_v29 }
 0x2dc   : > { %5316 = vmatprep.subr.bf16.mxu0 %v1480_v6 }
 0x2de   : > { %v8986_v50 = vpop.permute.xlu1 %1504 }
 0x2df   : > { %5317 = vmatpush3.bf16.msra.mxu0 %v8722_v57  ;;  %v1590_v11 = vadd.f32 %v8882_v49, %v8986_v50  ;;  %v1592_v9 = vadd.f32 %v8884_v58, %v8986_v50  ;;  %v821_v57 = vsel %vm812_vm10, %v6657_v53, %v811_v28  ;;  %v1551_v44 = vadd.f32 %v8775_v47, %v8986_v50  ;;  %vm11166_vm10 = vmmov %vm11161_vm4 }
 0x2e0   : > { %5318 = vmatprep.subr.bf16.mxu0 %v1489_v60  ;;  %v1435_v14 = vpack.c.bf16 %v821_v57, %v6652_v21  ;;  %v1549_v3 = vadd.f32 %v8769_v37, %v8986_v50 }
 0x2e1   : > { %v1720_v62 = vmax.f32 %v1590_v11, 0.0  ;;  %v1721_v51 = vmax.f32 %v1592_v9, 0.0  ;;  %v1719_v38 = vmax.f32 %v1551_v44, 0.0 }
 0x2e2   : > { %v1718_v47 = vmax.f32 %v1549_v3, 0.0 }
 0x2e3   : > { %5319 = vmatpush3.bf16.msra.mxu0 %v1417_v32  ;;  %v6744_v39 = vpack.i.bf16 %v1721_v51, %v1720_v62  ;;  %v860_v32 = vsel %vm851_vm13, %v6662_v18, %v850_v63 }
 0x2e4   : > { %5320 = vmatprep.subr.bf16.mxu0 %v1498_v19  ;;  %v1444_v61 = vpack.c.bf16 %v899_v31, %v860_v32 }
 0x2e5   : > { %6745 = vrot.lane.b32.xlu0 %v6744_v39, %s11029_s12 }
 0x2e7   : > { %5321 = vmatpush3.bf16.msra.mxu0 %v8746_v52  ;;  %v977_v52 = vsel %vm968_vm14, %v6677_v8, %v967_v27 }
 0x2e8   : > { %5322 = vmatprep.subr.bf16.mxu0 %v8042_v59  ;;  %v1453_v21 = vpack.c.bf16 %v977_v52, %v938_v40 }
 0x2eb   : > { %5323 = vmatpush3.bf16.msra.mxu0 %v1435_v14 }
 0x2ec   : > { %5324 = vmatprep.subr.bf16.mxu0 %v8042_v59 }
 0x2ef   : > { %5325 = vmatpush3.bf16.msra.mxu0 %v1444_v61 }
 0x2f0   : > { %5326 = vmatprep.subr.bf16.mxu0 %v8042_v59 }
 0x2f3   : > { %5327 = vmatpush3.bf16.msra.mxu0 %v1453_v21 }
 0x2f6   : > { %1711 = vmatmul.mubr.bf16.vlgmr.msra.gmra.mrb[16].mxu0 %v8085_v36 }
 0x329   : > { %v1630_v26 = vpop.f32.mrb[8].mxu0 }
 0x32a   : > { %v1631_v53 = vadd.f32 %v1630_v26, %v8986_v50  ;;  %v1632_v34 = vpop.f32.mrb[9].mxu0 }
 0x32b   : > { %v1633_v18 = vadd.f32 %v1632_v34, %v8986_v50  ;;  %v1634_v45 = vpop.f32.mrb[10].mxu0 }
 0x32c   : > { %v1722_v41 = vmax.f32 %v1631_v53, 0.0  ;;  %v1635_v8 = vpop.f32.mrb[11].mxu0 }
 0x32d   : > { %v1723_v49 = vmax.f32 %v1633_v18, 0.0 }
 0x32f   : > { %v6749_v58 = vpack.i.bf16 %v1723_v49, %v1722_v41 }
 0x331   : > { %6750 = vrot.lane.b32.xlu1 %v6749_v58, %s11029_s12 }
 0x357   : > { %v6746_v42 = vpop.permute.xlu0 %6745 }
 0x358   : > { %v6748_v36 = vunpack.i.h.bf16 %v6746_v42  ;;  %v6747_v23 = vunpack.i.l.bf16 %v6746_v42 }
 0x35a   : > { %v1756_v30 = vsel %vm11162_vm5, %v6747_v23, %v6748_v36  ;;  %vm11173_vm5 = vmmov %vm11171_vm1 }
 0x35b   : > { %v1772_v55 = vmax.f32 %v1720_v62, %v1756_v30 }
 0x3a3   : > { %v6751_v43 = vpop.permute.xlu1 %6750 }
 0x3a4   : > { %v6752_v59 = vunpack.i.l.bf16 %v6751_v43  ;;  %v6753_v13 = vunpack.i.h.bf16 %v6751_v43 }
 0x3a6   : > { %v1757_v7 = vsel %vm11161_vm4, %v6748_v36, %v6752_v59  ;;  %v1758_v22 = vsel %vm11163_vm6, %v6752_v59, %v6753_v13  ;;  %vm11172_vm4 = vmmov %vm11171_vm1 }
 0x3a7   : > { %v1773_v0 = vmax.f32 %v1721_v51, %v1757_v7  ;;  %v1774_v11 = vmax.f32 %v1722_v41, %v1758_v22  ;;  %vm11174_vm6 = vmmov %vm11171_vm1 }
 0x3a9   : > { %v1671_v2 = vpop.f32.mrb[12].mxu0  ;;  %v6764_v37 = vpack.i.bf16 %v1773_v0, %v1772_v55 }
 0x3aa   : > { %v1672_v10 = vadd.f32 %v1671_v2, %v8986_v50  ;;  %v1673_v46 = vpop.f32.mrb[13].mxu0 }
 0x3ab   : > { %v1674_v15 = vadd.f32 %v1673_v46, %v8986_v50  ;;  %v1675_v56 = vpop.f32.mrb[14].mxu0 }
 0x3ac   : > { %v1724_v25 = vmax.f32 %v1672_v10, 0.0  ;;  %v1676_v48 = vpop.f32.mrb[15].mxu0 }
 0x3ad   : > { %v1725_v24 = vmax.f32 %v1674_v15, 0.0 }
 0x3ae   : > { %v6754_v63 = vpack.i.bf16 %v1719_v38, %v1724_v25 }
 0x3af   : > { %v6759_v4 = vpack.i.bf16 %v1725_v24, %v1718_v47 }
 0x3b0   : > { %6755 = vrot.lane.b32.xlu0 %v6754_v63, %s11029_s12 }
 0x3b1   : > { %6760 = vrot.lane.b32.xlu1 %v6759_v4, %s11029_s12 }
 0x3b4   : > { %6765 = vrot.lane.b32.xlu0 %v6764_v37, %s11005_s15 }
 0x3c9   : > { %v5328_v12 = vpop.f32.mrb[16].mxu0 }
 0x3ca   : > { %v5329_v54 = vpop.f32.mrb[17].mxu0 }
 0x3cb   : > { %v5330_v20 = vadd.f32 %v5329_v54, %v5328_v12  ;;  %v5331_v16 = vpop.f32.mrb[18].mxu0 }
 0x3cc   : > { %v5332_v1 = vpop.f32.mrb[19].mxu0 }
 0x3cd   : > { %v1713_v39 = vadd.f32 %v5330_v20, %v8986_v50 }
 0x3cf   : > { %v1726_v14 = vmax.f32 %v1713_v39, 0.0 }
 0x422   : > { %v6756_v6 = vpop.permute.xlu0 %6755 }
 0x423   : > { %v6758_v29 = vunpack.i.h.bf16 %v6756_v6  ;;  %v6757_v33 = vunpack.i.l.bf16 %v6756_v6  ;;  %v6761_v17 = vpop.permute.xlu1 %6760 }
 0x424   : > { %v6762_v60 = vunpack.i.l.bf16 %v6761_v17  ;;  %v6763_v61 = vunpack.i.h.bf16 %v6761_v17 }
 0x425   : > { %v1755_v5 = vsel %vm11164_vm7, %v6758_v29, %v6747_v23  ;;  %v1759_v28 = vsel %vm11165_vm9, %v6753_v13, %v6757_v33  ;;  %vm1893_vm7 = vcmask 998400   ;;  %vm11175_vm9 = vmmov %vm11171_vm1 }
 0x426   : > { %v1771_v9 = vmax.f32 %v1719_v38, %v1755_v5  ;;  %v9037_v19 = vmax.f32 %v1723_v49, %v1759_v28  ;;  %v1754_v62 = vsel %vm11166_vm10, %v6762_v60, %v6758_v29  ;;  %v6766_v31 = vpop.permute.xlu0 %6765  ;;  %v1760_v50 = vsel %vm11168_vm2, %v6757_v33, %v6763_v61 }
 0x427   : > { %v1770_v51 = vmax.f32 %v1718_v47, %v1754_v62  ;;  %v6768_v27 = vunpack.i.h.bf16 %v6766_v31  ;;  %v6767_v32 = vunpack.i.l.bf16 %v6766_v31  ;;  %v9053_v58 = vmax.f32 %v1724_v25, %v1760_v50 }
 0x428   : > { %v6774_v35 = vpack.i.bf16 %v9037_v19, %v1774_v11  ;;  %vm11176_vm10 = vcmask 1031168   ;;  %vm2070_vm2 = vcmask 539648  }
 0x429   : > { %v6769_v57 = vpack.i.bf16 %v1770_v51, %v1771_v9  ;;  %v1809_v40 = vsel %vm11167_vm12, %v6767_v32, %v6768_v27  ;;  %vm11177_vm12 = vmmov %vm11176_vm10 }
 0x42a   : > { %6775 = vrot.lane.b32.xlu1 %v6774_v35, %s11005_s15  ;;  %v9048_v34 = vmax.f32 %v1772_v55, %v1809_v40 }
 0x42b   : > { %6770 = vrot.lane.b32.xlu0 %v6769_v57, %s11005_s15 }
 0x42e   : > { %1752 = vrot.lane.b32.xlu1 %v1726_v14, %s11029_s12  ;;  %s7312_s12 = smov 122  }
 0x49c   : > { %v6776_v52 = vpop.permute.xlu1 %6775 }
 0x49d   : > { %v6777_v21 = vunpack.i.l.bf16 %v6776_v52  ;;  %v6771_v26 = vpop.permute.xlu0 %6770  ;;  %v6778_v41 = vunpack.i.h.bf16 %v6776_v52 }
 0x49e   : > { %v6772_v8 = vunpack.i.l.bf16 %v6771_v26  ;;  %v6773_v10 = vunpack.i.h.bf16 %v6771_v26 }
 0x49f   : > { %v1810_v53 = vsel %vm11169_vm3, %v6768_v27, %v6777_v21  ;;  %v1811_v44 = vsel %vm11171_vm1, %v6777_v21, %v6778_v41  ;;  %vm11178_vm3 = vmmov %vm11176_vm10  ;;  %vm1916_vm1 = vcmask 982016  }
 0x4a0   : > { %v9050_v18 = vmax.f32 %v1773_v0, %v1810_v53  ;;  %v1753_v45 = vpop.permute.xlu1 %1752  ;;  %v1808_v36 = vsel %vm11172_vm4, %v6772_v8, %v6767_v32  ;;  %v9065_v23 = vmax.f32 %v1774_v11, %v1811_v44  ;;  %v1807_v46 = vsel %vm11173_vm5, %v6773_v10, %v6772_v8  ;;  %vm11180_vm5 = vmmov %vm11178_vm3 }
 0x4a1   : > { %v1761_v49 = vsel %vm11170_vm0, %v6763_v61, %v1753_v45  ;;  %v9067_v2 = vmax.f32 %v1771_v9, %v1808_v36  ;;  %v9084_v7 = vmax.f32 %v1770_v51, %v1807_v46  ;;  %v1779_v56 = vmax.f32 %v1726_v14, %v1753_v45 }
 0x4a2   : > { %v9055_v43 = vmax.f32 %v1725_v24, %v1761_v49  ;;  %v6789_v42 = vpack.i.bf16 %v9050_v18, %v9048_v34  ;;  %vm2005_vm0 = vcmask 474112  }
 0x4a3   : > { %v6829_v3 = vpack.i.bf16 %v9067_v2, %v9065_v23  ;;  %v6864_v15 = vpack.i.bf16 %v9050_v18, %v9084_v7  ;;  %v6859_v38 = vpack.i.bf16 %v9048_v34, %v9067_v2 }
 0x4a4   : > { %v6779_v59 = vpack.i.bf16 %v9055_v43, %v9053_v58  ;;  %6790 = vrot.lane.b32.xlu1 %v6789_v42, %s11012_s17 }
 0x4a6   : > { %6780 = vrot.lane.b32.xlu0 %v6779_v59, %s11005_s15 }
 0x4a8   : > { %6795 = vrot.lane.b32.xlu1 %v6789_v42, %s7312_s12 }
 0x4aa   : > { %6785 = vrot.lane.b32.xlu0 %v6789_v42, %s11027_s24 }
 0x4ac   : > { %6800 = vrot.lane.b32.xlu1 %v6789_v42, %s11016_s14 }
 0x4ae   : > { %6830 = vrot.lane.b32.xlu0 %v6829_v3, %s11012_s17 }
 0x4b0   : > { %6805 = vrot.lane.b32.xlu1 %v6789_v42, %s7313_s30 }
 0x4b2   : > { %6835 = vrot.lane.b32.xlu0 %v6829_v3, %s7312_s12 }
 0x4b4   : > { %6810 = vrot.lane.b32.xlu1 %v6829_v3, %s11027_s24 }
 0x4b6   : > { %6840 = vrot.lane.b32.xlu0 %v6829_v3, %s11016_s14 }
 0x4b8   : > { %6815 = vrot.lane.b32.xlu1 %v6789_v42, %s11019_s27 }
 0x4ba   : > { %2064 = vrot.lane.b32.xlu0 %v9065_v23, %s7313_s30 }
 0x4bc   : > { %6820 = vrot.lane.b32.xlu1 %v6789_v42, %s11024_s21 }
 0x4be   : > { %6845 = vrot.lane.b32.xlu0 %v6829_v3, %s11019_s27 }
 0x4c0   : > { %6825 = vrot.lane.b32.xlu1 %v6789_v42, %s7314_s19 }
 0x4c2   : > { %6850 = vrot.lane.b32.xlu0 %v6829_v3, %s11024_s21 }
 0x4c4   : > { %6865 = vrot.lane.b32.xlu1 %v6864_v15, %s7315_s20 }
 0x4c6   : > { %6855 = vrot.lane.b32.xlu0 %v6829_v3, %s7314_s19 }
 0x4c8   : > { %1805 = vrot.lane.b32.xlu1 %v1779_v56, %s11005_s15 }
 0x4ca   : > { %6860 = vrot.lane.b32.xlu0 %v6859_v38, %s7315_s20 }
 0x4ce   : > { %1927 = vrot.lane.b32.xlu0 %v9084_v7, %s11016_s14 }
 0x4d2   : > { %1971 = vrot.lane.b32.xlu0 %v9084_v7, %s11024_s21 }
 0x516   : > { %v6791_v25 = vpop.permute.xlu1 %6790 }
 0x517   : > { %v6793_v37 = vunpack.i.h.bf16 %v6791_v25  ;;  %v6792_v12 = vunpack.i.l.bf16 %v6791_v25 }
 0x518   : > { %v9101_v48 = vpop.permute.xlu0 %6780 }
 0x519   : > { %v6782_v30 = vunpack.i.l.bf16 %v9101_v48  ;;  %v9122_v13 = vsel %vm557_vm8, %v6792_v12, %v6793_v37  ;;  %v6783_v6 = vunpack.i.h.bf16 %v9101_v48  ;;  %v6979_v48 = vpack.i.bf16 %v9065_v23, %v9050_v18 }
 0x51a   : > { %v6796_v47 = vpop.permute.xlu1 %6795 }
 0x51b   : > { %v1812_v24 = vsel %vm11174_vm6, %v6778_v41, %v6782_v30  ;;  %v6798_v0 = vunpack.i.h.bf16 %v6796_v47  ;;  %v6797_v63 = vunpack.i.l.bf16 %v6796_v47  ;;  %v1813_v11 = vsel %vm11175_vm9, %v6782_v30, %v6783_v6  ;;  %vm11181_vm6 = vmmov %vm11178_vm3 }
 0x51c   : > { %v9106_v4 = vmax.f32 %v9037_v19, %v1812_v24  ;;  %v9108_v55 = vpop.permute.xlu0 %6785  ;;  %v9177_v40 = vmax.f32 %v9053_v58, %v1813_v11  ;;  %vm11182_vm9 = vmmov %vm11178_vm3 }
 0x51d   : > { %v9115_v16 = vsel %vm1893_vm7, %v6797_v63, %v6798_v0  ;;  %v6787_v9 = vunpack.i.l.bf16 %v9108_v55  ;;  %v6788_v57 = vunpack.i.h.bf16 %v9108_v55 }
 0x51e   : > { %v9110_v54 = vpop.permute.xlu1 %6800  ;;  %v6874_v20 = vpack.i.bf16 %v9106_v4, %v9084_v7  ;;  %v9129_v29 = vpack.c.bf16 %v9115_v16, %v9122_v13  ;;  %v9229_v25 = vpack.i.bf16 %v9177_v40, %v9106_v4 }
 0x51f   : > { %v6802_v27 = vunpack.i.l.bf16 %v9110_v54  ;;  %v9194_v41 = vsel %vm11177_vm12, %v6787_v9, %v6788_v57  ;;  %vm11207_vm12 = vmmov %vm11178_vm3 }
 0x520   : > { %v9117_v1 = vpop.permute.xlu0 %6830  ;;  %6875 = vrot.lane.b32.xlu0 %v6874_v20, %s11012_s17  ;;  %6870 = vrot.lane.b32.xlu1 %v6874_v20, %s11027_s24  ;;  %v6894_v42 = vpack.i.bf16 %v9194_v41, %v9084_v7 }
 0x521   : > { %v6833_v33 = vunpack.i.h.bf16 %v9117_v1  ;;  %v6832_v60 = vunpack.i.l.bf16 %v9117_v1 }
 0x522   : > { %v9125_v22 = vpop.permute.xlu1 %6805 }
 0x523   : > { %v1872_v62 = vsel %vm557_vm8, %v6833_v33, %v6792_v12  ;;  %v1874_v32 = vsel %vm557_vm8, %v6793_v37, %v6832_v60  ;;  %v6807_v49 = vunpack.i.l.bf16 %v9125_v22  ;;  %v6808_v47 = vunpack.i.h.bf16 %v9125_v22 }
 0x524   : > { %v9132_v17 = vpop.permute.xlu0 %6835  ;;  %6880 = vrot.lane.b32.xlu0 %v6859_v38, %s7316_s26  ;;  %1993 = vrot.lane.b32.xlu1 %v9084_v7, %s7314_s19  ;;  %v6803_v37 = vunpack.i.h.bf16 %v9110_v54  ;;  %v6924_v12 = vpack.i.bf16 %v1874_v32, %v9122_v13 }
 0x525   : > { %v6838_v5 = vunpack.i.h.bf16 %v9132_v17  ;;  %v6837_v28 = vunpack.i.l.bf16 %v9132_v17  ;;  %v2071_v13 = vsel %vm2070_vm2, %v6807_v49, %v6808_v47 }
 0x526   : > { %v9144_v19 = vpop.permute.xlu1 %6810 }
 0x527   : > { %v1895_v51 = vsel %vm1893_vm7, %v6838_v5, %v6797_v63  ;;  %v9155_v39 = vsel %vm1893_vm7, %v6798_v0, %v6837_v28  ;;  %v6813_v35 = vunpack.i.h.bf16 %v9144_v19  ;;  %v6812_v38 = vunpack.i.l.bf16 %v9144_v19 }
 0x528   : > { %v9159_v14 = vpop.permute.xlu0 %6840  ;;  %2016 = vrot.lane.b32.xlu0 %v9084_v7, %s7316_s26  ;;  %6885 = vrot.lane.b32.xlu1 %v6874_v20, %s7312_s12  ;;  %v9164_v31 = vpack.c.bf16 %v1895_v51, %v1872_v62  ;;  %v9186_v50 = vpack.c.bf16 %v9155_v39, %v1874_v32  ;;  %v6889_v53 = vpack.i.bf16 %v1895_v51, %v1872_v62 }
 0x529   : > { %v6843_v61 = vunpack.i.h.bf16 %v9159_v14  ;;  %v9174_v52 = vsel %vm11176_vm10, %v6813_v35, %v6787_v9  ;;  %v9251_v20 = vsel %vm11178_vm3, %v6788_v57, %v6812_v38  ;;  %vm2028_vm10 = vcmask 457728  }
 0x52a   : > { %v9179_v21 = vpop.permute.xlu1 %6815  ;;  %v9183_v26 = vpack.c.bf16 %v9174_v52, %v9067_v2  ;;  %v6899_v2 = vpack.i.bf16 %v6802_v27, %v6807_v49  ;;  %v6919_v49 = vpack.i.bf16 %v9174_v52, %v9251_v20 }
 0x52b   : > { %v9191_v45 = vsel %vm773_vm11, %v6843_v61, %v6802_v27  ;;  %v9210_v44 = vunpack.i.l.bf16 %v9179_v21 }
 0x52c   : > { %v9196_v8 = vpop.permute.xlu0 %2064  ;;  %2355 = vmatprep.subr.bf16.mxu0 %v9183_v26  ;;  %2040 = vrot.lane.b32.xlu0 %v9177_v40, %s11027_s24 }
 0x52d   : > { %6890 = vrot.lane.b32.xlu1 %v6889_v53, %s11019_s27  ;;  %v2072_v11 = vsel %vm2070_vm2, %v6808_v47, %v9196_v8 }
 0x52e   : > { %v6821_v58 = vpop.permute.xlu1 %6820 }
 0x52f   : > { %v6822_v15 = vunpack.i.l.bf16 %v6821_v58  ;;  %v6823_v57 = vunpack.i.h.bf16 %v6821_v58 }
 0x530   : > { %v9205_v59 = vpop.permute.xlu0 %6845  ;;  %2044 = vrot.lane.b32.xlu0 %v9177_v40, %s11012_s17 }
 0x531   : > { %v10975_v36 = vunpack.i.h.bf16 %v9205_v59  ;;  %6895 = vrot.lane.b32.xlu1 %v6894_v42, %s11019_s27  ;;  %v6914_v9 = vpack.i.bf16 %v6822_v15, %v9210_v44 }
 0x532   : > { %v6826_v10 = vpop.permute.xlu1 %6825 }
 0x533   : > { %v9218_v3 = vsel %vm851_vm13, %v10975_v36, %v9210_v44  ;;  %v6827_v63 = vunpack.i.l.bf16 %v6826_v10 }
 0x534   : > { %v9220_v46 = vpop.permute.xlu0 %6850  ;;  %6900 = vrot.lane.b32.xlu0 %v6899_v2, %s11019_s27  ;;  %v1941_v2 = vsel %vm773_vm11, %v6802_v27, %v6803_v37  ;;  %v10979_v27 = vunpack.i.l.bf16 %v9159_v14 }
 0x535   : > { %v6853_v56 = vunpack.i.h.bf16 %v9220_v46  ;;  %2048 = vrot.lane.b32.xlu1 %v9177_v40, %s7312_s12  ;;  %v10974_v62 = vunpack.i.l.bf16 %v9220_v46 }
 0x536   : > { %v9253_v22 = vpop.permute.xlu1 %6865 }
 0x537   : > { %v9234_v30 = vsel %vm929_vm15, %v6853_v56, %v6822_v15  ;;  %v10976_v32 = vunpack.i.h.bf16 %v9253_v22  ;;  %v9278_v47 = vsel %vm929_vm15, %v6823_v57, %v10974_v62  ;;  %v6867_v58 = vunpack.i.l.bf16 %v9253_v22 }
 0x538   : > { %v9237_v24 = vpop.permute.xlu0 %6855  ;;  %6910 = vrot.lane.b32.xlu0 %v9229_v25, %s7313_s30  ;;  %v2293_v0 = vpack.c.bf16 %v9234_v30, %v9218_v3  ;;  %v6828_v62 = vunpack.i.h.bf16 %v6826_v10  ;;  %v6929_v10 = vpack.i.bf16 %v9155_v39, %v9115_v16  ;;  %v6818_v16 = vunpack.i.h.bf16 %v9179_v21 }
 0x539   : > { %v10973_v55 = vunpack.i.h.bf16 %v9237_v24  ;;  %6905 = vrot.lane.b32.xlu1 %v9229_v25, %s11016_s14 }
 0x53b   : > { %v9262_v54 = vsel %vm2005_vm0, %v10973_v55, %v6827_v63  ;;  %v6934_v55 = vpack.i.bf16 %v2072_v11, %v2071_v13  ;;  %v9292_v13 = vsel %vm929_vm15, %v6822_v15, %v6823_v57 }
 0x53c   : > { %v9265_v51 = vpop.permute.xlu0 %6860  ;;  %6925 = vrot.lane.b32.xlu0 %v6924_v12, %s11019_s27  ;;  %v10977_v12 = vunpack.i.l.bf16 %v9237_v24 }
 0x53d   : > { %v6863_v53 = vunpack.i.h.bf16 %v9265_v51  ;;  %v6862_v42 = vunpack.i.l.bf16 %v9265_v51  ;;  %6915 = vrot.lane.b32.xlu1 %v6914_v9, %s11019_s27 }
 0x53e   : > { %v9314_v57 = vsel %vm2005_vm0, %v6828_v62, %v10977_v12 }
 0x53f   : > { %v1919_v9 = vsel %vm1916_vm1, %v6863_v53, %v10976_v32  ;;  %v9297_v36 = vsel %vm1916_vm1, %v6867_v58, %v6862_v42  ;;  %v9324_v58 = vsel %vm2005_vm0, %v6827_v63, %v6828_v62  ;;  %v9340_v62 = vsel %vm851_vm13, %v9210_v44, %v6818_v16 }
 0x540   : > { %6935 = vrot.lane.b32.xlu0 %v6934_v55, %s11019_s27  ;;  %v1928_v52 = vpop.permute.xlu0 %1927  ;;  %v9289_v11 = vpack.c.bf16 %v1941_v2, %v1919_v9  ;;  %v6954_v55 = vpack.i.bf16 %v9278_v47, %v9292_v13  ;;  %v6959_v39 = vpack.i.bf16 %v9314_v57, %v9324_v58 }
 0x541   : > { %v9302_v32 = vsel %vm773_vm11, %v1928_v52, %v6843_v61  ;;  %6920 = vrot.lane.b32.xlu1 %v6919_v49, %s11019_s27  ;;  %v9319_v61 = vsel %vm773_vm11, %v6803_v37, %v10979_v27  ;;  %v10978_v49 = vunpack.i.l.bf16 %v9205_v59  ;;  %v1806_v52 = vpop.permute.xlu1 %1805 }
 0x542   : > { %v2287_v15 = vpack.c.bf16 %v9302_v32, %v9297_v36  ;;  %v6939_v9 = vpack.i.bf16 %v9319_v61, %v1941_v2  ;;  %v1814_v2 = vsel %vm11172_vm4, %v6783_v6, %v1806_v52  ;;  %v9365_v6 = vld [vmem:[%s10834_s3 + $0x4] ss:$8 sps:$4 sm:$0xff]   ;;  %vm4796_vm4 = vcmask 687104  }
 0x543   : > { %v9334_v37 = vsel %vm851_vm13, %v6818_v16, %v10978_v49  ;;  %v1830_v44 = vmax.f32 %v9055_v43, %v1814_v2  ;;  %2387 = vmatprep.mubr.bf16.mxu0 %v9365_v6 }
 0x544   : > { %6955 = vrot.lane.b32.xlu0 %v6954_v55, %s11019_s27  ;;  %v6944_v21 = vpack.i.bf16 %v9334_v37, %v9340_v62  ;;  %v11179_v55 = vmov 0.0   ;;  %v1972_v43 = vpop.permute.xlu0 %1971 }
 0x545   : > { %6930 = vrot.lane.b32.xlu1 %v6929_v10, %s11019_s27  ;;  %v6969_v10 = vpack.i.bf16 %v11179_v55, %v6827_v63 }
 0x548   : > { %6960 = vrot.lane.b32.xlu0 %v6959_v39, %s11019_s27 }
 0x549   : > { %6940 = vrot.lane.b32.xlu1 %v6939_v9, %s11019_s27 }
 0x54c   : > { %6965 = vrot.lane.b32.xlu0 %v9229_v25, %s11024_s21 }
 0x54d   : > { %6945 = vrot.lane.b32.xlu1 %v6944_v21, %s11019_s27 }
 0x550   : > { %6975 = vrot.lane.b32.xlu0 %v9229_v25, %s7314_s19 }
 0x551   : > { %6950 = vrot.lane.b32.xlu1 %v9229_v25, %s11019_s27 }
 0x554   : > { %2076 = vrot.lane.b32.xlu0 %v1830_v44, %s11016_s14 }
 0x555   : > { %6970 = vrot.lane.b32.xlu1 %v6969_v10, %s11019_s27 }
 0x559   : > { %1912 = vrot.lane.b32.xlu1 %v9065_v23, %s7315_s20 }
 0x55d   : > { %6980 = vrot.lane.b32.xlu1 %v6979_v48, %s7316_s26 }
 0x561   : > { %2087 = vrot.lane.b32.xlu1 %v1830_v44, %s11024_s21  ;;  %s7233_s21 = sshll.u32 %s7318_s29, 4  ;;  %s7234_s21 = int_to_ptr.vmem [resolvable:$false] %s7233_s21 }
 0x562   : > { %s7235_s15 = scalar_lea.vmem %s7234_s21, 32 }
 0x565   : > { %1914 = vrot.lane.b32.xlu1 %v9106_v4, %s7315_s20 }
 0x592   : > { %v6876_v25 = vpop.permute.xlu0 %6875  ;;  %v6871_v63 = vpop.permute.xlu1 %6870 }
 0x593   : > { %v6873_v16 = vunpack.i.h.bf16 %v6871_v63  ;;  %v6872_v39 = vunpack.i.l.bf16 %v6871_v63  ;;  %v6878_v63 = vunpack.i.h.bf16 %v6876_v25  ;;  %v6877_v12 = vunpack.i.l.bf16 %v6876_v25 }
 0x595   : > { %v9375_v9 = vsel %vm11180_vm5, %v6812_v38, %v6873_v16  ;;  %v1849_v21 = vsel %vm11181_vm6, %v6872_v39, %v6813_v35  ;;  %v1871_v35 = vsel %vm557_vm8, %v6877_v12, %v6833_v33  ;;  %vm4844_vm5 = vcmask 73728  }
 0x596   : > { %v6984_v52 = vpack.i.bf16 %v9375_v9, %v1830_v44  ;;  %v2277_v2 = vpack.c.bf16 %v1849_v21, %v9084_v7  ;;  %v9382_v10 = vpop.permute.xlu0 %6880  ;;  %v1994_v48 = vpop.permute.xlu1 %1993  ;;  %v1918_v7 = vsel %vm1916_vm1, %v6862_v42, %v6863_v53 }
 0x597   : > { %v10981_v17 = vunpack.i.h.bf16 %v9382_v10 }
 0x598   : > { %6985 = vrot.lane.b32.xlu0 %v6984_v52, %s11019_s27  ;;  %2356 = vmatpush1.bf16.msra.mxu0 %v2277_v2  ;;  %v1983_v2 = vsel %vm929_vm15, %v1972_v43, %v6853_v56  ;;  %v11184_v43 = vunpack.i.h.bf16 %v9237_v24 }
 0x599   : > { %2357 = vmatprep.subr.bf16.mxu0 %v9164_v31 }
 0x59a   : > { %v2017_v38 = vpop.permute.xlu0 %2016  ;;  %v6886_v49 = vpop.permute.xlu1 %6885 }
 0x59b   : > { %v6888_v27 = vunpack.i.h.bf16 %v6886_v49  ;;  %v6887_v19 = vunpack.i.l.bf16 %v6886_v49  ;;  %v1875_v49 = vsel %vm557_vm8, %v6832_v60, %v6878_v63  ;;  %v6882_v60 = vunpack.i.l.bf16 %v9382_v10 }
 0x59c   : > { %2093 = vrot.lane.b32.xlu0 %v1830_v44, %s7314_s19 }
 0x59d   : > { %v1894_v25 = vsel %vm1893_vm7, %v6887_v19, %v6838_v5  ;;  %v1898_v44 = vsel %vm1893_vm7, %v6837_v28, %v6888_v27  ;;  %v9415_v5 = vpack.c.bf16 %v9191_v45, %v1918_v7  ;;  %v2030_v52 = vsel %vm2028_vm10, %v6882_v60, %v10981_v17 }
 0x59e   : > { %v2282_v39 = vpack.c.bf16 %v1894_v25, %v1871_v35  ;;  %v9404_v51 = vpop.permute.xlu0 %2040  ;;  %v9406_v53 = vpack.c.bf16 %v1898_v44, %v1875_v49  ;;  %v2029_v30 = vsel %vm2028_vm10, %v2017_v38, %v6882_v60  ;;  %v2006_v35 = vsel %vm2005_vm0, %v1994_v48, %v11184_v43 }
 0x59f   : > { %v9410_v33 = vsel %vm11182_vm9, %v6873_v16, %v9404_v51  ;;  %v9412_v42 = vpop.permute.xlu1 %6890 }
 0x5a0   : > { %v6989_v1 = vpack.i.bf16 %v1875_v49, %v9410_v33  ;;  %2358 = vmatpush1.bf16.msra.mxu0 %v2282_v39  ;;  %v2297_v49 = vpack.c.bf16 %v2029_v30, %v2006_v35  ;;  %v9469_v39 = vpack.c.bf16 %v9194_v41, %v9048_v34 }
 0x5a1   : > { %2359 = vmatprep.subr.bf16.mxu0 %v9415_v5 }
 0x5a2   : > { %v9421_v28 = vpop.permute.xlu0 %2044  ;;  %6990 = vrot.lane.b32.xlu0 %v6989_v1, %s11019_s27 }
 0x5a3   : > { %v9426_v12 = vsel %vm557_vm8, %v6878_v63, %v9421_v28  ;;  %v6896_v45 = vpop.permute.xlu1 %6895  ;;  %v11183_v63 = vunpack.i.h.bf16 %v9205_v59  ;;  %vm11202_vm8 = vmmov %vm11178_vm3 }
 0x5a4   : > { %v6994_v16 = vpack.i.bf16 %v1898_v44, %v9426_v12  ;;  %v6897_v21 = vunpack.i.l.bf16 %v6896_v45  ;;  %2360 = vmatpush1.bf16.msra.mxu0 %v2287_v15  ;;  %v2298_v15 = vpack.c.bf16 %v2030_v52, %v9262_v54 }
 0x5a5   : > { %2361 = vmatprep.subr.bf16.mxu0 %v2293_v0 }
 0x5a6   : > { %v1961_v19 = vsel %vm851_vm13, %v6897_v21, %v11183_v63  ;;  %v9444_v7 = vpop.permute.xlu0 %6900  ;;  %6995 = vrot.lane.b32.xlu1 %v6994_v16, %s11019_s27  ;;  %v11185_v16 = vunpack.i.l.bf16 %v9159_v14 }
 0x5a7   : > { %v2292_v36 = vpack.c.bf16 %v1983_v2, %v1961_v19  ;;  %v9447_v32 = vpop.permute.xlu1 %2048  ;;  %v6898_v2 = vunpack.i.h.bf16 %v6896_v45  ;;  %v6903_v17 = vunpack.i.h.bf16 %v9444_v7 }
 0x5a8   : > { %v9452_v0 = vsel %vm1893_vm7, %v6888_v27, %v9447_v32  ;;  %vm11205_vm7 = vmmov %vm11178_vm3 }
 0x5a9   : > { %2362 = vmatpush1.bf16.msra.mxu0 %v2292_v36 }
 0x5aa   : > { %2363 = vmatprep.subr.bf16.mxu0 %v2298_v15  ;;  %v9460_v25 = vpop.permute.xlu0 %6910 }
 0x5ab   : > { %v10984_v38 = vunpack.i.h.bf16 %v9460_v25  ;;  %v6912_v44 = vunpack.i.l.bf16 %v9460_v25  ;;  %v9464_v27 = vpop.permute.xlu1 %6905 }
 0x5ac   : > { %v10986_v54 = vunpack.i.l.bf16 %v9464_v27  ;;  %v11186_v55 = vunpack.i.l.bf16 %v9464_v27 }
 0x5ad   : > { %v2073_v1 = vsel %vm2070_vm2, %v9196_v8, %v6912_v44  ;;  %v2074_v48 = vsel %vm2070_vm2, %v6912_v44, %v10984_v38  ;;  %2364 = vmatpush1.bf16.msra.mxu0 %v2297_v49  ;;  %v6893_v44 = vunpack.i.h.bf16 %v9412_v42  ;;  %v6908_v38 = vunpack.i.h.bf16 %v9464_v27  ;;  %vm11208_vm2 = vmmov %vm11178_vm3 }
 0x5ae   : > { %v6999_v60 = vpack.i.bf16 %v2073_v1, %v9452_v0  ;;  %v9482_v21 = vsel %vm773_vm11, %v11185_v16, %v10986_v54  ;;  %2365 = vmatprep.subr.bf16.mxu0 %v9469_v39  ;;  %v9485_v34 = vpop.permute.xlu0 %6925 }
 0x5af   : > { %v7004_v41 = vpack.i.bf16 %v9482_v21, %v2074_v48  ;;  %v9488_v8 = vpop.permute.xlu1 %6915  ;;  %v10982_v36 = vunpack.i.h.bf16 %v9485_v34  ;;  %v6927_v30 = vunpack.i.l.bf16 %v9485_v34 }
 0x5b0   : > { %7000 = vrot.lane.b32.xlu0 %v6999_v60, %s11019_s27 }
 0x5b1   : > { %7005 = vrot.lane.b32.xlu1 %v7004_v41, %s11019_s27  ;;  %2366 = vmatpush1.bf16.msra.mxu0 %v9183_v26  ;;  %v2201_v16 = vsel %vm851_vm13, %v6927_v30, %v10982_v36 }
 0x5b2   : > { %2367 = vmatprep.subr.bf16.mxu0 %v9129_v29  ;;  %v9494_v14 = vpop.permute.xlu0 %6935 }
 0x5b3   : > { %v9496_v52 = vpop.permute.xlu1 %6920  ;;  %v10985_v1 = vunpack.i.h.bf16 %v9494_v14  ;;  %v6937_v48 = vunpack.i.l.bf16 %v9494_v14 }
 0x5b4   : > { %v6923_v63 = vunpack.i.h.bf16 %v9496_v52  ;;  %v10980_v19 = vunpack.i.l.bf16 %v9496_v52 }
 0x5b5   : > { %2368 = vmatpush1.bf16.msra.mxu0 %v9164_v31 }
 0x5b6   : > { %2369 = vmatprep.subr.bf16.mxu0 %v9289_v11  ;;  %v9504_v26 = vpop.permute.xlu0 %6955  ;;  %v2196_v15 = vsel %vm851_vm13, %v6898_v2, %v10980_v19  ;;  %v2195_v35 = vsel %vm851_vm13, %v6923_v63, %v6898_v2  ;;  %v6892_v2 = vunpack.i.l.bf16 %v9412_v42 }
 0x5b7   : > { %v9509_v43 = vpop.permute.xlu1 %6930  ;;  %v2306_v45 = vpack.c.bf16 %v2196_v15, %v9340_v62  ;;  %v2305_v63 = vpack.c.bf16 %v2195_v35, %v9218_v3  ;;  %v6957_v42 = vunpack.i.l.bf16 %v9504_v26  ;;  %v2211_v35 = vsel %vm851_vm13, %v6937_v48, %v10985_v1 }
 0x5b8   : > { %v10983_v31 = vunpack.i.h.bf16 %v9509_v43  ;;  %v6932_v49 = vunpack.i.l.bf16 %v9509_v43  ;;  %v2200_v36 = vsel %vm851_vm13, %v6892_v2, %v6927_v30  ;;  %v6917_v1 = vunpack.i.l.bf16 %v9488_v8 }
 0x5b9   : > { %2370 = vmatpush1.bf16.msra.mxu0 %v9415_v5 }
 0x5ba   : > { %2371 = vmatprep.subr.bf16.mxu0 %v2306_v45  ;;  %v9519_v60 = vpop.permute.xlu0 %6960  ;;  %v2206_v41 = vsel %vm851_vm13, %v6932_v49, %v10983_v31  ;;  %v2205_v56 = vsel %vm851_vm13, %v6893_v44, %v6932_v49  ;;  %v10989_v31 = vunpack.i.h.bf16 %v9504_v26 }
 0x5bb   : > { %v9529_v5 = vpop.permute.xlu1 %6940  ;;  %v2311_v15 = vpack.c.bf16 %v2206_v41, %v2201_v16  ;;  %v2310_v44 = vpack.c.bf16 %v2205_v56, %v2200_v36  ;;  %v6902_v41 = vunpack.i.l.bf16 %v9444_v7 }
 0x5bc   : > { %v10987_v45 = vunpack.i.h.bf16 %v9529_v5  ;;  %v6942_v19 = vunpack.i.l.bf16 %v9529_v5  ;;  %v2226_v7 = vsel %vm851_vm13, %v6957_v42, %v10989_v31  ;;  %v9575_v31 = vsel %vm773_vm11, %v11186_v55, %v6908_v38 }
 0x5bd   : > { %2372 = vmatpush1.bf16.msra.mxu0 %v2305_v63  ;;  %v2210_v54 = vsel %vm851_vm13, %v6902_v41, %v6937_v48  ;;  %v11188_v55 = vunpack.i.l.bf16 %v9205_v59 }
 0x5be   : > { %2373 = vmatprep.subr.bf16.mxu0 %v2311_v15  ;;  %v9538_v3 = vpop.permute.xlu0 %6965  ;;  %v2216_v49 = vsel %vm851_vm13, %v6942_v19, %v10987_v45  ;;  %v2215_v2 = vsel %vm851_vm13, %v6903_v17, %v6942_v19  ;;  %v6918_v19 = vunpack.i.h.bf16 %v9488_v8  ;;  %v6962_v8 = vunpack.i.l.bf16 %v9519_v60 }
 0x5bf   : > { %v9546_v16 = vpop.permute.xlu1 %6945  ;;  %v2316_v30 = vpack.c.bf16 %v2216_v49, %v2211_v35  ;;  %v6967_v56 = vunpack.i.l.bf16 %v9538_v3  ;;  %v2315_v35 = vpack.c.bf16 %v2215_v2, %v2210_v54  ;;  %v6963_v54 = vunpack.i.h.bf16 %v9519_v60 }
 0x5c0   : > { %v10988_v63 = vunpack.i.h.bf16 %v9546_v16  ;;  %v6947_v15 = vunpack.i.l.bf16 %v9546_v16  ;;  %v11187_v2 = vunpack.i.l.bf16 %v9220_v46 }
 0x5c1   : > { %2374 = vmatpush1.bf16.msra.mxu0 %v2310_v44 }
 0x5c2   : > { %2375 = vmatprep.subr.bf16.mxu0 %v2316_v30  ;;  %v9556_v36 = vpop.permute.xlu0 %6975  ;;  %v2221_v17 = vsel %vm851_vm13, %v6947_v15, %v10988_v63  ;;  %v2220_v49 = vsel %vm851_vm13, %v6917_v1, %v6947_v15  ;;  %v2225_v1 = vsel %vm851_vm13, %v6918_v19, %v6957_v42  ;;  %v9583_v15 = vsel %vm929_vm15, %v11187_v2, %v6967_v56 }
 0x5c3   : > { %v9566_v44 = vpop.permute.xlu1 %6950  ;;  %v2321_v48 = vpack.c.bf16 %v2226_v7, %v2221_v17  ;;  %v6978_v30 = vunpack.i.h.bf16 %v9556_v36  ;;  %v6977_v41 = vunpack.i.l.bf16 %v9556_v36  ;;  %v6968_v7 = vunpack.i.h.bf16 %v9538_v3  ;;  %v2333_v36 = vld [vmem:[%s10835_s4] sm:$0xff] }
 0x5c4   : > { %v10990_v45 = vunpack.i.h.bf16 %v9566_v44  ;;  %v6952_v63 = vunpack.i.l.bf16 %v9566_v44  ;;  %v11189_v2 = vunpack.i.l.bf16 %v9237_v24 }
 0x5c5   : > { %2376 = vmatpush1.bf16.msra.mxu0 %v2315_v35  ;;  %v2320_v35 = vpack.c.bf16 %v2225_v1, %v2220_v49  ;;  %v2095_v59 = vsel %vm2005_vm0, %v6977_v41, %v6978_v30  ;;  %v2231_v49 = vsel %vm851_vm13, %v6962_v8, %v6963_v54 }
 0x5c6   : > { %v9588_v17 = vsel %vm851_vm13, %v6952_v63, %v10990_v45  ;;  %v9593_v27 = vsel %vm851_vm13, %v11188_v55, %v6952_v63  ;;  %2377 = vmatprep.subr.bf16.mxu0 %v2321_v48  ;;  %v9603_v45 = vsel %vm2005_vm0, %v11189_v2, %v6977_v41 }
 0x5c7   : > { %v7014_v46 = vpack.i.bf16 %v9583_v15, %v9588_v17  ;;  %v6971_v42 = vpop.permute.xlu1 %6970  ;;  %v7009_v19 = vpack.i.bf16 %v9593_v27, %v9575_v31  ;;  %v7019_v55 = vpack.i.bf16 %v2095_v59, %v9603_v45 }
 0x5c8   : > { %v9608_v63 = vunpack.i.h.bf16 %v6971_v42  ;;  %v6972_v48 = vunpack.i.l.bf16 %v6971_v42  ;;  %v2077_v42 = vpop.permute.xlu0 %2076 }
 0x5c9   : > { %7015 = vrot.lane.b32.xlu1 %v7014_v46, %s11019_s27  ;;  %7010 = vrot.lane.b32.xlu0 %v7009_v19, %s11019_s27  ;;  %v2089_v46 = vsel %vm929_vm15, %v6967_v56, %v6968_v7  ;;  %v11190_v56 = vunpack.i.h.bf16 %v9460_v25  ;;  %v11191_v25 = vunpack.i.h.bf16 %v9253_v22  ;;  %v2295_v22 = vpack.c.bf16 %v9278_v47, %v9334_v37 }
 0x5ca   : > { %v2230_v24 = vsel %vm851_vm13, %v6972_v48, %v6962_v8  ;;  %2378 = vmatpush1.bf16.msra.mxu0 %v2320_v35  ;;  %v2326_v1 = vpack.c.bf16 %v9608_v63, %v2231_v49  ;;  %v9624_v19 = vpack.c.bf16 %v9608_v63, %v9608_v63  ;;  %v7024_v8 = vpack.i.bf16 %v9447_v32, %v9421_v28 }
 0x5cb   : > { %v2325_v41 = vpack.c.bf16 %v9608_v63, %v2230_v24  ;;  %v2078_v35 = vsel %vm773_vm11, %v6908_v38, %v2077_v42  ;;  %v1913_v28 = vpop.permute.xlu1 %1912  ;;  %v2280_v32 = vpack.c.bf16 %v9251_v20, %v9050_v18  ;;  %v11192_v49 = vunpack.i.h.bf16 %v9382_v10 }
 0x5cc   : > { %2379 = vmatprep.subr.bf16.mxu0 %v2326_v1  ;;  %v7029_v2 = vpack.i.bf16 %v2078_v35, %v11190_v56  ;;  %v1920_v38 = vsel %vm1916_vm1, %v11191_v25, %v1913_v28 }
 0x5cd   : > { %7020 = vrot.lane.b32.xlu1 %v7019_v55, %s11019_s27  ;;  %2177 = vrot.lane.b32.xlu0 %v2089_v46, %s11019_s27  ;;  %v2290_v18 = vpack.c.bf16 %v9319_v61, %v1920_v38  ;;  %v2294_v61 = vpack.c.bf16 %v9292_v13, %v9340_v62  ;;  %v11195_v38 = vunpack.i.h.bf16 %v9509_v43 }
 0x5ce   : > { %2380 = vmatpush1.bf16.msra.mxu0 %v2325_v41 }
 0x5cf   : > { %2381 = vmatprep.subr.bf16.mxu0 %v9624_v19  ;;  %v9656_v59 = vpop.permute.xlu1 %6980 }
 0x5d0   : > { %v6983_v20 = vunpack.i.h.bf16 %v9656_v59  ;;  %v6982_v48 = vunpack.i.l.bf16 %v9656_v59 }
 0x5d1   : > { %7025 = vrot.lane.b32.xlu1 %v7024_v8, %s11019_s27  ;;  %2107 = vrot.lane.b32.xlu0 %v9404_v51, %s11019_s27  ;;  %v9647_v51 = vld [vmem:[%s10834_s3] ss:$8 sps:$4 sm:$0xff]  }
 0x5d2   : > { %2382 = vmatpush1.bf16.msra.mxu0 %v9624_v19  ;;  %v2031_v24 = vsel %vm2028_vm10, %v11192_v49, %v6982_v48 }
 0x5d3   : > { %2383 = vmatprep.subr.bf16.mxu0 %v9624_v19  ;;  %v2088_v1 = vpop.permute.xlu1 %2087  ;;  %v2299_v47 = vpack.c.bf16 %v2031_v24, %v9324_v58 }
 0x5d4   : > { %v2090_v62 = vsel %vm929_vm15, %v6968_v7, %v2088_v1  ;;  %v11194_v7 = vunpack.i.l.bf16 %v9496_v52  ;;  %vm11204_vm15 = vmmov %vm11178_vm3 }
 0x5d5   : > { %7030 = vrot.lane.b32.xlu0 %v7029_v2, %s11019_s27 }
 0x5d6   : > { %2384 = vmatpush1.bf16.msra.mxu0 %v9624_v19 }
 0x5d7   : > { %2385 = vmatprep.subr.bf16.mxu0 %v9624_v19  ;;  %v9680_v55 = vpop.permute.xlu1 %1914 }
 0x5d8   : > { %v1921_v13 = vsel %vm1916_vm1, %v1913_v28, %v9680_v55 }
 0x5da   : > { %2386 = vmatpush1.bf16.msra.mxu0 %v9624_v19 }
 0x5db   : > { %2398 = vmatprep.subr.bf16.mxu0 %v2280_v32 }
 0x5dd   : > { %2388 = vmatmul.mubr.bf16.vlgmr.msra.gmra.mrb[20].mxu0 %v9647_v51 }
 0x5de   : > { %2399 = vmatpush1.bf16.msra.mxu0 %v9469_v39  ;;  %2430 = vmatprep.mubr.bf16.mxu0 %v9365_v6  ;;  %v2032_v39 = vsel %vm2028_vm10, %v6982_v48, %v6983_v20 }
 0x5df   : > { %2400 = vmatprep.subr.bf16.mxu0 %v9186_v50 }
 0x5e2   : > { %2401 = vmatpush1.bf16.msra.mxu0 %v9129_v29  ;;  %v2300_v29 = vpack.c.bf16 %v2032_v39, %v9314_v57  ;;  %v9687_v57 = vpack.c.bf16 %v9482_v21, %v1921_v13 }
 0x5e3   : > { %2402 = vmatprep.subr.bf16.mxu0 %v2290_v18 }
 0x5e6   : > { %2403 = vmatpush1.bf16.msra.mxu0 %v9289_v11  ;;  %v9678_v11 = vpack.c.bf16 %v9375_v9, %v9065_v23  ;;  %v11193_v9 = vunpack.i.h.bf16 %v9566_v44 }
 0x5e7   : > { %2404 = vmatprep.subr.bf16.mxu0 %v2295_v22  ;;  %v11196_v22 = vunpack.i.h.bf16 %v9485_v34  ;;  %v11198_v34 = vunpack.i.h.bf16 %v9529_v5 }
 0x5ea   : > { %2405 = vmatpush1.bf16.msra.mxu0 %v2294_v61 }
 0x5eb   : > { %2406 = vmatprep.subr.bf16.mxu0 %v2300_v29 }
 0x5ee   : > { %2407 = vmatpush1.bf16.msra.mxu0 %v2299_v47  ;;  %v11197_v47 = vunpack.i.h.bf16 %v9494_v14 }
 0x5ef   : > { %2408 = vmatprep.subr.bf16.mxu0 %v9678_v11 }
 0x5f2   : > { %2409 = vmatpush1.bf16.msra.mxu0 %v2280_v32 }
 0x5f3   : > { %2410 = vmatprep.subr.bf16.mxu0 %v9406_v53 }
 0x5f6   : > { %2411 = vmatpush1.bf16.msra.mxu0 %v9186_v50 }
 0x5f7   : > { %2412 = vmatprep.subr.bf16.mxu0 %v9687_v57 }
 0x5fa   : > { %2413 = vmatpush1.bf16.msra.mxu0 %v2290_v18 }
 0x60a   : > { %v6986_v23 = vpop.permute.xlu0 %6985 }
 0x60b   : > { %v6987_v58 = vunpack.i.l.bf16 %v6986_v23  ;;  %v6988_v50 = vunpack.i.h.bf16 %v6986_v23 }
 0x60d   : > { %v2084_v10 = vsel %vm851_vm13, %v11193_v9, %v6987_v58  ;;  %v2197_v42 = vsel %vm851_vm13, %v11194_v7, %v6988_v50 }
 0x60e   : > { %v7034_v41 = vpack.i.bf16 %v2090_v62, %v2084_v10  ;;  %v2094_v46 = vpop.permute.xlu0 %2093  ;;  %v2307_v35 = vpack.c.bf16 %v2197_v42, %v9334_v37 }
 0x60f   : > { %v2096_v21 = vsel %vm2005_vm0, %v6978_v30, %v2094_v46  ;;  %v2334_v30 = vld [vmem:[%s10835_s4 + $0x8] sm:$0xff]  ;;  %vm11210_vm0 = vmmov %vm11208_vm2 }
 0x610   : > { %2191 = vrot.lane.b32.xlu0 %v2096_v21, %s11019_s27  ;;  %7035 = vrot.lane.b32.xlu1 %v7034_v41, %s11019_s27 }
 0x614   : > { %2052 = vrot.lane.b32.xlu0 %v9177_v40, %s7315_s20  ;;  %v9704_v3 = vpop.permute.xlu0 %6990  ;;  %2026 = vrot.lane.b32.xlu1 %v9106_v4, %s7316_s26  ;;  %s11211_s20 = sld [smem:[#allocation31_spill]] }
 0x615   : > { %v6992_v44 = vunpack.i.l.bf16 %v9704_v3  ;;  %v6993_v28 = vunpack.i.h.bf16 %v9704_v3 }
 0x617   : > { %v2198_v40 = vsel %vm851_vm13, %v6988_v50, %v6992_v44  ;;  %v2202_v39 = vsel %vm851_vm13, %v11196_v22, %v6993_v28 }
 0x618   : > { %2337 = vperm.xlu1 %6743, %v2333_v36   ;;  %v2308_v8 = vpack.c.bf16 %v2198_v40, %v9593_v27  ;;  %2342 = vperm.xlu0 %7039, %v2334_v30   ;;  %v9723_v56 = vpop.permute.xlu1 %6995 }
 0x619   : > { %v6998_v2 = vunpack.i.h.bf16 %v9723_v56  ;;  %v6997_v52 = vunpack.i.l.bf16 %v9723_v56 }
 0x61a   : > { %2414 = vmatprep.subr.bf16.mxu0 %v2308_v8  ;;  %s10789_s26 = scalar_lea.hbm %s11211_s20, %s5309_s0 }
 0x61b   : > { %2415 = vmatpush1.bf16.msra.mxu0 %v2307_v35  ;;  %v2207_v18 = vsel %vm851_vm13, %v11195_v38, %v6998_v2  ;;  %v2203_v37 = vsel %vm851_vm13, %v6993_v28, %v6997_v52  ;;  %v11199_v35 = vunpack.i.h.bf16 %v9504_v26  ;;  %v11200_v28 = vunpack.i.h.bf16 %v9546_v16 }
 0x61c   : > { %v2312_v49 = vpack.c.bf16 %v2207_v18, %v2202_v39 }
 0x622   : > { %v9728_v32 = vpop.permute.xlu0 %7000 }
 0x623   : > { %v7002_v25 = vunpack.i.l.bf16 %v9728_v32  ;;  %v7006_v24 = vpop.permute.xlu1 %7005  ;;  %v7003_v1 = vunpack.i.h.bf16 %v9728_v32 }
 0x624   : > { %v7008_v43 = vunpack.i.h.bf16 %v7006_v24  ;;  %v7007_v29 = vunpack.i.l.bf16 %v7006_v24 }
 0x625   : > { %v2208_v48 = vsel %vm851_vm13, %v6998_v2, %v7002_v25  ;;  %v2212_v13 = vsel %vm851_vm13, %v11197_v47, %v7003_v1 }
 0x626   : > { %v2313_v61 = vpack.c.bf16 %v2208_v48, %v2203_v37  ;;  %v2217_v62 = vsel %vm851_vm13, %v11198_v34, %v7008_v43  ;;  %v2213_v21 = vsel %vm851_vm13, %v7003_v1, %v7007_v29 }
 0x627   : > { %v2317_v14 = vpack.c.bf16 %v2217_v62, %v2212_v13 }
 0x628   : > { %2416 = vmatprep.subr.bf16.mxu0 %v2313_v61 }
 0x629   : > { %2417 = vmatpush1.bf16.msra.mxu0 %v2312_v49 }
 0x63b   : > { %v9745_v23 = vpop.permute.xlu1 %7015  ;;  %v7011_v58 = vpop.permute.xlu0 %7010 }
 0x63c   : > { %v7017_v9 = vunpack.i.l.bf16 %v9745_v23  ;;  %v7013_v10 = vunpack.i.h.bf16 %v7011_v58  ;;  %v7012_v41 = vunpack.i.l.bf16 %v7011_v58  ;;  %v7018_v46 = vunpack.i.h.bf16 %v9745_v23 }
 0x63e   : > { %v2218_v50 = vsel %vm851_vm13, %v7008_v43, %v7012_v41  ;;  %v2223_v5 = vsel %vm851_vm13, %v7013_v10, %v7017_v9  ;;  %v2227_v2 = vsel %vm851_vm13, %v11199_v35, %v7018_v46  ;;  %v2222_v32 = vsel %vm851_vm13, %v11200_v28, %v7013_v10 }
 0x63f   : > { %v7021_v36 = vpop.permute.xlu1 %7020  ;;  %v2178_v30 = vpop.permute.xlu0 %2177  ;;  %v2318_v7 = vpack.c.bf16 %v2218_v50, %v2213_v21  ;;  %v2322_v37 = vpack.c.bf16 %v2227_v2, %v2222_v32 }
 0x640   : > { %v7023_v42 = vunpack.i.h.bf16 %v7021_v36  ;;  %v7022_v40 = vunpack.i.l.bf16 %v7021_v36  ;;  %v2228_v8 = vsel %vm851_vm13, %v7018_v46, %v2178_v30 }
 0x641   : > { %v2323_v38 = vpack.c.bf16 %v2228_v8, %v2223_v5  ;;  %2418 = vmatprep.subr.bf16.mxu0 %v2318_v7 }
 0x642   : > { %2419 = vmatpush1.bf16.msra.mxu0 %v2317_v14  ;;  %v2233_v18 = vsel %vm851_vm13, %v7022_v40, %v7023_v42  ;;  %v2232_v48 = vsel %vm851_vm13, %v6963_v54, %v7022_v40 }
 0x643   : > { %2420 = vmatprep.subr.bf16.mxu0 %v2323_v38  ;;  %v2328_v22 = vpack.c.bf16 %v9608_v63, %v2233_v18  ;;  %v2327_v26 = vpack.c.bf16 %v9608_v63, %v2232_v48  ;;  %v2108_v16 = vpop.permute.xlu0 %2107  ;;  %v7026_v39 = vpop.permute.xlu1 %7025 }
 0x644   : > { %v7028_v61 = vunpack.i.h.bf16 %v7026_v39  ;;  %v7027_v49 = vunpack.i.l.bf16 %v7026_v39  ;;  %v2199_v60 = vsel %vm851_vm13, %v6992_v44, %v2108_v16 }
 0x645   : > { %v2309_v24 = vpack.c.bf16 %v2199_v60, %v9588_v17 }
 0x646   : > { %2421 = vmatpush1.bf16.msra.mxu0 %v2322_v37  ;;  %v2204_v47 = vsel %vm851_vm13, %v6997_v52, %v7027_v49  ;;  %v2209_v13 = vsel %vm851_vm13, %v7002_v25, %v7028_v61 }
 0x647   : > { %2422 = vmatprep.subr.bf16.mxu0 %v2328_v22  ;;  %v7031_v54 = vpop.permute.xlu0 %7030  ;;  %v2314_v3 = vpack.c.bf16 %v2209_v13, %v2204_v47 }
 0x648   : > { %v7033_v1 = vunpack.i.h.bf16 %v7031_v54  ;;  %v7032_v43 = vunpack.i.l.bf16 %v7031_v54 }
 0x64a   : > { %2423 = vmatpush1.bf16.msra.mxu0 %v2327_v26  ;;  %v2214_v44 = vsel %vm851_vm13, %v7007_v29, %v7032_v43  ;;  %v2219_v17 = vsel %vm851_vm13, %v7012_v41, %v7033_v1 }
 0x64b   : > { %2424 = vmatprep.subr.bf16.mxu0 %v9624_v19  ;;  %v2319_v58 = vpack.c.bf16 %v2219_v17, %v2214_v44  ;;  %v2624_v17 = vld [vmem:[%s10836_s5 + $0x80] sm:$0xff] }
 0x64e   : > { %2425 = vmatpush1.bf16.msra.mxu0 %v9624_v19 }
 0x64f   : > { %2426 = vmatprep.subr.bf16.mxu0 %v9624_v19 }
 0x652   : > { %2427 = vmatpush1.bf16.msra.mxu0 %v9624_v19 }
 0x653   : > { %2428 = vmatprep.subr.bf16.mxu0 %v9624_v19 }
 0x656   : > { %2429 = vmatpush1.bf16.msra.mxu0 %v9624_v19 }
 0x657   : > { %5334 = vmatprep.subr.bf16.mxu0 %v2309_v24 }
 0x659   : > { %2431 = vmatmul.mubr.bf16.vlgmr.msra.gmra.mrb[24].mxu0 %v9647_v51 }
 0x65a   : > { %5335 = vmatpush3.bf16.msra.mxu0 %v9678_v11  ;;  %2473 = vmatprep.mubr.bf16.mxu0 %v9365_v6 }
 0x65b   : > { %5336 = vmatprep.subr.bf16.mxu0 %v2314_v3 }
 0x65e   : > { %5337 = vmatpush3.bf16.msra.mxu0 %v9406_v53  ;;  %v2296_v53 = vpack.c.bf16 %v9583_v15, %v9593_v27  ;;  %v11201_v27 = vpack.c.bf16 %v9452_v0, %v9426_v12 }
 0x65f   : > { %5338 = vmatprep.subr.bf16.mxu0 %v2319_v58  ;;  %v2625_v58 = vld [vmem:[%s10836_s5 + $0x88] sm:$0xff] }
 0x662   : > { %5339 = vmatpush3.bf16.msra.mxu0 %v9687_v57 }
 0x682   : > { %v2192_v56 = vpop.permute.xlu0 %2191  ;;  %v7036_v52 = vpop.permute.xlu1 %7035 }
 0x683   : > { %v7038_v25 = vunpack.i.h.bf16 %v7036_v52  ;;  %v7037_v34 = vunpack.i.l.bf16 %v7036_v52  ;;  %v2234_v62 = vsel %vm851_vm13, %v7023_v42, %v2192_v56  ;;  %v2608_v56 = vld [vmem:[%s10836_s5] sm:$0xff] }
 0x684   : > { %v2329_v41 = vpack.c.bf16 %v9608_v63, %v2234_v62  ;;  %v2609_v62 = vld [vmem:[%s10836_s5 + $0x8] sm:$0xff] }
 0x685   : > { %v2224_v11 = vsel %vm851_vm13, %v7017_v9, %v7037_v34  ;;  %v2229_v29 = vsel %vm851_vm13, %v2178_v30, %v7038_v25  ;;  %v2302_v9 = vpack.c.bf16 %v9410_v33, %v9106_v4  ;;  %v5965_v34 = vpack.c.bf16 %v2625_v58, %v2624_v17  ;;  %vm11203_vm13 = vmmov %vm11178_vm3  ;;  %v2615_v58 = vld [vmem:[%s10836_s5 + $0x38] sm:$0xff] }
 0x686   : > { %v2027_v6 = vpop.permute.xlu1 %2026  ;;  %v2324_v10 = vpack.c.bf16 %v2229_v29, %v2224_v11  ;;  %v2053_v46 = vpop.permute.xlu0 %2052  ;;  %v2656_v11 = vld [vmem:[%s10836_s5 + $0x180] sm:$0xff]  ;;  %v2657_v29 = vld [vmem:[%s10836_s5 + $0x188] sm:$0xff]  ;;  %vm11209_vm3 = vmmov %vm11208_vm2 }
 0x687   : > { %v2033_v57 = vsel %vm2028_vm10, %v6983_v20, %v2027_v6  ;;  %v2054_v15 = vsel %vm1916_vm1, %v9680_v55, %v2053_v46  ;;  %v5967_v6 = vpack.c.bf16 %v2609_v62, %v2608_v56  ;;  %v2627_v46 = vld [vmem:[%s10836_s5 + $0x98] sm:$0xff]  ;;  %v2662_v56 = vld [vmem:[%s10836_s5 + $0x1b0] sm:$0xff] }
 0x688   : > { %5340 = vmatprep.subr.bf16.mxu0 %v2324_v10  ;;  %v2301_v23 = vpack.c.bf16 %v2033_v57, %v9603_v45  ;;  %v2304_v45 = vpack.c.bf16 %v9575_v31, %v2054_v15  ;;  %v5997_v10 = vpack.c.bf16 %v2657_v29, %v2656_v11  ;;  %v2626_v57 = vld [vmem:[%s10836_s5 + $0x90] sm:$0xff]  ;;  %v2647_v11 = vld [vmem:[%s10836_s5 + $0x138] sm:$0xff]  ;;  %v2632_v29 = vld [vmem:[%s10836_s5 + $0xc0] sm:$0xff] }
 0x689   : > { %5341 = vmatpush3.bf16.msra.mxu0 %v2296_v53  ;;  %v2640_v53 = vld [vmem:[%s10836_s5 + $0x100] sm:$0xff]  ;;  %v2610_v15 = vld [vmem:[%s10836_s5 + $0x10] sm:$0xff] }
 0x68a   : > { %5342 = vmatprep.subr.bf16.mxu0 %v2329_v41  ;;  %v2641_v41 = vld [vmem:[%s10836_s5 + $0x108] sm:$0xff]  ;;  %5998 = vmatprep.subr.bf16.mxu1 %v5997_v10  ;;  %v2646_v62 = vld [vmem:[%s10836_s5 + $0x130] sm:$0xff] }
 0x68d   : > { %5343 = vmatpush3.bf16.msra.mxu0 %v2301_v23 }
 0x68e   : > { %5344 = vmatprep.subr.bf16.mxu0 %v9624_v19 }
 0x691   : > { %5345 = vmatpush3.bf16.msra.mxu0 %v2302_v9  ;;  %v5999_v9 = vpack.c.bf16 %v2641_v41, %v2640_v53  ;;  %v2664_v53 = vld [vmem:[%s10836_s5 + $0x1c0] sm:$0xff]  ;;  %v2665_v41 = vld [vmem:[%s10836_s5 + $0x1c8] sm:$0xff] }
 0x692   : > { %5346 = vmatprep.subr.bf16.mxu0 %v9624_v19 }
 0x693   : > { %6000 = vmatpush3.bf16.msra.mxu1 %v5999_v9  ;;  %v2616_v9 = vld [vmem:[%s10836_s5 + $0x40] sm:$0xff] }
 0x695   : > { %5347 = vmatpush3.bf16.msra.mxu0 %v11201_v27  ;;  %v2611_v27 = vld [vmem:[%s10836_s5 + $0x18] sm:$0xff] }
 0x696   : > { %5348 = vmatprep.subr.bf16.mxu0 %v9624_v19 }
 0x697   : > { %v2338_v20 = vpop.permute.xlu1 %2337  ;;  %v2343_v30 = vpop.permute.xlu0 %2342 }
 0x699   : > { %5349 = vmatpush3.bf16.msra.mxu0 %v2304_v45 }
 0x69a   : > { %5966 = vmatprep.subr.bf16.mxu0 %v5965_v34 }
 0x69c   : > { %2474 = vmatmul.mubr.bf16.vlgmr.msra.gmra.mrb[28].mxu0 %v9647_v51 }
 0x69d   : > { %5968 = vmatpush3.bf16.msra.mxu0 %v5967_v6  ;;  %v2633_v6 = vld [vmem:[%s10836_s5 + $0xc8] sm:$0xff] }
 0x6b0   : > { %v2389_v63 = vpop.f32.mrb[20].mxu0 }
 0x6b1   : > { %v2391_v4 = vpop.f32.mrb[21].mxu0  ;;  %v9821_v19 = vadd.f32 %v2389_v63, %v2338_v20 }
 0x6b2   : > { %v2393_v33 = vpop.f32.mrb[22].mxu0  ;;  %v9815_v21 = vadd.f32 %v2391_v4, %v2338_v20  ;;  %v5969_v4 = vpack.c.bf16 %v2627_v46, %v2626_v57  ;;  %v6011_v57 = vpack.c.bf16 %v2647_v11, %v2646_v62  ;;  %v2617_v46 = vld [vmem:[%s10836_s5 + $0x48] sm:$0xff]  ;;  %v2639_v62 = vld [vmem:[%s10836_s5 + $0xf8] sm:$0xff]  ;;  %v2622_v11 = vld [vmem:[%s10836_s5 + $0x70] sm:$0xff] }
 0x6b3   : > { %v2395_v59 = vpop.f32.mrb[23].mxu0  ;;  %v2482_v5 = vmax.f32 %v9821_v19, 0.0  ;;  %v9846_v16 = vadd.f32 %v2393_v33, %v2343_v30  ;;  %v2658_v33 = vld [vmem:[%s10836_s5 + $0x190] sm:$0xff] }
 0x6b4   : > { %v2483_v31 = vmax.f32 %v9815_v21, 0.0  ;;  %v9829_v8 = vadd.f32 %v2395_v59, %v2343_v30  ;;  %v2659_v59 = vld [vmem:[%s10836_s5 + $0x198] sm:$0xff]  ;;  %v5971_v21 = vpack.c.bf16 %v2611_v27, %v2610_v15  ;;  %5970 = vmatprep.subr.bf16.mxu0 %v5969_v4  ;;  %v2648_v15 = vld [vmem:[%s10836_s5 + $0x140] sm:$0xff]  ;;  %v6013_v27 = vpack.c.bf16 %v2665_v41, %v2664_v53  ;;  %v2649_v4 = vld [vmem:[%s10836_s5 + $0x148] sm:$0xff] }
 0x6b5   : > { %v2487_v24 = vmax.f32 %v9846_v16, 0.0  ;;  %v2671_v53 = vld [vmem:[%s10836_s5 + $0x1f8] sm:$0xff] }
 0x6b6   : > { %v2488_v28 = vmax.f32 %v9829_v8, 0.0  ;;  %5972 = vmatpush3.bf16.msra.mxu0 %v5971_v21  ;;  %v2667_v21 = vld [vmem:[%s10836_s5 + $0x1d8] sm:$0xff] }
 0x72c   : > { %v2432_v50 = vpop.f32.mrb[24].mxu0 }
 0x72d   : > { %v9817_v55 = vadd.f32 %v2432_v50, %v2338_v20  ;;  %v2434_v14 = vpop.f32.mrb[25].mxu0  ;;  %v6001_v50 = vpack.c.bf16 %v2659_v59, %v2658_v33  ;;  %v2634_v33 = vld [vmem:[%s10836_s5 + $0xd0] sm:$0xff]  ;;  %v2635_v59 = vld [vmem:[%s10836_s5 + $0xd8] sm:$0xff] }
 0x72e   : > { %v9819_v12 = vadd.f32 %v2434_v14, %v2338_v20  ;;  %v2436_v0 = vpop.f32.mrb[26].mxu0  ;;  %v2628_v14 = vld [vmem:[%s10836_s5 + $0xa0] sm:$0xff] }
 0x72f   : > { %v2484_v51 = vmax.f32 %v9817_v55, 0.0  ;;  %v2438_v36 = vpop.f32.mrb[27].mxu0  ;;  %v9826_v40 = vadd.f32 %v2436_v0, %v2343_v30  ;;  %v2643_v55 = vld [vmem:[%s10836_s5 + $0x118] sm:$0xff]  ;;  %v2629_v0 = vld [vmem:[%s10836_s5 + $0xa8] sm:$0xff]  ;;  %6002 = vmatprep.subr.bf16.mxu1 %v6001_v50  ;;  %v5983_v50 = vpack.c.bf16 %v2617_v46, %v2616_v9  ;;  %v2654_v9 = vld [vmem:[%s10836_s5 + $0x170] sm:$0xff] }
 0x730   : > { %v2485_v42 = vmax.f32 %v9819_v12, 0.0  ;;  %v9844_v37 = vadd.f32 %v2438_v36, %v2343_v30  ;;  %v5973_v36 = vpack.c.bf16 %v2629_v0, %v2628_v14  ;;  %v5985_v14 = vpack.c.bf16 %v2635_v59, %v2634_v33  ;;  %v2618_v0 = vld [vmem:[%s10836_s5 + $0x50] sm:$0xff]  ;;  %v2655_v46 = vld [vmem:[%s10836_s5 + $0x178] sm:$0xff]  ;;  %v2673_v33 = vld [vmem:[%s10836_s5 + $0x208] sm:$0xff] }
 0x731   : > { %v7040_v7 = vpack.i.bf16 %v2484_v51, %v2483_v31  ;;  %v2489_v2 = vmax.f32 %v9826_v40, 0.0 }
 0x732   : > { %v7045_v35 = vpack.i.bf16 %v2482_v5, %v2485_v42  ;;  %v2490_v49 = vmax.f32 %v9844_v37, 0.0  ;;  %5974 = vmatprep.subr.bf16.mxu0 %v5973_v36  ;;  %v2650_v36 = vld [vmem:[%s10836_s5 + $0x150] sm:$0xff] }
 0x733   : > { %7041 = vrot.lane.b32.xlu1 %v7040_v7, %s11027_s24  ;;  %v7050_v32 = vpack.i.bf16 %v2489_v2, %v2488_v28  ;;  %v2613_v7 = vld [vmem:[%s10836_s5 + $0x28] sm:$0xff] }
 0x734   : > { %v7055_v43 = vpack.i.bf16 %v2487_v24, %v2490_v49 }
 0x737   : > { %7046 = vrot.lane.b32.xlu1 %v7045_v35, %s11027_s24  ;;  %v2660_v35 = vld [vmem:[%s10836_s5 + $0x1a0] sm:$0xff] }
 0x73b   : > { %7051 = vrot.lane.b32.xlu1 %v7050_v32, %s11027_s24  ;;  %v2661_v32 = vld [vmem:[%s10836_s5 + $0x1a8] sm:$0xff] }
 0x76f   : > { %v5350_v38 = vpop.f32.mrb[28].mxu0 }
 0x770   : > { %v5351_v18 = vpop.f32.mrb[29].mxu0 }
 0x771   : > { %v5352_v48 = vadd.f32 %v5351_v18, %v5350_v38  ;;  %v5353_v22 = vpop.f32.mrb[30].mxu0  ;;  %v2644_v38 = vld [vmem:[%s10836_s5 + $0x120] sm:$0xff]  ;;  %v2645_v18 = vld [vmem:[%s10836_s5 + $0x128] sm:$0xff] }
 0x772   : > { %v5354_v26 = vpop.f32.mrb[31].mxu0 }
 0x773   : > { %v9848_v39 = vadd.f32 %v5352_v48, %v2338_v20  ;;  %v5355_v61 = vadd.f32 %v5354_v26, %v5353_v22  ;;  %v2642_v20 = vld [vmem:[%s10836_s5 + $0x110] sm:$0xff]  ;;  %v6005_v22 = vpack.c.bf16 %v2661_v32, %v2660_v35  ;;  %v2636_v32 = vld [vmem:[%s10836_s5 + $0xe0] sm:$0xff] }
 0x774   : > { %v2630_v26 = vld [vmem:[%s10836_s5 + $0xb0] sm:$0xff] }
 0x775   : > { %v2486_v60 = vmax.f32 %v9848_v39, 0.0  ;;  %v9852_v54 = vadd.f32 %v5355_v61, %v2343_v30  ;;  %v2612_v30 = vld [vmem:[%s10836_s5 + $0x20] sm:$0xff]  ;;  %v2631_v61 = vld [vmem:[%s10836_s5 + $0xb8] sm:$0xff] }
 0x776   : > { %v5975_v48 = vpack.c.bf16 %v2613_v7, %v2612_v30  ;;  %v5977_v17 = vpack.c.bf16 %v2631_v61, %v2630_v26  ;;  %v2651_v30 = vld [vmem:[%s10836_s5 + $0x158] sm:$0xff]  ;;  %v2668_v26 = vld [vmem:[%s10836_s5 + $0x1e0] sm:$0xff]  ;;  %v2669_v61 = vld [vmem:[%s10836_s5 + $0x1e8] sm:$0xff] }
 0x777   : > { %v2491_v1 = vmax.f32 %v9852_v54, 0.0  ;;  %2510 = vrot.lane.b32.xlu0 %v2486_v60, %s11027_s24  ;;  %v6019_v35 = vpack.c.bf16 %v2651_v30, %v2650_v36  ;;  %v2674_v54 = vld [vmem:[%s10836_s5 + $0x210] sm:$0xff] }
 0x778   : > { %5976 = vmatpush3.bf16.msra.mxu0 %v5975_v48 }
 0x779   : > { %2520 = vrot.lane.b32.xlu1 %v2491_v1, %s11027_s24  ;;  %5978 = vmatprep.subr.bf16.mxu0 %v5977_v17  ;;  %v2652_v17 = vld [vmem:[%s10836_s5 + $0x160] sm:$0xff] }
 0x77b   : > { %7056 = vrot.lane.b32.xlu0 %v7055_v43, %s11027_s24  ;;  %v2614_v43 = vld [vmem:[%s10836_s5 + $0x30] sm:$0xff] }
 0x77c   : > { %v5979_v10 = vpack.c.bf16 %v2615_v58, %v2614_v43  ;;  %v2653_v58 = vld [vmem:[%s10836_s5 + $0x168] sm:$0xff] }
 0x77e   : > { %5980 = vmatpush3.bf16.msra.mxu0 %v5979_v10  ;;  %v2670_v10 = vld [vmem:[%s10836_s5 + $0x1f0] sm:$0xff] }
 0x7a5   : > { %v9867_v47 = vpop.permute.xlu1 %7041 }
 0x7a6   : > { %v7044_v13 = vunpack.i.h.bf16 %v9867_v47  ;;  %v7043_v3 = vunpack.i.l.bf16 %v9867_v47 }
 0x7a8   : > { %v2523_v52 = vsel %vm11202_vm8, %v7043_v3, %v7044_v13 }
 0x7a9   : > { %v9871_v44 = vpop.permute.xlu1 %7046  ;;  %v9916_v45 = vmax.f32 %v2483_v31, %v2523_v52  ;;  %v2663_v52 = vld [vmem:[%s10836_s5 + $0x1b8] sm:$0xff] }
 0x7aa   : > { %v7048_v25 = vunpack.i.l.bf16 %v9871_v44  ;;  %v6009_v34 = vpack.c.bf16 %v2663_v52, %v2662_v56  ;;  %v6023_v56 = vpack.c.bf16 %v2653_v58, %v2652_v17  ;;  %v7049_v52 = vunpack.i.h.bf16 %v9871_v44  ;;  %v7080_v17 = vld [vmem:[%s10837_s6] sm:$0xff]  }
 0x7ac   : > { %v2524_v23 = vsel %vm11203_vm13, %v7044_v13, %v7048_v25  ;;  %v6007_v13 = vpack.c.bf16 %v2645_v18, %v2644_v38  ;;  %v2637_v38 = vld [vmem:[%s10836_s5 + $0xe8] sm:$0xff]  ;;  %v2620_v18 = vld [vmem:[%s10836_s5 + $0x60] sm:$0xff] }
 0x7ad   : > { %v9918_v63 = vmax.f32 %v2484_v51, %v2524_v23  ;;  %v6003_v51 = vpack.c.bf16 %v2643_v55, %v2642_v20  ;;  %v5981_v23 = vpack.c.bf16 %v2633_v6, %v2632_v29  ;;  %v2666_v20 = vld [vmem:[%s10836_s5 + $0x1d0] sm:$0xff]  ;;  %v6015_v55 = vpack.c.bf16 %v2649_v4, %v2648_v15  ;;  %v2623_v6 = vld [vmem:[%s10836_s5 + $0x78] sm:$0xff]  ;;  %v7052_v41 = vpop.permute.xlu1 %7051  ;;  %v2672_v4 = vld [vmem:[%s10836_s5 + $0x200] sm:$0xff] }
 0x7ae   : > { %v5989_v48 = vpack.c.bf16 %v2637_v38, %v2636_v32  ;;  %v2522_v15 = vsel %vm11204_vm15, %v7049_v52, %v7043_v3 }
 0x7af   : > { %v7060_v31 = vpack.i.bf16 %v9918_v63, %v9916_v45  ;;  %6004 = vmatpush3.bf16.msra.mxu1 %v6003_v51  ;;  %5982 = vmatprep.subr.bf16.mxu0 %v5981_v23  ;;  %v6017_v51 = vpack.c.bf16 %v2667_v21, %v2666_v20  ;;  %v6025_v23 = vpack.c.bf16 %v2671_v53, %v2670_v10  ;;  %v7054_v21 = vunpack.i.h.bf16 %v7052_v41 }
 0x7b0   : > { %6006 = vmatprep.subr.bf16.mxu1 %v6005_v22  ;;  %5984 = vmatpush3.bf16.msra.mxu0 %v5983_v50  ;;  %v2621_v22 = vld [vmem:[%s10836_s5 + $0x68] sm:$0xff]  ;;  %v6029_v20 = vpack.c.bf16 %v2673_v33, %v2672_v4  ;;  %v7053_v50 = vunpack.i.l.bf16 %v7052_v41  ;;  %v7084_v4 = vld [vmem:[%s10837_s6 + $0x20] sm:$0xff]  }
 0x7b1   : > { %7061 = vrot.lane.b32.xlu0 %v7060_v31, %s11016_s14  ;;  %v2619_v31 = vld [vmem:[%s10836_s5 + $0x58] sm:$0xff]  ;;  %5986 = vmatprep.subr.bf16.mxu0 %v5985_v14  ;;  %v5991_v43 = vpack.c.bf16 %v2621_v22, %v2620_v18  ;;  %v7085_v33 = vld [vmem:[%s10837_s6 + $0x28] sm:$0xff]  }
 0x7b2   : > { %v5987_v7 = vpack.c.bf16 %v2619_v31, %v2618_v0  ;;  %v11206_v0 = vmov 0.0  }
 0x7b3   : > { %6008 = vmatpush3.bf16.msra.mxu1 %v6007_v13  ;;  %v6021_v13 = vpack.c.bf16 %v2669_v61, %v2668_v26 }
 0x7b4   : > { %6010 = vmatprep.subr.bf16.mxu1 %v6009_v34  ;;  %5988 = vmatpush3.bf16.msra.mxu0 %v5987_v7  ;;  %v2638_v34 = vld [vmem:[%s10836_s5 + $0xf0] sm:$0xff] }
 0x7b5   : > { %5990 = vmatprep.subr.bf16.mxu0 %v5989_v48  ;;  %v5993_v29 = vpack.c.bf16 %v2639_v62, %v2638_v34  ;;  %v7081_v62 = vld [vmem:[%s10837_s6 + $0x8] sm:$0xff]  }
 0x7b7   : > { %6012 = vmatpush3.bf16.msra.mxu1 %v6011_v57  ;;  %v5995_v57 = vpack.c.bf16 %v2623_v6, %v2622_v11 }
 0x7b8   : > { %6014 = vmatprep.subr.bf16.mxu1 %v6013_v27  ;;  %5992 = vmatpush3.bf16.msra.mxu0 %v5991_v43  ;;  %v6027_v27 = vpack.c.bf16 %v2655_v46, %v2654_v9  ;;  %v7082_v9 = vld [vmem:[%s10837_s6 + $0x10] sm:$0xff]  }
 0x7b9   : > { %5994 = vmatprep.subr.bf16.mxu0 %v5993_v29 }
 0x7bb   : > { %6016 = vmatpush3.bf16.msra.mxu1 %v6015_v55  ;;  %v2540_v55 = vmax.f32 %v2482_v5, %v2522_v15 }
 0x7bc   : > { %6018 = vmatprep.subr.bf16.mxu1 %v6017_v51  ;;  %5996 = vmatpush3.bf16.msra.mxu0 %v5995_v57 }
 0x7bd   : > { %6030 = vmatprep.subr.bf16.mxu0 %v6029_v20 }
 0x7bf   : > { %6020 = vmatpush3.bf16.msra.mxu1 %v6019_v35 }
 0x7c0   : > { %6022 = vmatprep.subr.bf16.mxu1 %v6021_v13 }
 0x7c3   : > { %6024 = vmatpush3.bf16.msra.mxu1 %v6023_v56 }
 0x7c4   : > { %6026 = vmatprep.subr.bf16.mxu1 %v6025_v23 }
 0x7c7   : > { %6028 = vmatpush3.bf16.msra.mxu1 %v6027_v27  ;;  %v7083_v27 = vld [vmem:[%s10837_s6 + $0x18] sm:$0xff]  }
 0x7c8   : > { %5609 = vmatprep.subr.bf16.mxu1 %v11206_v0 }
 0x7e9   : > { %v2511_v59 = vpop.permute.xlu0 %2510 }
 0x7ea   : > { %v2525_v47 = vsel %vm11205_vm7, %v7048_v25, %v2511_v59  ;;  %v10094_v3 = vmax.f32 %v2486_v60, %v2511_v59  ;;  %v2527_v25 = vsel %vm11207_vm12, %v7053_v50, %v7054_v21  ;;  %v7086_v59 = vld [vmem:[%s10837_s6 + $0x30] sm:$0xff]  }
 0x7eb   : > { %v2543_v14 = vmax.f32 %v2485_v42, %v2525_v47  ;;  %v2546_v12 = vmax.f32 %v2488_v28, %v2527_v25  ;;  %v2521_v42 = vpop.permute.xlu1 %2520 }
 0x7ec   : > { %2568 = vrot.lane.b32.xlu0 %v10094_v3, %s11016_s14  ;;  %v2549_v8 = vmax.f32 %v2491_v1, %v2521_v42  ;;  %v2675_v1 = vld [vmem:[%s10836_s5 + $0x218] sm:$0xff] }
 0x7ed   : > { %v7065_v44 = vpack.i.bf16 %v2543_v14, %v2540_v55  ;;  %v7057_v31 = vpop.permute.xlu0 %7056  ;;  %v6033_v13 = vpack.c.bf16 %v2675_v1, %v2674_v54  ;;  %v7098_v54 = vld [vmem:[%s10837_s6 + $0x90] sm:$0xff]   ;;  %v7099_v1 = vld [vmem:[%s10837_s6 + $0x98] sm:$0xff]  }
 0x7ee   : > { %v7059_v39 = vunpack.i.h.bf16 %v7057_v31  ;;  %v7058_v60 = vunpack.i.l.bf16 %v7057_v31 }
 0x7ef   : > { %7066 = vrot.lane.b32.xlu1 %v7065_v44, %s11016_s14 }
 0x7f0   : > { %v2526_v19 = vsel %vm11208_vm2, %v7059_v39, %v7053_v50  ;;  %v2528_v5 = vsel %vm11209_vm3, %v7054_v21, %v7058_v60  ;;  %v2529_v30 = vsel %vm11210_vm0, %v7058_v60, %v2521_v42 }
 0x7f1   : > { %v2545_v51 = vmax.f32 %v2487_v24, %v2526_v19  ;;  %v2547_v36 = vmax.f32 %v2489_v2, %v2528_v5  ;;  %v2548_v35 = vmax.f32 %v2490_v49, %v2529_v30  ;;  %v7088_v30 = vld [vmem:[%s10837_s6 + $0x40] sm:$0xff]  }
 0x7f3   : > { %2570 = vrot.lane.b32.xlu0 %v2545_v51, %s11016_s14  ;;  %v7070_v7 = vpack.i.bf16 %v2547_v36, %v2546_v12 }
 0x7f5   : > { %7071 = vrot.lane.b32.xlu1 %v7070_v7, %s11016_s14 }
 0x7f7   : > { %2576 = vrot.lane.b32.xlu0 %v2548_v35, %s11016_s14 }
 0x7f9   : > { %2578 = vrot.lane.b32.xlu1 %v2549_v8, %s11016_s14  ;;  %s404_s14 = sand.u32 1, %s7283_s22  }
 0x7fa   : > { %s405_s12 = scalar_lea.vmem [#allocation2], %s404_s14  ;;  %s4847_s25 = scalar_lea.sflag [#allocation3], %s404_s14 }
 0x7fb   : > { %s4859_s30 = sshll.u32 %s405_s12, 4  ;;  %s10791_s30 = int_to_ptr.vmem [resolvable:$true] %s4859_s30 }
 0x7fc   : > { %s7229_s28 = scalar_lea.vmem %s10791_s30, 16  ;;  %p7236_p0 = scmp.lt.s32.totalorder %s10791_s30, %s7234_s21 }
 0x7fd   : > { %p7230_p11 = scmp.ne.s32.totalorder %s10791_s30, %s7229_s28  ;;  %p7237_p1 = scmp.lt.s32.totalorder %s7235_s15, %s7229_s28 }
 0x7ff   : > { %p7231_p12 = pnand %p7230_p11, %p7422_p5  ;;  %p7238_p2 = por %p7237_p1, %p7236_p0 }
 0x801   : > { %p7232_p13 = pneg %p7231_p12 }
 0x803   : > { %p7239_p3 = pnand %p7238_p2, %p7232_p13 }
 0x823   : > { %v7062_v28 = vpop.permute.xlu0 %7061 }
 0x824   : > { %v7064_v40 = vunpack.i.h.bf16 %v7062_v28  ;;  %v7063_v2 = vunpack.i.l.bf16 %v7062_v28  ;;  %v7090_v28 = vld [vmem:[%s10837_s6 + $0x50] sm:$0xff]  }
 0x826   : > { %v2581_v16 = vsel %vm773_vm11, %v7063_v2, %v7064_v40 }
 0x827   : > { %v2599_v24 = vmax.f32 %v9916_v45, %v2581_v16  ;;  %v7093_v16 = vld [vmem:[%s10837_s6 + $0x68] sm:$0xff]  }
 0x829   : > { %2746 = vmatprep.mubr.f32.mxu0 %v2599_v24  ;;  %v7094_v24 = vld [vmem:[%s10837_s6 + $0x70] sm:$0xff]  }
 0x85e   : > { %v2569_v32 = vpop.permute.xlu0 %2568 }
 0x85f   : > { %v2602_v57 = vmax.f32 %v10094_v3, %v2569_v32 }
 0x861   : > { %v7067_v37 = vpop.permute.xlu1 %7066 }
 0x862   : > { %v7069_v49 = vunpack.i.h.bf16 %v7067_v37  ;;  %v7068_v38 = vunpack.i.l.bf16 %v7067_v37  ;;  %v7096_v37 = vld [vmem:[%s10837_s6 + $0x80] sm:$0xff]  }
 0x864   : > { %v2580_v18 = vsel %vm773_vm11, %v7068_v38, %v7063_v2  ;;  %v2583_v48 = vsel %vm773_vm11, %v7069_v49, %v2569_v32  ;;  %v2582_v22 = vsel %vm773_vm11, %v7064_v40, %v7069_v49  ;;  %v7091_v40 = vld [vmem:[%s10837_s6 + $0x58] sm:$0xff]   ;;  %v7092_v2 = vld [vmem:[%s10837_s6 + $0x60] sm:$0xff]   ;;  %v7097_v38 = vld [vmem:[%s10837_s6 + $0x88] sm:$0xff]  }
 0x865   : > { %v2598_v45 = vmax.f32 %v2540_v55, %v2580_v18  ;;  %v2571_v26 = vpop.permute.xlu0 %2570  ;;  %v2601_v61 = vmax.f32 %v2543_v14, %v2583_v48  ;;  %v2600_v43 = vmax.f32 %v9918_v63, %v2582_v22  ;;  %v7095_v32 = vld [vmem:[%s10837_s6 + $0x78] sm:$0xff]   ;;  %v7100_v18 = vld [vmem:[%s10837_s6 + $0xa0] sm:$0xff]   ;;  %v7101_v48 = vld [vmem:[%s10837_s6 + $0xa8] sm:$0xff]  }
 0x866   : > { %v7102_v22 = vld [vmem:[%s10837_s6 + $0xb0] sm:$0xff]  }
 0x867   : > { %v7072_v58 = vpop.permute.xlu1 %7071  ;;  %2747 = vmatmul.mubr.f32.vlgmr.msra.gmra.mrb[32].mxu0 %v2598_v45  ;;  %2821 = vmatprep.mubr.f32.mxu1 %v2601_v61  ;;  %v7103_v45 = vld [vmem:[%s10837_s6 + $0xb8] sm:$0xff]  }
 0x868   : > { %v7074_v56 = vunpack.i.h.bf16 %v7072_v58  ;;  %v7073_v52 = vunpack.i.l.bf16 %v7072_v58  ;;  %2822 = vmatmul.mubr.f32.vlgmr.msra.gmra.mrb[0].mxu1 %v2600_v43  ;;  %6032 = vmatpush3.bf16.msra.mxu0 %v6029_v20  ;;  %v7087_v20 = vld [vmem:[%s10837_s6 + $0x38] sm:$0xff]   ;;  %v7105_v43 = vld [vmem:[%s10837_s6 + $0xc8] sm:$0xff]   ;;  %v7108_v58 = vld [vmem:[%s10837_s6 + $0xe0] sm:$0xff]  }
 0x869   : > { %v2577_v34 = vpop.permute.xlu0 %2576  ;;  %6034 = vmatprep.subr.bf16.mxu0 %v6033_v13  ;;  %5610 = vmatpush3.bf16.msra.mxu1 %v7080_v17  ;;  %v7107_v17 = vld [vmem:[%s10837_s6 + $0xd8] sm:$0xff]  }
 0x86a   : > { %v2585_v63 = vsel %vm773_vm11, %v7073_v52, %v7074_v56  ;;  %v2584_v11 = vsel %vm773_vm11, %v2571_v26, %v7073_v52  ;;  %5611 = vmatprep.subr.bf16.mxu1 %v11206_v0  ;;  %v2586_v29 = vsel %vm773_vm11, %v7074_v56, %v2577_v34  ;;  %v7104_v26 = vld [vmem:[%s10837_s6 + $0xc0] sm:$0xff]   ;;  %v7109_v56 = vld [vmem:[%s10837_s6 + $0xe8] sm:$0xff]   ;;  %v7110_v52 = vld [vmem:[%s10837_s6 + $0xf0] sm:$0xff]  }
 0x86b   : > { %v2579_v6 = vpop.permute.xlu1 %2578  ;;  %v2604_v10 = vmax.f32 %v2546_v12, %v2585_v63  ;;  %v2603_v53 = vmax.f32 %v2545_v51, %v2584_v11  ;;  %v2605_v46 = vmax.f32 %v2547_v36, %v2586_v29  ;;  %v7113_v11 = vld [vmem:[%s10837_s6 + $0x108] sm:$0xff]   ;;  %v7114_v29 = vld [vmem:[%s10837_s6 + $0x110] sm:$0xff]  }
 0x86c   : > { %v2587_v41 = vsel %vm773_vm11, %v2577_v34, %v2579_v6  ;;  %6036 = vmatpush3.bf16.msra.mxu0 %v6033_v13  ;;  %v2607_v15 = vmax.f32 %v2549_v8, %v2579_v6  ;;  %vm7317_vm11 = vmmov 0   ;;  %v7089_v8 = vld [vmem:[%s10837_s6 + $0x48] sm:$0xff]   ;;  %v7106_v13 = vld [vmem:[%s10837_s6 + $0xd0] sm:$0xff]   ;;  %v7111_v34 = vld [vmem:[%s10837_s6 + $0xf8] sm:$0xff]  }
 0x86d   : > { %v2606_v23 = vmax.f32 %v2548_v35, %v2587_v41  ;;  %2751 = vmatprep.mubr.f32.mxu0 %v2604_v10  ;;  %5612 = vmatpush3.bf16.msra.mxu1 %v7081_v62  ;;  %v7112_v62 = vld [vmem:[%s10837_s6 + $0x100] sm:$0xff]   ;;  %v7115_v6 = vld [vmem:[%s10837_s6 + $0x118] sm:$0xff]   ;;  %v7118_v41 = vld [vmem:[%s10837_s6 + $0x130] sm:$0xff]  }
 0x86e   : > { %2752 = vmatmul.mubr.f32.gmra.mrb[34].mxu0 %v2603_v53  ;;  %5613 = vmatprep.subr.bf16.mxu1 %v11206_v0  ;;  %v7116_v10 = vld [vmem:[%s10837_s6 + $0x120] sm:$0xff]   ;;  %v7117_v53 = vld [vmem:[%s10837_s6 + $0x128] sm:$0xff]  }
 0x86f   : > { %2826 = vmatprep.mubr.f32.mxu1 %v2606_v23  ;;  %5606 = vmatprep.mubr.msk.f32.mxu0 %vm968_vm14, %v2602_v57  ;;  %v7119_v57 = vld [vmem:[%s10837_s6 + $0x138] sm:$0xff]   ;;  %v7120_v23 = vld [vmem:[%s10837_s6 + $0x140] sm:$0xff]  }
 0x870   : > { %2827 = vmatmul.mubr.f32.gmra.mrb[2].mxu1 %v2605_v46  ;;  %5929 = vmatprep.subr.bf16.mxu0 %v11206_v0  ;;  %v7121_v46 = vld [vmem:[%s10837_s6 + $0x148] sm:$0xff]  }
 0x871   : > { %5614 = vmatpush3.bf16.msra.mxu1 %v7082_v9  ;;  %5625 = vmatprep.mubr.msk.bf16.mxu1 %vm7317_vm11, %v11206_v0 }
 0x872   : > { %5607 = vmatmul.mubr.msk.f32.vlgmr.msra.gmra.mrb[36].mxu0 %vm968_vm14, %v2607_v15  ;;  %5615 = vmatprep.subr.bf16.mxu1 %v11206_v0  ;;  %v7122_v15 = vld [vmem:[%s10837_s6 + $0x150] sm:$0xff]   ;;  %vm4705_vm14 = vcmask 1043456  }
 0x873   : > { %5945 = vmatprep.mubr.msk.bf16.mxu0 %vm7317_vm11, %v11206_v0 }
 0x875   : > { %5616 = vmatpush3.bf16.msra.mxu1 %v7083_v27  ;;  %v7123_v27 = vld [vmem:[%s10837_s6 + $0x158] sm:$0xff]  }
 0x876   : > { %5617 = vmatprep.subr.bf16.mxu1 %v11206_v0 }
 0x879   : > { %5618 = vmatpush3.bf16.msra.mxu1 %v7084_v4  ;;  %v7124_v4 = vld [vmem:[%s10837_s6 + $0x160] sm:$0xff]  }
 0x87a   : > { %5619 = vmatprep.subr.bf16.mxu1 %v11206_v0 }
 0x87d   : > { %5620 = vmatpush3.bf16.msra.mxu1 %v7085_v33  ;;  %v7125_v33 = vld [vmem:[%s10837_s6 + $0x168] sm:$0xff]  }
 0x87e   : > { %5621 = vmatprep.subr.bf16.mxu1 %v11206_v0 }
 0x881   : > { %5622 = vmatpush3.bf16.msra.mxu1 %v7086_v59  ;;  %v7126_v59 = vld [vmem:[%s10837_s6 + $0x170] sm:$0xff]  }
 0x882   : > { %5623 = vmatprep.subr.bf16.mxu1 %v11206_v0 }
 0x885   : > { %5624 = vmatpush3.bf16.msra.mxu1 %v7087_v20  ;;  %v7127_v20 = vld [vmem:[%s10837_s6 + $0x178] sm:$0xff]  }
 0x886   : > { %5629 = vmatprep.subr.bf16.mxu1 %v11206_v0 }
 0x93a   : > { %v5388_v21 = vpop.f32.mrb[32].mxu0 }
 0x93b   : > { %v5389_v50 = vpop.f32.mrb[33].mxu0  ;;  %v5426_v47 = vpop.f32.mrb[0].mxu1 }
 0x93c   : > { %v5390_v3 = vadd.f32 %v5389_v50, %v5388_v21  ;;  %v5427_v55 = vpop.f32.mrb[1].mxu1  ;;  %v7128_v21 = vld [vmem:[%s10837_s6 + $0x180] sm:$0xff]  }
 0x93d   : > { %v5428_v14 = vadd.f32 %v5427_v55, %v5426_v47  ;;  %v7129_v47 = vld [vmem:[%s10837_s6 + $0x188] sm:$0xff]   ;;  %v7131_v55 = vld [vmem:[%s10837_s6 + $0x198] sm:$0xff]  }
 0x93f   : > { %v2824_v44 = vadd.f32 %v5428_v14, %v5390_v3  ;;  %v7130_v3 = vld [vmem:[%s10837_s6 + $0x190] sm:$0xff]   ;;  %v7132_v14 = vld [vmem:[%s10837_s6 + $0x1a0] sm:$0xff]  }
 0x941   : > { %v5391_v31 = vpop.f32.mrb[34].mxu0 }
 0x942   : > { %v5392_v25 = vpop.f32.mrb[35].mxu0 }
 0x943   : > { %v5393_v39 = vadd.f32 %v5392_v25, %v5391_v31  ;;  %v5429_v60 = vpop.f32.mrb[2].mxu1  ;;  %v7134_v31 = vld [vmem:[%s10837_s6 + $0x1b0] sm:$0xff]   ;;  %v7135_v25 = vld [vmem:[%s10837_s6 + $0x1b8] sm:$0xff]  }
 0x944   : > { %v5430_v19 = vpop.f32.mrb[3].mxu1 }
 0x945   : > { %v5431_v5 = vadd.f32 %v5430_v19, %v5429_v60  ;;  %v5608_v12 = vpop.f32.mrb[36].mxu0  ;;  %v7137_v19 = vld [vmem:[%s10837_s6 + $0x1c8] sm:$0xff]  }
 0x946   : > { %v2898_v42 = vpop.f32.mrb[37].mxu0 }
 0x947   : > { %v2829_v51 = vadd.f32 %v5431_v5, %v5393_v39  ;;  %v2899_v36 = vadd.f32 %v2898_v42, %v2824_v44  ;;  %v7133_v44 = vld [vmem:[%s10837_s6 + $0x1a8] sm:$0xff]   ;;  %v7136_v39 = vld [vmem:[%s10837_s6 + $0x1c0] sm:$0xff]   ;;  %v7138_v5 = vld [vmem:[%s10837_s6 + $0x1d0] sm:$0xff]  }
 0x948   : > { %v7140_v42 = vld [vmem:[%s10837_s6 + $0x1e0] sm:$0xff]  }
 0x949   : > { %v10181_v7 = vadd.f32 %v5608_v12, %v2829_v51  ;;  %v10183_v35 = vpack.c.bf16 %v2899_v36, %v2899_v36  ;;  %v7139_v12 = vld [vmem:[%s10837_s6 + $0x1d8] sm:$0xff]   ;;  %v7141_v51 = vld [vmem:[%s10837_s6 + $0x1e8] sm:$0xff]   ;;  %v7142_v36 = vld [vmem:[%s10837_s6 + $0x1f0] sm:$0xff]  }
 0x94b   : > { %5626 = vmatmul.mubr.bf16.vlgmr.msra.gmra.mrb[4].mxu1 %v10183_v35  ;;  %v10220_v49 = vshrl.u32 %v10183_v35, 16  ;;  %v3142_v61 = vrot.slane %v10183_v35, 1  ;;  %v3358_v9 = vrot.slane %v10183_v35, 2  ;;  %v3574_v60 = vrot.slane %v10183_v35, 3  ;;  %v7144_v35 = vld [vmem:[%s10837_s6 + $0x200] sm:$0xff]  }
 0x94c   : > { %5630 = vmatpush3.bf16.msra.mxu1 %v7088_v30  ;;  %5645 = vmatprep.mubr.msk.bf16.mxu1 %vm7317_vm11, %v11206_v0  ;;  %v7143_v30 = vld [vmem:[%s10837_s6 + $0x1f8] sm:$0xff]  }
 0x94d   : > { %5631 = vmatprep.subr.bf16.mxu1 %v11206_v0  ;;  %v3250_v63 = vrot.slane %v10220_v49, 1  ;;  %v3466_v50 = vrot.slane %v10220_v49, 2 }
 0x950   : > { %5632 = vmatpush3.bf16.msra.mxu1 %v7089_v8  ;;  %v3682_v8 = vrot.slane %v10220_v49, 3 }
 0x951   : > { %5633 = vmatprep.subr.bf16.mxu1 %v11206_v0 }
 0x954   : > { %5634 = vmatpush3.bf16.msra.mxu1 %v7090_v28  ;;  %v7145_v28 = vld [vmem:[%s10837_s6 + $0x208] sm:$0xff]  }
 0x955   : > { %5635 = vmatprep.subr.bf16.mxu1 %v11206_v0 }
 0x958   : > { %5636 = vmatpush3.bf16.msra.mxu1 %v7091_v40  ;;  %v7146_v40 = vld [vmem:[%s10837_s6 + $0x210] sm:$0xff]  }
 0x959   : > { %5637 = vmatprep.subr.bf16.mxu1 %v11206_v0 }
 0x95c   : > { %5638 = vmatpush3.bf16.msra.mxu1 %v7092_v2  ;;  %v7147_v2 = vld [vmem:[%s10837_s6 + $0x218] sm:$0xff]  }
 0x95d   : > { %5639 = vmatprep.subr.bf16.mxu1 %v11206_v0 }
 0x960   : > { %5640 = vmatpush3.bf16.msra.mxu1 %v7093_v16  ;;  %v7148_v16 = vld [vmem:[%s10837_s6 + $0x220] sm:$0xff]  }
 0x961   : > { %5641 = vmatprep.subr.bf16.mxu1 %v11206_v0 }
 0x964   : > { %5642 = vmatpush3.bf16.msra.mxu1 %v7094_v24  ;;  %v7149_v24 = vld [vmem:[%s10837_s6 + $0x228] sm:$0xff]  }
 0x965   : > { %5643 = vmatprep.subr.bf16.mxu1 %v11206_v0 }
 0x968   : > { %5644 = vmatpush3.bf16.msra.mxu1 %v7095_v32  ;;  %v7150_v32 = vld [vmem:[%s10837_s6 + $0x230] sm:$0xff]  }
 0x969   : > { %5649 = vmatprep.subr.bf16.mxu1 %v11206_v0 }
 0x96b   : > { %5646 = vmatmul.mubr.bf16.vlgmr.msra.gmra.mrb[4].mxu1 %v10220_v49  ;;  %v7152_v49 = vld [vmem:[%s10837_s6 + $0x240] sm:$0xff]  }
 0x96c   : > { %5650 = vmatpush3.bf16.msra.mxu1 %v7096_v37  ;;  %5665 = vmatprep.mubr.msk.bf16.mxu1 %vm7317_vm11, %v11206_v0  ;;  %v7151_v37 = vld [vmem:[%s10837_s6 + $0x238] sm:$0xff]  }
 0x96d   : > { %5651 = vmatprep.subr.bf16.mxu1 %v11206_v0 }
 0x970   : > { %5652 = vmatpush3.bf16.msra.mxu1 %v7097_v38  ;;  %v10469_v38 = vpack.c.bf16 %v10181_v7, %v10181_v7  ;;  %v7154_v7 = vld [vmem:[%s10837_s6 + $0x250] sm:$0xff]  }
 0x971   : > { %5653 = vmatprep.subr.bf16.mxu1 %v11206_v0 }
 0x974   : > { %5654 = vmatpush3.bf16.msra.mxu1 %v7098_v54  ;;  %v7153_v54 = vld [vmem:[%s10837_s6 + $0x248] sm:$0xff]  }
 0x975   : > { %5655 = vmatprep.subr.bf16.mxu1 %v11206_v0 }
 0x978   : > { %5656 = vmatpush3.bf16.msra.mxu1 %v7099_v1  ;;  %v7155_v1 = vld [vmem:[%s10837_s6 + $0x258] sm:$0xff]  }
 0x979   : > { %5657 = vmatprep.subr.bf16.mxu1 %v11206_v0 }
 0x97c   : > { %5658 = vmatpush3.bf16.msra.mxu1 %v7100_v18  ;;  %v7156_v18 = vld [vmem:[%s10837_s6 + $0x260] sm:$0xff]  }
 0x97d   : > { %5659 = vmatprep.subr.bf16.mxu1 %v11206_v0 }
 0x980   : > { %5660 = vmatpush3.bf16.msra.mxu1 %v7101_v48  ;;  %v7157_v48 = vld [vmem:[%s10837_s6 + $0x268] sm:$0xff]  }
 0x981   : > { %5661 = vmatprep.subr.bf16.mxu1 %v11206_v0 }
 0x984   : > { %5662 = vmatpush3.bf16.msra.mxu1 %v7102_v22  ;;  %v7158_v22 = vld [vmem:[%s10837_s6 + $0x270] sm:$0xff]  }
 0x985   : > { %5663 = vmatprep.subr.bf16.mxu1 %v11206_v0 }
 0x988   : > { %5664 = vmatpush3.bf16.msra.mxu1 %v7103_v45  ;;  %v7159_v45 = vld [vmem:[%s10837_s6 + $0x278] sm:$0xff]  }
 0x989   : > { %5669 = vmatprep.subr.bf16.mxu1 %v11206_v0 }
 0x98b   : > { %5666 = vmatmul.mubr.bf16.vlgmr.msra.gmra.mrb[4].mxu1 %v3142_v61  ;;  %v10507_v61 = vshrl.u32 %v10469_v38, 16 }
 0x98c   : > { %5670 = vmatpush3.bf16.msra.mxu1 %v7104_v26  ;;  %5685 = vmatprep.mubr.msk.bf16.mxu1 %vm7317_vm11, %v11206_v0  ;;  %v7160_v26 = vld [vmem:[%s10837_s6 + $0x280] sm:$0xff]  }
 0x98d   : > { %5671 = vmatprep.subr.bf16.mxu1 %v11206_v0 }
 0x990   : > { %5672 = vmatpush3.bf16.msra.mxu1 %v7105_v43  ;;  %v7161_v43 = vld [vmem:[%s10837_s6 + $0x288] sm:$0xff]  }
 0x991   : > { %5673 = vmatprep.subr.bf16.mxu1 %v11206_v0 }
 0x994   : > { %5674 = vmatpush3.bf16.msra.mxu1 %v7106_v13  ;;  %v7162_v13 = vld [vmem:[%s10837_s6 + $0x290] sm:$0xff]  }
 0x995   : > { %5675 = vmatprep.subr.bf16.mxu1 %v11206_v0 }
 0x998   : > { %5676 = vmatpush3.bf16.msra.mxu1 %v7107_v17  ;;  %v7163_v17 = vld [vmem:[%s10837_s6 + $0x298] sm:$0xff]  }
 0x999   : > { %5677 = vmatprep.subr.bf16.mxu1 %v11206_v0 }
 0x99c   : > { %5678 = vmatpush3.bf16.msra.mxu1 %v7108_v58  ;;  %v7164_v58 = vld [vmem:[%s10837_s6 + $0x2a0] sm:$0xff]  }
 0x99d   : > { %5679 = vmatprep.subr.bf16.mxu1 %v11206_v0 }
 0x9a0   : > { %5680 = vmatpush3.bf16.msra.mxu1 %v7109_v56  ;;  %v7165_v56 = vld [vmem:[%s10837_s6 + $0x2a8] sm:$0xff]  }
 0x9a1   : > { %5681 = vmatprep.subr.bf16.mxu1 %v11206_v0 }
 0x9a4   : > { %5682 = vmatpush3.bf16.msra.mxu1 %v7110_v52  ;;  %v7166_v52 = vld [vmem:[%s10837_s6 + $0x2b0] sm:$0xff]  }
 0x9a5   : > { %5683 = vmatprep.subr.bf16.mxu1 %v11206_v0 }
 0x9a8   : > { %5684 = vmatpush3.bf16.msra.mxu1 %v7111_v34  ;;  %v7167_v34 = vld [vmem:[%s10837_s6 + $0x2b8] sm:$0xff]  }
 0x9a9   : > { %5689 = vmatprep.subr.bf16.mxu1 %v11206_v0 }
 0x9ab   : > { %5686 = vmatmul.mubr.bf16.vlgmr.msra.gmra.mrb[4].mxu1 %v3250_v63  ;;  %v4008_v63 = vrot.slane %v10469_v38, 1 }
 0x9ac   : > { %5690 = vmatpush3.bf16.msra.mxu1 %v7112_v62  ;;  %5705 = vmatprep.mubr.msk.bf16.mxu1 %vm7317_vm11, %v11206_v0  ;;  %v7168_v62 = vld [vmem:[%s10837_s6 + $0x2c0] sm:$0xff]  }
 0x9ad   : > { %5691 = vmatprep.subr.bf16.mxu1 %v11206_v0 }
 0x9b0   : > { %5692 = vmatpush3.bf16.msra.mxu1 %v7113_v11  ;;  %v7169_v11 = vld [vmem:[%s10837_s6 + $0x2c8] sm:$0xff]  }
 0x9b1   : > { %5693 = vmatprep.subr.bf16.mxu1 %v11206_v0 }
 0x9b4   : > { %5694 = vmatpush3.bf16.msra.mxu1 %v7114_v29  ;;  %v7170_v29 = vld [vmem:[%s10837_s6 + $0x2d0] sm:$0xff]  }
 0x9b5   : > { %5695 = vmatprep.subr.bf16.mxu1 %v11206_v0 }
 0x9b8   : > { %5696 = vmatpush3.bf16.msra.mxu1 %v7115_v6  ;;  %v7171_v6 = vld [vmem:[%s10837_s6 + $0x2d8] sm:$0xff]  }
 0x9b9   : > { %5697 = vmatprep.subr.bf16.mxu1 %v11206_v0 }
 0x9bc   : > { %5698 = vmatpush3.bf16.msra.mxu1 %v7116_v10  ;;  %v7172_v10 = vld [vmem:[%s10837_s6 + $0x2e0] sm:$0xff]  }
 0x9bd   : > { %5699 = vmatprep.subr.bf16.mxu1 %v11206_v0 }
 0x9c0   : > { %5700 = vmatpush3.bf16.msra.mxu1 %v7117_v53  ;;  %v7173_v53 = vld [vmem:[%s10837_s6 + $0x2e8] sm:$0xff]  }
 0x9c1   : > { %5701 = vmatprep.subr.bf16.mxu1 %v11206_v0 }
 0x9c4   : > { %5702 = vmatpush3.bf16.msra.mxu1 %v7118_v41  ;;  %v7174_v41 = vld [vmem:[%s10837_s6 + $0x2f0] sm:$0xff]  }
 0x9c5   : > { %5703 = vmatprep.subr.bf16.mxu1 %v11206_v0 }
 0x9c8   : > { %5704 = vmatpush3.bf16.msra.mxu1 %v7119_v57  ;;  %v7175_v57 = vld [vmem:[%s10837_s6 + $0x2f8] sm:$0xff]  }
 0x9c9   : > { %5709 = vmatprep.subr.bf16.mxu1 %v11206_v0 }
 0x9cb   : > { %5706 = vmatmul.mubr.bf16.vlgmr.msra.gmra.mrb[4].mxu1 %v3358_v9  ;;  %v4116_v9 = vrot.slane %v10507_v61, 1 }
 0x9cc   : > { %5710 = vmatpush3.bf16.msra.mxu1 %v7120_v23  ;;  %5725 = vmatprep.mubr.msk.bf16.mxu1 %vm7317_vm11, %v11206_v0  ;;  %v7176_v23 = vld [vmem:[%s10837_s6 + $0x300] sm:$0xff]  }
 0x9cd   : > { %5711 = vmatprep.subr.bf16.mxu1 %v11206_v0 }
 0x9d0   : > { %5712 = vmatpush3.bf16.msra.mxu1 %v7121_v46  ;;  %v7208_v46 = vld [vmem:[%s10839_s8] sm:$0xff]  }
 0x9d1   : > { %5713 = vmatprep.subr.bf16.mxu1 %v11206_v0  ;;  %5930 = vmatpush3.bf16.msra.mxu0 %v7208_v46 }
 0x9d2   : > { %5931 = vmatprep.subr.bf16.mxu0 %v11206_v0 }
 0x9d4   : > { %5714 = vmatpush3.bf16.msra.mxu1 %v7122_v15  ;;  %v7177_v15 = vld [vmem:[%s10837_s6 + $0x308] sm:$0xff]  }
 0x9d5   : > { %5715 = vmatprep.subr.bf16.mxu1 %v11206_v0 }
 0x9d8   : > { %5716 = vmatpush3.bf16.msra.mxu1 %v7123_v27  ;;  %v7209_v27 = vld [vmem:[%s10839_s8 + $0x8] sm:$0xff]  }
 0x9d9   : > { %5717 = vmatprep.subr.bf16.mxu1 %v11206_v0  ;;  %5932 = vmatpush3.bf16.msra.mxu0 %v7209_v27 }
 0x9da   : > { %5933 = vmatprep.subr.bf16.mxu0 %v11206_v0 }
 0x9dc   : > { %5718 = vmatpush3.bf16.msra.mxu1 %v7124_v4  ;;  %v7178_v4 = vld [vmem:[%s10837_s6 + $0x310] sm:$0xff]  }
 0x9dd   : > { %5719 = vmatprep.subr.bf16.mxu1 %v11206_v0 }
 0x9e0   : > { %5720 = vmatpush3.bf16.msra.mxu1 %v7125_v33  ;;  %v7210_v33 = vld [vmem:[%s10839_s8 + $0x10] sm:$0xff]  }
 0x9e1   : > { %5721 = vmatprep.subr.bf16.mxu1 %v11206_v0  ;;  %5934 = vmatpush3.bf16.msra.mxu0 %v7210_v33 }
 0x9e2   : > { %5935 = vmatprep.subr.bf16.mxu0 %v11206_v0 }
 0x9e4   : > { %5722 = vmatpush3.bf16.msra.mxu1 %v7126_v59  ;;  %v7179_v59 = vld [vmem:[%s10837_s6 + $0x318] sm:$0xff]  }
 0x9e5   : > { %5723 = vmatprep.subr.bf16.mxu1 %v11206_v0 }
 0x9e8   : > { %5724 = vmatpush3.bf16.msra.mxu1 %v7127_v20  ;;  %v7211_v20 = vld [vmem:[%s10839_s8 + $0x18] sm:$0xff]  }
 0x9e9   : > { %5729 = vmatprep.subr.bf16.mxu1 %v11206_v0  ;;  %5936 = vmatpush3.bf16.msra.mxu0 %v7211_v20 }
 0x9ea   : > { %5937 = vmatprep.subr.bf16.mxu0 %v11206_v0 }
 0x9eb   : > { %5726 = vmatmul.mubr.bf16.vlgmr.msra.gmra.mrb[4].mxu1 %v3466_v50  ;;  %v7212_v50 = vld [vmem:[%s10839_s8 + $0x20] sm:$0xff]  }
 0x9ec   : > { %5730 = vmatpush3.bf16.msra.mxu1 %v7128_v21  ;;  %5745 = vmatprep.mubr.msk.bf16.mxu1 %vm7317_vm11, %v11206_v0  ;;  %v7180_v21 = vld [vmem:[%s10837_s6 + $0x320] sm:$0xff]  }
 0x9ed   : > { %5731 = vmatprep.subr.bf16.mxu1 %v11206_v0  ;;  %5938 = vmatpush3.bf16.msra.mxu0 %v7212_v50 }
 0x9ee   : > { %5939 = vmatprep.subr.bf16.mxu0 %v11206_v0 }
 0x9f0   : > { %5732 = vmatpush3.bf16.msra.mxu1 %v7129_v47  ;;  %v7181_v47 = vld [vmem:[%s10837_s6 + $0x328] sm:$0xff]  }
 0x9f1   : > { %5733 = vmatprep.subr.bf16.mxu1 %v11206_v0 }
 0x9f4   : > { %5734 = vmatpush3.bf16.msra.mxu1 %v7130_v3  ;;  %v7213_v3 = vld [vmem:[%s10839_s8 + $0x28] sm:$0xff]  }
 0x9f5   : > { %5735 = vmatprep.subr.bf16.mxu1 %v11206_v0  ;;  %5940 = vmatpush3.bf16.msra.mxu0 %v7213_v3 }
 0x9f6   : > { %5941 = vmatprep.subr.bf16.mxu0 %v11206_v0 }
 0x9f8   : > { %5736 = vmatpush3.bf16.msra.mxu1 %v7131_v55  ;;  %v7182_v55 = vld [vmem:[%s10837_s6 + $0x330] sm:$0xff]  }
 0x9f9   : > { %5737 = vmatprep.subr.bf16.mxu1 %v11206_v0 }
 0x9fc   : > { %5738 = vmatpush3.bf16.msra.mxu1 %v7132_v14  ;;  %v7183_v14 = vld [vmem:[%s10837_s6 + $0x338] sm:$0xff]  }
 0x9fd   : > { %5739 = vmatprep.subr.bf16.mxu1 %v11206_v0 }
 0xa00   : > { %5740 = vmatpush3.bf16.msra.mxu1 %v7133_v44  ;;  %v7184_v44 = vld [vmem:[%s10837_s6 + $0x340] sm:$0xff]  }
 0xa01   : > { %5741 = vmatprep.subr.bf16.mxu1 %v11206_v0 }
 0xa04   : > { %5742 = vmatpush3.bf16.msra.mxu1 %v7134_v31  ;;  %v4224_v31 = vrot.slane %v10469_v38, 2 }
 0xa05   : > { %5743 = vmatprep.subr.bf16.mxu1 %v11206_v0 }
 0xa08   : > { %5744 = vmatpush3.bf16.msra.mxu1 %v7135_v25  ;;  %v7185_v25 = vld [vmem:[%s10837_s6 + $0x348] sm:$0xff]  }
 0xa09   : > { %5749 = vmatprep.subr.bf16.mxu1 %v11206_v0 }
 0xa0b   : > { %5746 = vmatmul.mubr.bf16.vlgmr.msra.gmra.mrb[4].mxu1 %v3574_v60  ;;  %v7187_v60 = vld [vmem:[%s10837_s6 + $0x358] sm:$0xff]  }
 0xa0c   : > { %5750 = vmatpush3.bf16.msra.mxu1 %v7136_v39  ;;  %5765 = vmatprep.mubr.msk.bf16.mxu1 %vm7317_vm11, %v11206_v0  ;;  %v7186_v39 = vld [vmem:[%s10837_s6 + $0x350] sm:$0xff]  }
 0xa0d   : > { %5751 = vmatprep.subr.bf16.mxu1 %v11206_v0 }
 0xa10   : > { %5752 = vmatpush3.bf16.msra.mxu1 %v7137_v19  ;;  %v7188_v19 = vld [vmem:[%s10837_s6 + $0x360] sm:$0xff]  }
 0xa11   : > { %5753 = vmatprep.subr.bf16.mxu1 %v11206_v0 }
 0xa14   : > { %5754 = vmatpush3.bf16.msra.mxu1 %v7138_v5  ;;  %v7189_v5 = vld [vmem:[%s10837_s6 + $0x368] sm:$0xff]  }
 0xa15   : > { %5755 = vmatprep.subr.bf16.mxu1 %v11206_v0 }
 0xa18   : > { %5756 = vmatpush3.bf16.msra.mxu1 %v7139_v12  ;;  %v7190_v12 = vld [vmem:[%s10837_s6 + $0x370] sm:$0xff]  }
 0xa19   : > { %5757 = vmatprep.subr.bf16.mxu1 %v11206_v0 }
 0xa1c   : > { %5758 = vmatpush3.bf16.msra.mxu1 %v7140_v42  ;;  %v7191_v42 = vld [vmem:[%s10837_s6 + $0x378] sm:$0xff]  }
 0xa1d   : > { %5759 = vmatprep.subr.bf16.mxu1 %v11206_v0 }
 0xa20   : > { %5760 = vmatpush3.bf16.msra.mxu1 %v7141_v51  ;;  %v7192_v51 = vld [vmem:[%s10837_s6 + $0x380] sm:$0xff]  }
 0xa21   : > { %5761 = vmatprep.subr.bf16.mxu1 %v11206_v0 }
 0xa24   : > { %5762 = vmatpush3.bf16.msra.mxu1 %v7142_v36  ;;  %v4332_v36 = vrot.slane %v10507_v61, 2 }
 0xa25   : > { %5763 = vmatprep.subr.bf16.mxu1 %v11206_v0 }
 0xa28   : > { %5764 = vmatpush3.bf16.msra.mxu1 %v7143_v30  ;;  %v7193_v30 = vld [vmem:[%s10837_s6 + $0x388] sm:$0xff]  }
 0xa29   : > { %5769 = vmatprep.subr.bf16.mxu1 %v11206_v0 }
 0xa2b   : > { %5766 = vmatmul.mubr.bf16.vlgmr.msra.gmra.mrb[4].mxu1 %v3682_v8  ;;  %v7195_v8 = vld [vmem:[%s10837_s6 + $0x398] sm:$0xff]  }
 0xa2c   : > { %5770 = vmatpush3.bf16.msra.mxu1 %v7144_v35  ;;  %5785 = vmatprep.mubr.msk.bf16.mxu1 %vm7317_vm11, %v11206_v0  ;;  %v7194_v35 = vld [vmem:[%s10837_s6 + $0x390] sm:$0xff]  }
 0xa2d   : > { %5771 = vmatprep.subr.bf16.mxu1 %v11206_v0 }
 0xa30   : > { %5772 = vmatpush3.bf16.msra.mxu1 %v7145_v28  ;;  %v7196_v28 = vld [vmem:[%s10837_s6 + $0x3a0] sm:$0xff]  }
 0xa31   : > { %5773 = vmatprep.subr.bf16.mxu1 %v11206_v0 }
 0xa34   : > { %5774 = vmatpush3.bf16.msra.mxu1 %v7146_v40  ;;  %v7197_v40 = vld [vmem:[%s10837_s6 + $0x3a8] sm:$0xff]  }
 0xa35   : > { %5775 = vmatprep.subr.bf16.mxu1 %v11206_v0 }
 0xa38   : > { %5776 = vmatpush3.bf16.msra.mxu1 %v7147_v2  ;;  %v7198_v2 = vld [vmem:[%s10837_s6 + $0x3b0] sm:$0xff]  }
 0xa39   : > { %5777 = vmatprep.subr.bf16.mxu1 %v11206_v0 }
 0xa3c   : > { %5778 = vmatpush3.bf16.msra.mxu1 %v7148_v16  ;;  %v7199_v16 = vld [vmem:[%s10837_s6 + $0x3b8] sm:$0xff]  }
 0xa3d   : > { %5779 = vmatprep.subr.bf16.mxu1 %v11206_v0 }
 0xa40   : > { %5780 = vmatpush3.bf16.msra.mxu1 %v7149_v24  ;;  %v7200_v24 = vld [vmem:[%s10837_s6 + $0x3c0] sm:$0xff]  }
 0xa41   : > { %5781 = vmatprep.subr.bf16.mxu1 %v11206_v0 }
 0xa44   : > { %5782 = vmatpush3.bf16.msra.mxu1 %v7150_v32  ;;  %v4440_v32 = vrot.slane %v10469_v38, 3 }
 0xa45   : > { %5783 = vmatprep.subr.bf16.mxu1 %v11206_v0 }
 0xa48   : > { %5784 = vmatpush3.bf16.msra.mxu1 %v7151_v37  ;;  %v7201_v37 = vld [vmem:[%s10837_s6 + $0x3c8] sm:$0xff]  }
 0xa49   : > { %5789 = vmatprep.subr.bf16.mxu1 %v11206_v0 }
 0xa4b   : > { %5786 = vmatmul.mubr.bf16.vlgmr.msra.gmra.mrb[4].mxu1 %v10469_v38  ;;  %v7203_v38 = vld [vmem:[%s10837_s6 + $0x3d8] sm:$0xff]  }
 0xa4c   : > { %5790 = vmatpush3.bf16.msra.mxu1 %v7152_v49  ;;  %5805 = vmatprep.mubr.msk.bf16.mxu1 %vm7317_vm11, %v11206_v0  ;;  %v7202_v49 = vld [vmem:[%s10837_s6 + $0x3d0] sm:$0xff]  }
 0xa4d   : > { %5791 = vmatprep.subr.bf16.mxu1 %v11206_v0 }
 0xa50   : > { %5792 = vmatpush3.bf16.msra.mxu1 %v7153_v54  ;;  %v7204_v54 = vld [vmem:[%s10837_s6 + $0x3e0] sm:$0xff]  }
 0xa51   : > { %5793 = vmatprep.subr.bf16.mxu1 %v11206_v0 }
 0xa54   : > { %5794 = vmatpush3.bf16.msra.mxu1 %v7154_v7  ;;  %v7205_v7 = vld [vmem:[%s10837_s6 + $0x3e8] sm:$0xff]  }
 0xa55   : > { %5795 = vmatprep.subr.bf16.mxu1 %v11206_v0 }
 0xa58   : > { %5796 = vmatpush3.bf16.msra.mxu1 %v7155_v1  ;;  %v7206_v1 = vld [vmem:[%s10837_s6 + $0x3f0] sm:$0xff]  }
 0xa59   : > { %5797 = vmatprep.subr.bf16.mxu1 %v11206_v0 }
 0xa5c   : > { %5798 = vmatpush3.bf16.msra.mxu1 %v7156_v18  ;;  %v7207_v18 = vld [vmem:[%s10837_s6 + $0x3f8] sm:$0xff]  }
 0xa5d   : > { %5799 = vmatprep.subr.bf16.mxu1 %v11206_v0 }
 0xa60   : > { %5800 = vmatpush3.bf16.msra.mxu1 %v7157_v48  ;;  %v4548_v48 = vrot.slane %v10507_v61, 3 }
 0xa61   : > { %5801 = vmatprep.subr.bf16.mxu1 %v11206_v0 }
 0xa64   : > { %5802 = vmatpush3.bf16.msra.mxu1 %v7158_v22  ;;  %v7214_v22 = vld [vmem:[%s10839_s8 + $0x30] sm:$0xff]  }
 0xa65   : > { %5803 = vmatprep.subr.bf16.mxu1 %v11206_v0  ;;  %5942 = vmatpush3.bf16.msra.mxu0 %v7214_v22 }
 0xa66   : > { %5943 = vmatprep.subr.bf16.mxu0 %v11206_v0 }
 0xa68   : > { %5804 = vmatpush3.bf16.msra.mxu1 %v7159_v45  ;;  %v7215_v45 = vld [vmem:[%s10839_s8 + $0x38] ss:$0 sps:$4 sm:$0xff]  }
 0xa69   : > { %5809 = vmatprep.subr.bf16.mxu1 %v11206_v0 }
 0xa6b   : > { %5806 = vmatmul.mubr.bf16.vlgmr.msra.gmra.mrb[4].mxu1 %v10507_v61  ;;  %v2907_v61 = vld [vmem:[%s10838_s7] sm:$0x1] }
 0xa6c   : > { %5810 = vmatpush3.bf16.msra.mxu1 %v7160_v26  ;;  %5825 = vmatprep.mubr.msk.bf16.mxu1 %vm7317_vm11, %v11206_v0  ;;  %v4707_v26 = vsel %vm4705_vm14, %v7215_v45, 0 }
 0xa6d   : > { %5811 = vmatprep.subr.bf16.mxu1 %v11206_v0  ;;  %5944 = vmatpush3.bf16.msra.mxu0 %v4707_v26 }
 0xa6e   : > { %5949 = vmatprep.subr.bf16.mxu0 %v11206_v0 }
 0xa70   : > { %5812 = vmatpush3.bf16.msra.mxu1 %v7161_v43 }
 0xa71   : > { %5813 = vmatprep.subr.bf16.mxu1 %v11206_v0 }
 0xa74   : > { %5814 = vmatpush3.bf16.msra.mxu1 %v7162_v13 }
 0xa75   : > { %5815 = vmatprep.subr.bf16.mxu1 %v11206_v0 }
 0xa78   : > { %5816 = vmatpush3.bf16.msra.mxu1 %v7163_v17 }
 0xa79   : > { %5817 = vmatprep.subr.bf16.mxu1 %v11206_v0 }
 0xa7c   : > { %5818 = vmatpush3.bf16.msra.mxu1 %v7164_v58 }
 0xa7d   : > { %5819 = vmatprep.subr.bf16.mxu1 %v11206_v0 }
 0xa80   : > { %5820 = vmatpush3.bf16.msra.mxu1 %v7165_v56 }
 0xa81   : > { %5821 = vmatprep.subr.bf16.mxu1 %v11206_v0 }
 0xa84   : > { %5822 = vmatpush3.bf16.msra.mxu1 %v7166_v52 }
 0xa85   : > { %5823 = vmatprep.subr.bf16.mxu1 %v11206_v0 }
 0xa88   : > { %5824 = vmatpush3.bf16.msra.mxu1 %v7167_v34  ;;  %v7216_v34 = vld [vmem:[%s10841_s10] sm:$0xff]  }
 0xa89   : > { %5829 = vmatprep.subr.bf16.mxu1 %v11206_v0 }
 0xa8b   : > { %5826 = vmatmul.mubr.bf16.vlgmr.msra.gmra.mrb[4].mxu1 %v4008_v63  ;;  %v7217_v63 = vld [vmem:[%s10841_s10 + $0x8] sm:$0xff]  }
 0xa8c   : > { %5830 = vmatpush3.bf16.msra.mxu1 %v7168_v62  ;;  %5845 = vmatprep.mubr.msk.bf16.mxu1 %vm7317_vm11, %v11206_v0 }
 0xa8d   : > { %5831 = vmatprep.subr.bf16.mxu1 %v11206_v0 }
 0xa90   : > { %5832 = vmatpush3.bf16.msra.mxu1 %v7169_v11  ;;  %v7218_v11 = vld [vmem:[%s10841_s10 + $0x10] sm:$0xff]  }
 0xa91   : > { %5833 = vmatprep.subr.bf16.mxu1 %v11206_v0 }
 0xa94   : > { %5834 = vmatpush3.bf16.msra.mxu1 %v7170_v29  ;;  %v7219_v29 = vld [vmem:[%s10841_s10 + $0x18] sm:$0xff]  }
 0xa95   : > { %5835 = vmatprep.subr.bf16.mxu1 %v11206_v0 }
 0xa98   : > { %5836 = vmatpush3.bf16.msra.mxu1 %v7171_v6  ;;  %v7220_v6 = vld [vmem:[%s10841_s10 + $0x20] sm:$0xff]  }
 0xa99   : > { %5837 = vmatprep.subr.bf16.mxu1 %v11206_v0 }
 0xa9c   : > { %5838 = vmatpush3.bf16.msra.mxu1 %v7172_v10  ;;  %v7221_v10 = vld [vmem:[%s10841_s10 + $0x28] ss:$0 sps:$4 sm:$0x33]  }
 0xa9d   : > { %5839 = vmatprep.subr.bf16.mxu1 %v11206_v0 }
 0xaa0   : > { %5840 = vmatpush3.bf16.msra.mxu1 %v7173_v53 }
 0xaa1   : > { %5841 = vmatprep.subr.bf16.mxu1 %v11206_v0 }
 0xaa4   : > { %5842 = vmatpush3.bf16.msra.mxu1 %v7174_v41  ;;  %v4656_v41 = vld [vmem:[%s10840_s9] sm:$0x1] }
 0xaa5   : > { %5843 = vmatprep.subr.bf16.mxu1 %v11206_v0 }
 0xaa8   : > { %5844 = vmatpush3.bf16.msra.mxu1 %v7175_v57 }
 0xaa9   : > { %5849 = vmatprep.subr.bf16.mxu1 %v11206_v0 }
 0xaab   : > { %5846 = vmatmul.mubr.bf16.vlgmr.msra.gmra.mrb[4].mxu1 %v4116_v9 }
 0xaac   : > { %5850 = vmatpush3.bf16.msra.mxu1 %v7176_v23  ;;  %5865 = vmatprep.mubr.msk.bf16.mxu1 %vm7317_vm11, %v11206_v0 }
 0xaad   : > { %5851 = vmatprep.subr.bf16.mxu1 %v11206_v0 }
 0xab0   : > { %5852 = vmatpush3.bf16.msra.mxu1 %v7177_v15 }
 0xab1   : > { %5853 = vmatprep.subr.bf16.mxu1 %v11206_v0 }
 0xab4   : > { %5854 = vmatpush3.bf16.msra.mxu1 %v7178_v4  ;;  %v4762_v4 = vld [vmem:[%s10842_s11] sm:$0x1] }
 0xab5   : > { %5855 = vmatprep.subr.bf16.mxu1 %v11206_v0 }
 0xab8   : > { %5856 = vmatpush3.bf16.msra.mxu1 %v7179_v59 }
 0xab9   : > { %5857 = vmatprep.subr.bf16.mxu1 %v11206_v0 }
 0xabc   : > { %5858 = vmatpush3.bf16.msra.mxu1 %v7180_v21 }
 0xabd   : > { %5859 = vmatprep.subr.bf16.mxu1 %v11206_v0 }
 0xac0   : > { %5860 = vmatpush3.bf16.msra.mxu1 %v7181_v47 }
 0xac1   : > { %5861 = vmatprep.subr.bf16.mxu1 %v11206_v0 }
 0xac4   : > { %5862 = vmatpush3.bf16.msra.mxu1 %v7182_v55 }
 0xac5   : > { %5863 = vmatprep.subr.bf16.mxu1 %v11206_v0 }
 0xac8   : > { %5864 = vmatpush3.bf16.msra.mxu1 %v7183_v14 }
 0xac9   : > { %5869 = vmatprep.subr.bf16.mxu1 %v11206_v0 }
 0xacb   : > { %5866 = vmatmul.mubr.bf16.vlgmr.msra.gmra.mrb[4].mxu1 %v4224_v31 }
 0xacc   : > { %5870 = vmatpush3.bf16.msra.mxu1 %v7184_v44  ;;  %5885 = vmatprep.mubr.msk.bf16.mxu1 %vm7317_vm11, %v11206_v0 }
 0xacd   : > { %5871 = vmatprep.subr.bf16.mxu1 %v11206_v0 }
 0xad0   : > { %5872 = vmatpush3.bf16.msra.mxu1 %v7185_v25 }
 0xad1   : > { %5873 = vmatprep.subr.bf16.mxu1 %v11206_v0 }
 0xad4   : > { %5874 = vmatpush3.bf16.msra.mxu1 %v7186_v39 }
 0xad5   : > { %5875 = vmatprep.subr.bf16.mxu1 %v11206_v0 }
 0xad8   : > { %5876 = vmatpush3.bf16.msra.mxu1 %v7187_v60 }
 0xad9   : > { %5877 = vmatprep.subr.bf16.mxu1 %v11206_v0 }
 0xadc   : > { %5878 = vmatpush3.bf16.msra.mxu1 %v7188_v19 }
 0xadd   : > { %5879 = vmatprep.subr.bf16.mxu1 %v11206_v0 }
 0xae0   : > { %5880 = vmatpush3.bf16.msra.mxu1 %v7189_v5 }
 0xae1   : > { %5881 = vmatprep.subr.bf16.mxu1 %v11206_v0 }
 0xae4   : > { %5882 = vmatpush3.bf16.msra.mxu1 %v7190_v12 }
 0xae5   : > { %5883 = vmatprep.subr.bf16.mxu1 %v11206_v0 }
 0xae8   : > { %5884 = vmatpush3.bf16.msra.mxu1 %v7191_v42 }
 0xae9   : > { %5889 = vmatprep.subr.bf16.mxu1 %v11206_v0 }
 0xaeb   : > { %5886 = vmatmul.mubr.bf16.vlgmr.msra.gmra.mrb[4].mxu1 %v4332_v36 }
 0xaec   : > { %5890 = vmatpush3.bf16.msra.mxu1 %v7192_v51  ;;  %5905 = vmatprep.mubr.msk.bf16.mxu1 %vm7317_vm11, %v11206_v0 }
 0xaed   : > { %5891 = vmatprep.subr.bf16.mxu1 %v11206_v0 }
 0xaf0   : > { %5892 = vmatpush3.bf16.msra.mxu1 %v7193_v30 }
 0xaf1   : > { %5893 = vmatprep.subr.bf16.mxu1 %v11206_v0 }
 0xaf4   : > { %5894 = vmatpush3.bf16.msra.mxu1 %v7194_v35 }
 0xaf5   : > { %5895 = vmatprep.subr.bf16.mxu1 %v11206_v0 }
 0xaf8   : > { %5896 = vmatpush3.bf16.msra.mxu1 %v7195_v8 }
 0xaf9   : > { %5897 = vmatprep.subr.bf16.mxu1 %v11206_v0 }
 0xafc   : > { %5898 = vmatpush3.bf16.msra.mxu1 %v7196_v28 }
 0xafd   : > { %5899 = vmatprep.subr.bf16.mxu1 %v11206_v0 }
 0xb00   : > { %5900 = vmatpush3.bf16.msra.mxu1 %v7197_v40 }
 0xb01   : > { %5901 = vmatprep.subr.bf16.mxu1 %v11206_v0 }
 0xb04   : > { %5902 = vmatpush3.bf16.msra.mxu1 %v7198_v2 }
 0xb05   : > { %5903 = vmatprep.subr.bf16.mxu1 %v11206_v0 }
 0xb08   : > { %5904 = vmatpush3.bf16.msra.mxu1 %v7199_v16 }
 0xb09   : > { %5909 = vmatprep.subr.bf16.mxu1 %v11206_v0 }
 0xb0b   : > { %5906 = vmatmul.mubr.bf16.vlgmr.msra.gmra.mrb[4].mxu1 %v4440_v32 }
 0xb0c   : > { %5910 = vmatpush3.bf16.msra.mxu1 %v7200_v24  ;;  %5925 = vmatprep.mubr.msk.bf16.mxu1 %vm7317_vm11, %v11206_v0 }
 0xb0d   : > { %5911 = vmatprep.subr.bf16.mxu1 %v11206_v0 }
 0xb10   : > { %5912 = vmatpush3.bf16.msra.mxu1 %v7201_v37 }
 0xb11   : > { %5913 = vmatprep.subr.bf16.mxu1 %v11206_v0 }
 0xb14   : > { %5914 = vmatpush3.bf16.msra.mxu1 %v7202_v49 }
 0xb15   : > { %5915 = vmatprep.subr.bf16.mxu1 %v11206_v0 }
 0xb18   : > { %5916 = vmatpush3.bf16.msra.mxu1 %v7203_v38 }
 0xb19   : > { %5917 = vmatprep.subr.bf16.mxu1 %v11206_v0 }
 0xb1c   : > { %5918 = vmatpush3.bf16.msra.mxu1 %v7204_v54 }
 0xb1d   : > { %5919 = vmatprep.subr.bf16.mxu1 %v11206_v0 }
 0xb20   : > { %5920 = vmatpush3.bf16.msra.mxu1 %v7205_v7 }
 0xb21   : > { %5921 = vmatprep.subr.bf16.mxu1 %v11206_v0 }
 0xb24   : > { %5922 = vmatpush3.bf16.msra.mxu1 %v7206_v1 }
 0xb25   : > { %5923 = vmatprep.subr.bf16.mxu1 %v11206_v0 }
 0xb28   : > { %5924 = vmatpush3.bf16.msra.mxu1 %v7207_v18 }
 0xb2b   : > { %5926 = vmatmul.mubr.bf16.vlgmr.msra.gmra.mrb[4].mxu1 %v4548_v48 }
 0xbfe   : > { %v4632_v43 = vpop.f32.mrb[4].mxu1 }
 0xbff   : > { %v6037_v13 = vadd.f32 %v4632_v43, %v2907_v61  ;;  %v5927_v17 = vpop.f32.mrb[5].mxu1 }
 0xc00   : > { %v4635_v58 = vpop.f32.mrb[6].mxu1 }
 0xc01   : > { %v4639_v56 = vmax.f32 %v6037_v13, 0.0  ;;  %v5928_v52 = vpop.f32.mrb[7].mxu1 }
 0xc03   : > { %v4640_v62 = vpack.c.bf16 %v4639_v56, %v4639_v56 }
 0xc05   : > { %5946 = vmatmul.mubr.msk.bf16.vlgmr.msra.gmra.mrb[40].mxu0 %vm1916_vm1, %v4640_v62  ;;  %vm4800_vm1 = vcmask 1041408  }
 0xc06   : > { %5950 = vmatpush3.bf16.msra.mxu0 %v7216_v34  ;;  %5961 = vmatprep.mubr.msk.bf16.mxu0 %vm7317_vm11, %v11206_v0  ;;  %v4802_v53 = vsel %vm4800_vm1, %v7221_v10, 0 }
 0xc07   : > { %5951 = vmatprep.subr.bf16.mxu0 %v11206_v0 }
 0xc0a   : > { %5952 = vmatpush3.bf16.msra.mxu0 %v7217_v63 }
 0xc0b   : > { %5953 = vmatprep.subr.bf16.mxu0 %v11206_v0 }
 0xc0e   : > { %5954 = vmatpush3.bf16.msra.mxu0 %v7218_v11 }
 0xc0f   : > { %5955 = vmatprep.subr.bf16.mxu0 %v11206_v0 }
 0xc12   : > { %5956 = vmatpush3.bf16.msra.mxu0 %v7219_v29 }
 0xc13   : > { %5957 = vmatprep.subr.bf16.mxu0 %v11206_v0 }
 0xc16   : > { %5958 = vmatpush3.bf16.msra.mxu0 %v7220_v6 }
 0xc17   : > { %5959 = vmatprep.subr.bf16.mxu0 %v11206_v0 }
 0xc1a   : > { %5960 = vmatpush3.bf16.msra.mxu0 %v4802_v53 }
 0xcd8   : > { %v4743_v57 = vpop.f32.mrb[40].mxu0 }
 0xcd9   : > { %v4744_v23 = vadd.f32 %v4743_v57, %v4656_v41  ;;  %v5947_v9 = vpop.f32.mrb[41].mxu0 }
 0xcda   : > { %v4746_v46 = vpop.f32.mrb[42].mxu0 }
 0xcdb   : > { %v4749_v15 = vmax.f32 %v4744_v23, 0.0  ;;  %v5948_v27 = vpop.f32.mrb[43].mxu0 }
 0xcdd   : > { %v4750_v0 = vpack.c.bf16 %v4749_v15, %v4749_v15 }
 0xcdf   : > { %5962 = vmatmul.mubr.msk.bf16.vlgmr.msra.gmra.mrb[44].mxu0 %vm4796_vm4, %v4750_v0 }
 0xdb2   : > { %v4838_v33 = vpop.f32.mrb[44].mxu0 }
 0xdb3   : > { %v4839_v59 = vadd.f32 %v4838_v33, %v4762_v4  ;;  %v5963_v20 = vpop.f32.mrb[45].mxu0 }
 0xdb4   : > { %v4841_v21 = vpop.f32.mrb[46].mxu0 }
 0xdb5   : > { %v5964_v50 = vpop.f32.mrb[47].mxu0  ;;  %4845 = vst.msk [vmem:[%s405_s12] sm:$0x1] %vm4844_vm5, %v4839_v59 }
 0xdb6   : > { %7242 = shalt.err (!%p7239_p3)
}
 0xdb7   : > { %s7243_s16 = scalar_lea.hbm %s10789_s26, 16  ;;  %s7247_s23 = scalar_lea.hbm %s11211_s20, 32 }
 0xdb8   : > { %p7244_p4 = scmp.ne.s32.totalorder %s10789_s26, %s7243_s16  ;;  %p7248_p9 = scmp.lt.u32.totalorder %s10789_s26, %s11211_s20 }
 0xdb9   : > { %p7249_p10 = scmp.lt.u32.totalorder %s7247_s23, %s7243_s16  ;;  %p7251_p12 = scmp.lt.u32.totalorder %s7243_s16, %s10789_s26 }
 0xdba   : > { %p7245_p7 = pnand %p7244_p4, %p7422_p5 }
 0xdbb   : > { %p7250_p11 = por %p7249_p10, %p7248_p9 }
 0xdbc   : > { %p7246_p8 = pneg %p7245_p7 }
 0xdbd   : > { %p7252_p13 = por %p7251_p12, %p7250_p11 }
 0xdbf   : > { %p7253_p0 = pnand %p7252_p13, %p7246_p8 }
 0xdc1   : > { %7256 = shalt.err (!%p7253_p0)
}
 0xdc2   : > { %6099 = dma.vmem_to_hbm [thread:$0]  (%p7422_p5), %s10791_s30, 16, %s10789_s26, %s4847_s25  }
 0xdc3 PF: > { %s11212_s1 = sld [smem:[#allocation7_spill]]  ;;  %s11213_s0 = sld [smem:[#allocation5_spill]] }
 0xdc9   : > { %p6105_p1 = scmp.ge.s32.totalorder %s11212_s1, 2  ;;  %s4871_s19 = sand.u32 1, %s11213_s0  }
 0xdca   : > { %s4872_s24 = scalar_lea.sflag [#allocation3], %s4871_s19 }
 0xdcb   : > { %p6102_p2 = pnand %p6105_p1, %p7426_p6 }
 0xdcd   : > { %7274 = dma.done.wait (!%p6102_p2), %s4872_s24, 16  }
 0xdce   : > { %7276 = vsyncadd (!%p6102_p2), %s4872_s24, 4294967280  ;;  %s11215_s24 = sld [smem:[#allocation8_spill]]  ;;  %s11216_s28 = sld [smem:[#allocation6_spill]] }
 0xdcf   : > { %s11217_s23 = sld [smem:[#allocation9_spill]]  ;;  %s11218_s21 = smov %s7283_s22 }
 0xdd4   : > { %p22_p3 = scmp.ge.s32.totalorder %s11215_s24, 4   ;;  %s11219_s22 = smov %s11216_s28 }
 0xdd6   :  { %24 = sbr.rel (!%p22_p3) target bundleno = 7 (0x7), region = 118 }
 0xddd   :  { %4876 = vsyncpa [#allocation3], 1 }
 0xdde   :  { %4878 = vsyncpa [#allocation3 + $0x1], 1 }

</bundles_post_ra>
